<compile_context>
chip_gen: v7x
topology: tpu7x:2x2x1
jax: 0.10.0
libtpu: 0.0.40
codegen_flags: <defaults>
</compile_context>

<pallas_src>
import functools

import jax
import jax.numpy as jnp
from jax import lax
from jax.experimental import pallas as pl
from jax.experimental.pallas import tpu as pltpu

_TILE_M = 1024                    # rows per grid step for the final strided conv
_VMEM_LIMIT = 16 * 1024 * 1024    # ample headroom over the ~2 MiB actual footprint
_EPS = 1e-5
_NEG_SLOPE = 0.01                 # PyTorch LeakyReLU default


def _round_up(x, m):
    return (x + m - 1) // m * m


# ----------------------------- Pallas kernels -------------------------------

def _fused_two_stage_kernel(x_ref, t1_ref, t2_ref, g_ref, mask_ref,
                            g1_ref, b1_ref, g2_ref, b2_ref,
                            o_ref, ext_ref, *, hp, mg, rp, cnt):
    """conv1(3x3x3) -> BN -> LeakyReLU -> conv2(3x3x3) -> BN -> LeakyReLU, all in VMEM.

    Layout: rows = (n, d_pad, h_pad) (zero rows at D/H padding positions + a zero row
    margin of `mg` at both ends), lanes = (w, channel).  A 3x3x3 conv is then
        z[r] = sum_{a,b in 0..2} X[r + (a-1)*hp + (b-1)] @ T[a*3+b]
    where T folds the 3 W-taps (with W zero-padding) and channel mixing.
    """
    mask = mask_ref[...]                                   # (rp, 1) 1.0 on interior rows
    inv = 1.0 / float(cnt)

    # ---- stage 1: conv1 as 9 row-shifted matmuls (MXU), f32 accumulation ----
    z = jnp.zeros(o_ref.shape, jnp.float32)
    for a in range(3):
        for b in range(3):
            off = mg + (a - 1) * hp + (b - 1)              # static row offset
            z = z + jnp.dot(x_ref[off:off + rp, :], t1_ref[a * 3 + b],
                            preferred_element_type=jnp.float32)

    # ---- BN1 (batch stats over interior rows) + LeakyReLU ----
    zm = z * mask
    s = jnp.sum(zm, axis=0, keepdims=True)                 # (1, W*O) per-lane sums
    ss = jnp.sum(zm * zm, axis=0, keepdims=True)
    cs = jnp.dot(s, g_ref[...], preferred_element_type=jnp.float32)    # per-channel, re-tiled
    css = jnp.dot(ss, g_ref[...], preferred_element_type=jnp.float32)
    mean = cs * inv
    var = css * inv - mean * mean
    sc1 = g1_ref[...] * lax.rsqrt(var + _EPS)              # rsqrt -> EUP slot
    sh1 = b1_ref[...] - mean * sc1
    h1 = z * sc1 + sh1
    h1 = jnp.where(h1 >= 0, h1, _NEG_SLOPE * h1)
    h1 = h1 * mask                                         # zero boundary rows for conv2

    # ---- stage 2: embed h1 into the margin-extended scratch, conv2 + BN2 + LReLU ----
    ext_ref[...] = jnp.zeros_like(ext_ref)
    ext_ref[mg:mg + rp, :] = h1
    z2 = jnp.zeros(o_ref.shape, jnp.float32)
    for a in range(3):
        for b in range(3):
            off = mg + (a - 1) * hp + (b - 1)
            z2 = z2 + jnp.dot(ext_ref[off:off + rp, :], t2_ref[a * 3 + b],
                              preferred_element_type=jnp.float32)

    z2m = z2 * mask
    s2 = jnp.sum(z2m, axis=0, keepdims=True)
    ss2 = jnp.sum(z2m * z2m, axis=0, keepdims=True)
    cs2 = jnp.dot(s2, g_ref[...], preferred_element_type=jnp.float32)
    css2 = jnp.dot(ss2, g_ref[...], preferred_element_type=jnp.float32)
    mean2 = cs2 * inv
    var2 = css2 * inv - mean2 * mean2
    sc2 = g2_ref[...] * lax.rsqrt(var2 + _EPS)
    sh2 = b2_ref[...] - mean2 * sc2
    y2 = z2 * sc2 + sh2
    o_ref[...] = jnp.where(y2 >= 0, y2, _NEG_SLOPE * y2)


def _matmul_bias_kernel(p_ref, w_ref, b_ref, o_ref):
    """Final strided conv: patches @ W + bias (no BN / activation)."""
    z = jnp.dot(p_ref[...], w_ref[...], preferred_element_type=jnp.float32)
    o_ref[...] = (z + b_ref[...]).astype(o_ref.dtype)


# ------------------------------- host-side prep ------------------------------

def _build_toeplitz(w, width):
    """w: (O, Ci, 3, 3, 3) -> (9, width*Ci, width*O) Toeplitz blocks (W-taps folded in)."""
    blocks = []
    for a in range(3):
        for b in range(3):
            t = jnp.zeros((width * w.shape[1], width * w.shape[0]), jnp.float32)
            for c in range(3):
                sel = jnp.eye(width, width, k=1 - c, dtype=jnp.float32)
                t = t + jnp.kron(sel, w[:, :, a, b, c].T)
            blocks.append(t)
    return jnp.stack(blocks, axis=0)


def _interior_mask(n, d, h):
    dp, hp = d + 2, h + 2
    di = jnp.arange(dp)
    hi = jnp.arange(hp)
    m2 = ((di >= 1) & (di <= d))[:, None] & ((hi >= 1) & (hi <= h))[None, :]
    m = jnp.broadcast_to(m2[None], (n, dp, hp)).reshape(n * dp * hp, 1)
    return m.astype(jnp.float32)


def _to_rows(x_ndhwc, mg):
    """(N, D, H, W, C) -> (mg + N*(D+2)*(H+2) + mg, W*C) with zero pad/margin rows."""
    n, d, h, w, c = x_ndhwc.shape
    xr = x_ndhwc.reshape(n, d, h, w * c)
    xr = jnp.pad(xr, ((0, 0), (1, 1), (1, 1), (0, 0)))
    xr = xr.reshape(n * (d + 2) * (h + 2), w * c)
    return jnp.pad(xr, ((mg, mg), (0, 0)))


def _im2col_ndhwc(x, ksize, pad, stride):
    """x: [N, D, H, W, C] -> patches [N*Do*Ho*Wo, kD*kH*kW*C] (column order: kd, kh, kw, ci)."""
    kd, kh, kw = ksize
    pd, ph, pw = pad
    sd, sh, sw = stride
    n, d, h, w, c = x.shape
    do = (d + 2 * pd - kd) // sd + 1
    ho = (h + 2 * ph - kh) // sh + 1
    wo = (w + 2 * pw - kw) // sw + 1
    xp = jnp.pad(x, ((0, 0), (pd, pd), (ph, ph), (pw, pw), (0, 0)))
    taps = []
    for a in range(kd):
        for b in range(kh):
            for cc in range(kw):
                taps.append(xp[:, a:a + do * sd:sd, b:b + ho * sh:sh, cc:cc + wo * sw:sw, :])
    pat = jnp.stack(taps, axis=4)
    pat = pat.reshape(n * do * ho * wo, kd * kh * kw * c)
    return pat, (n, do, ho, wo)


def _compiler_params(semantics):
    return pltpu.CompilerParams(dimension_semantics=semantics,
                                vmem_limit_bytes=_VMEM_LIMIT)


# ------------------------------- stage wrappers -------------------------------

def _fused_conv_bn_stage12(x_ndhwc, w1, g1, bt1, w2, g2, bt2):
    """Two fused conv3x3x3 -> BN -> LeakyReLU stages in a single pallas_call."""
    n, d, h, w, cin = x_ndhwc.shape
    cout = w1.shape[0]
    dp, hp = d + 2, h + 2
    rp = n * dp * hp                       # padded-position rows
    mg = _round_up(hp + 1, 8)              # zero row margin (sublane-aligned store offset)
    lw1 = w * cin                          # input lanes  (w, ci)
    lw2 = w * cout                         # output lanes (w, o)

    x_ext = _to_rows(x_ndhwc, mg)                                       # (rp + 2*mg, lw1)
    t1 = _build_toeplitz(w1, w)                                         # (9, lw1, lw2)
    t2 = _build_toeplitz(w2, w)                                         # (9, lw2, lw2)
    gsum = jnp.kron(jnp.ones((w, w), jnp.float32), jnp.eye(cout, dtype=jnp.float32))
    mask = _interior_mask(n, d, h)                                      # (rp, 1)
    g1l = jnp.tile(g1, w)[None, :]
    b1l = jnp.tile(bt1, w)[None, :]
    g2l = jnp.tile(g2, w)[None, :]
    b2l = jnp.tile(bt2, w)[None, :]
    cnt = n * d * h * w

    kern = functools.partial(_fused_two_stage_kernel, hp=hp, mg=mg, rp=rp, cnt=cnt)
    out = pl.pallas_call(
        kern,
        out_shape=jax.ShapeDtypeStruct((rp, lw2), jnp.float32),
        grid=(1,),
        in_specs=[pl.BlockSpec((rp + 2 * mg, lw1), lambda i: (0, 0)),
                  pl.BlockSpec((9, lw1, lw2), lambda i: (0, 0, 0)),
                  pl.BlockSpec((9, lw2, lw2), lambda i: (0, 0, 0)),
                  pl.BlockSpec((lw2, lw2), lambda i: (0, 0)),
                  pl.BlockSpec((rp, 1), lambda i: (0, 0)),
                  pl.BlockSpec((1, lw2), lambda i: (0, 0)),
                  pl.BlockSpec((1, lw2), lambda i: (0, 0)),
                  pl.BlockSpec((1, lw2), lambda i: (0, 0)),
                  pl.BlockSpec((1, lw2), lambda i: (0, 0))],
        out_specs=pl.BlockSpec((rp, lw2), lambda i: (0, 0)),
        scratch_shapes=[pltpu.VMEM((rp + 2 * mg, lw2), jnp.float32)],
        compiler_params=_compiler_params(("arbitrary",)),
    )(x_ext, t1, t2, gsum, mask, g1l, b1l, g2l, b2l)

    h2 = out.reshape(n, dp, hp, w, cout)[:, 1:1 + d, 1:1 + h]           # interior rows only
    return h2                                                           # NDHWC


def _conv_bias(x_ndhwc, wgt, bias, ksize, pad, stride):
    """Strided Conv3d as tiled matmul + bias (outputs stored at real channel width)."""
    pat, dims = _im2col_ndhwc(x_ndhwc, ksize, pad, stride)
    m, k = pat.shape
    cout, cin = wgt.shape[0], wgt.shape[1]
    kd, kh, kw = ksize
    w2d = jnp.transpose(wgt, (2, 3, 4, 1, 0)).reshape(kd * kh * kw * cin, cout)
    tm = min(_TILE_M, _round_up(m, 8))
    mp = _round_up(m, tm)
    pat_p = jnp.pad(pat, ((0, mp - m), (0, 0)))
    n_m = mp // tm

    y = pl.pallas_call(
        _matmul_bias_kernel,
        out_shape=jax.ShapeDtypeStruct((mp, cout), jnp.float32),
        grid=(n_m,),
        in_specs=[pl.BlockSpec((tm, k), lambda i: (i, 0)),
                  pl.BlockSpec((k, cout), lambda i: (0, 0)),
                  pl.BlockSpec((1, cout), lambda i: (0, 0))],
        out_specs=pl.BlockSpec((tm, cout), lambda i: (i, 0)),
        compiler_params=_compiler_params(("parallel",)),
    )(pat_p, w2d, bias.reshape(1, cout))

    n, do, ho, wo = dims
    return y[:m].reshape(n, do, ho, wo, cout)


def downstream_block_forward(x, params):
    """x: [N, in_chan, D, H, W] float32 -> [N, out_chan, D, H//2, W//2]."""
    p = params
    h = jnp.transpose(x, (0, 2, 3, 4, 1))                   # NCDHW -> NDHWC once at entry
    # Conv biases b1/b2 are mathematically cancelled by the following BatchNorm
    # (mean subtraction; variance unaffected), so they are not applied.
    h = _fused_conv_bn_stage12(h, p["w1"], p["g1"], p["bt1"],
                               p["w2"], p["g2"], p["bt2"])
    h = _conv_bias(h, p["w3"], p["b3"],
                   ksize=(1, 4, 4), pad=(0, 1, 1), stride=(1, 2, 2))
    return jnp.transpose(h, (0, 4, 1, 2, 3))                # NDHWC -> NCDHW at the boundary


# ------------------------------- reference -----------------------------------

def _ref_forward(x, p):
    def conv3d(x, w, b, pad, stride):
        y = lax.conv_general_dilated(
            x, w, window_strides=stride, padding=[(q, q) for q in pad],
            dimension_numbers=("NCDHW", "OIDHW", "NCDHW"))
        return y + b.reshape(1, -1, 1, 1, 1)

    def bn_lrelu(y, g, bt):
        mean = y.mean(axis=(0, 2, 3, 4), keepdims=True)
        var = ((y - mean) ** 2).mean(axis=(0, 2, 3, 4), keepdims=True)
        yh = (y - mean) / jnp.sqrt(var + 1e-5)
        yh = yh * g.reshape(1, -1, 1, 1, 1) + bt.reshape(1, -1, 1, 1, 1)
        return jnp.where(yh >= 0, yh, 0.01 * yh)

    h = bn_lrelu(conv3d(x, p["w1"], p["b1"], (1, 1, 1), (1, 1, 1)), p["g1"], p["bt1"])
    h = bn_lrelu(conv3d(h, p["w2"], p["b2"], (1, 1, 1), (1, 1, 1)), p["g2"], p["bt2"])
    h = conv3d(h, p["w3"], p["b3"], (0, 1, 1), (1, 2, 2))
    return h


# --------------------------------- main ---------------------------------------

if __name__ == "__main__":
    in_chan, out_chan = 4, 8
    N, D, H, W = 2, 4, 8, 8

    key = jax.random.PRNGKey(0)
    ks = jax.random.split(key, 12)

    params = {
        # Conv3d(in_chan, out_chan, 3, padding=1)
        "w1": 0.1 * jax.random.normal(ks[0], (out_chan, in_chan, 3, 3, 3), jnp.float32),
        "b1": 0.1 * jax.random.normal(ks[1], (out_chan,), jnp.float32),
        "g1": 1.0 + 0.1 * jax.random.normal(ks[2], (out_chan,), jnp.float32),
        "bt1": 0.1 * jax.random.normal(ks[3], (out_chan,), jnp.float32),
        # Conv3d(out_chan, out_chan, 3, padding=1)
        "w2": 0.1 * jax.random.normal(ks[4], (out_chan, out_chan, 3, 3, 3), jnp.float32),
        "b2": 0.1 * jax.random.normal(ks[5], (out_chan,), jnp.float32),
        "g2": 1.0 + 0.1 * jax.random.normal(ks[6], (out_chan,), jnp.float32),
        "bt2": 0.1 * jax.random.normal(ks[7], (out_chan,), jnp.float32),
        # Conv3d(out_chan, out_chan, (1,4,4), padding=(0,1,1), stride=(1,2,2))
        "w3": 0.1 * jax.random.normal(ks[8], (out_chan, out_chan, 1, 4, 4), jnp.float32),
        "b3": 0.1 * jax.random.normal(ks[9], (out_chan,), jnp.float32),
    }

    x = jax.random.normal(ks[10], (N, in_chan, D, H, W), jnp.float32)

    fwd = jax.jit(downstream_block_forward)
    y = jax.block_until_ready(fwd(x, params))
    y_ref = jax.block_until_ready(_ref_forward(x, params))

    assert y.shape == (N, out_chan, D, H // 2, W // 2), y.shape
    assert jnp.allclose(y, y_ref, atol=1e-4, rtol=1e-4), float(jnp.max(jnp.abs(y - y_ref)))

    print("KERNEL_OK")
</pallas_src>

<mosaic_0001>
module attributes {stable_mosaic.version = 11 : i64} {
  func.func @_fused_two_stage_kernel(%arg0: i32, %arg1: memref<152x32xf32, #tpu.memory_space<vmem>>, %arg2: memref<9x32x64xf32, #tpu.memory_space<vmem>>, %arg3: memref<9x64x64xf32, #tpu.memory_space<vmem>>, %arg4: memref<64x64xf32, #tpu.memory_space<vmem>>, %arg5: memref<120x1xf32, #tpu.memory_space<vmem>>, %arg6: memref<1x64xf32, #tpu.memory_space<vmem>>, %arg7: memref<1x64xf32, #tpu.memory_space<vmem>>, %arg8: memref<1x64xf32, #tpu.memory_space<vmem>>, %arg9: memref<1x64xf32, #tpu.memory_space<vmem>>, %arg10: memref<120x64xf32, #tpu.memory_space<vmem>>, %arg11: memref<152x64xf32, #tpu.memory_space<vmem>>) attributes {dimension_semantics = [#tpu.dimension_semantics<arbitrary>], iteration_bounds = array<i64: 1>, scalar_prefetch = 0 : i64, scratch_operands = 1 : i64, tpu.core_type = #tpu.core_type<tc>, window_params = [{pipeline_mode = #tpu.pipeline_mode<synchronous>, transform_indices = @transform_0, window_bounds = array<i64: 152, 32>}, {pipeline_mode = #tpu.pipeline_mode<synchronous>, transform_indices = @transform_1, window_bounds = array<i64: 9, 32, 64>}, {pipeline_mode = #tpu.pipeline_mode<synchronous>, transform_indices = @transform_2, window_bounds = array<i64: 9, 64, 64>}, {pipeline_mode = #tpu.pipeline_mode<synchronous>, transform_indices = @transform_3, window_bounds = array<i64: 64, 64>}, {pipeline_mode = #tpu.pipeline_mode<synchronous>, transform_indices = @transform_4, window_bounds = array<i64: 120, 1>}, {pipeline_mode = #tpu.pipeline_mode<synchronous>, transform_indices = @transform_5, window_bounds = array<i64: 1, 64>}, {pipeline_mode = #tpu.pipeline_mode<synchronous>, transform_indices = @transform_6, window_bounds = array<i64: 1, 64>}, {pipeline_mode = #tpu.pipeline_mode<synchronous>, transform_indices = @transform_7, window_bounds = array<i64: 1, 64>}, {pipeline_mode = #tpu.pipeline_mode<synchronous>, transform_indices = @transform_8, window_bounds = array<i64: 1, 64>}, {pipeline_mode = #tpu.pipeline_mode<synchronous>, transform_indices = @transform_9, window_bounds = array<i64: 120, 64>}]} {
    %c0 = arith.constant 0 : index
    %c0_0 = arith.constant 0 : index
    %0 = vector.load %arg5[%c0, %c0_0] : memref<120x1xf32, #tpu.memory_space<vmem>>, vector<120x1xf32>
    %cst = arith.constant 0.000000e+00 : f32
    %1 = vector.broadcast %cst : f32 to vector<120x64xf32>
    %c5 = arith.constant 5 : index
    %c0_1 = arith.constant 0 : index
    %2 = vector.load %arg1[%c5, %c0_1] : memref<152x32xf32, #tpu.memory_space<vmem>>, vector<120x32xf32>
    %c0_2 = arith.constant 0 : index
    %c0_3 = arith.constant 0 : index
    %c0_4 = arith.constant 0 : index
    %3 = vector.load %arg2[%c0_2, %c0_3, %c0_4] : memref<9x32x64xf32, #tpu.memory_space<vmem>>, vector<1x32x64xf32>
    %4 = vector.shape_cast %3 : vector<1x32x64xf32> to vector<32x64xf32>
    %cst_5 = arith.constant dense<0.000000e+00> : vector<120x64xf32>
    %5 = tpu.matmul %2, %4, %cst_5 {dimension_numbers = #tpu.dot_dimension_numbers<[1], [0], [0], [1], [0, 0, 1, 1], [], []>} : vector<120x32xf32>, vector<32x64xf32>, vector<120x64xf32> -> vector<120x64xf32>
    %6 = arith.addf %1, %5 : vector<120x64xf32>
    %c6 = arith.constant 6 : index
    %c0_6 = arith.constant 0 : index
    %7 = vector.load %arg1[%c6, %c0_6] : memref<152x32xf32, #tpu.memory_space<vmem>>, vector<120x32xf32>
    %c1 = arith.constant 1 : index
    %c0_7 = arith.constant 0 : index
    %c0_8 = arith.constant 0 : index
    %8 = vector.load %arg2[%c1, %c0_7, %c0_8] : memref<9x32x64xf32, #tpu.memory_space<vmem>>, vector<1x32x64xf32>
    %9 = vector.shape_cast %8 : vector<1x32x64xf32> to vector<32x64xf32>
    %cst_9 = arith.constant dense<0.000000e+00> : vector<120x64xf32>
    %10 = tpu.matmul %7, %9, %cst_9 {dimension_numbers = #tpu.dot_dimension_numbers<[1], [0], [0], [1], [0, 0, 1, 1], [], []>} : vector<120x32xf32>, vector<32x64xf32>, vector<120x64xf32> -> vector<120x64xf32>
    %11 = arith.addf %6, %10 : vector<120x64xf32>
    %c7 = arith.constant 7 : index
    %c0_10 = arith.constant 0 : index
    %12 = vector.load %arg1[%c7, %c0_10] : memref<152x32xf32, #tpu.memory_space<vmem>>, vector<120x32xf32>
    %c2 = arith.constant 2 : index
    %c0_11 = arith.constant 0 : index
    %c0_12 = arith.constant 0 : index
    %13 = vector.load %arg2[%c2, %c0_11, %c0_12] : memref<9x32x64xf32, #tpu.memory_space<vmem>>, vector<1x32x64xf32>
    %14 = vector.shape_cast %13 : vector<1x32x64xf32> to vector<32x64xf32>
    %cst_13 = arith.constant dense<0.000000e+00> : vector<120x64xf32>
    %15 = tpu.matmul %12, %14, %cst_13 {dimension_numbers = #tpu.dot_dimension_numbers<[1], [0], [0], [1], [0, 0, 1, 1], [], []>} : vector<120x32xf32>, vector<32x64xf32>, vector<120x64xf32> -> vector<120x64xf32>
    %16 = arith.addf %11, %15 : vector<120x64xf32>
    %c15 = arith.constant 15 : index
    %c0_14 = arith.constant 0 : index
    %17 = vector.load %arg1[%c15, %c0_14] : memref<152x32xf32, #tpu.memory_space<vmem>>, vector<120x32xf32>
    %c3 = arith.constant 3 : index
    %c0_15 = arith.constant 0 : index
    %c0_16 = arith.constant 0 : index
    %18 = vector.load %arg2[%c3, %c0_15, %c0_16] : memref<9x32x64xf32, #tpu.memory_space<vmem>>, vector<1x32x64xf32>
    %19 = vector.shape_cast %18 : vector<1x32x64xf32> to vector<32x64xf32>
    %cst_17 = arith.constant dense<0.000000e+00> : vector<120x64xf32>
    %20 = tpu.matmul %17, %19, %cst_17 {dimension_numbers = #tpu.dot_dimension_numbers<[1], [0], [0], [1], [0, 0, 1, 1], [], []>} : vector<120x32xf32>, vector<32x64xf32>, vector<120x64xf32> -> vector<120x64xf32>
    %21 = arith.addf %16, %20 : vector<120x64xf32>
    %c16 = arith.constant 16 : index
    %c0_18 = arith.constant 0 : index
    %22 = vector.load %arg1[%c16, %c0_18] : memref<152x32xf32, #tpu.memory_space<vmem>>, vector<120x32xf32>
    %c4 = arith.constant 4 : index
    %c0_19 = arith.constant 0 : index
    %c0_20 = arith.constant 0 : index
    %23 = vector.load %arg2[%c4, %c0_19, %c0_20] : memref<9x32x64xf32, #tpu.memory_space<vmem>>, vector<1x32x64xf32>
    %24 = vector.shape_cast %23 : vector<1x32x64xf32> to vector<32x64xf32>
    %cst_21 = arith.constant dense<0.000000e+00> : vector<120x64xf32>
    %25 = tpu.matmul %22, %24, %cst_21 {dimension_numbers = #tpu.dot_dimension_numbers<[1], [0], [0], [1], [0, 0, 1, 1], [], []>} : vector<120x32xf32>, vector<32x64xf32>, vector<120x64xf32> -> vector<120x64xf32>
    %26 = arith.addf %21, %25 : vector<120x64xf32>
    %c17 = arith.constant 17 : index
    %c0_22 = arith.constant 0 : index
    %27 = vector.load %arg1[%c17, %c0_22] : memref<152x32xf32, #tpu.memory_space<vmem>>, vector<120x32xf32>
    %c5_23 = arith.constant 5 : index
    %c0_24 = arith.constant 0 : index
    %c0_25 = arith.constant 0 : index
    %28 = vector.load %arg2[%c5_23, %c0_24, %c0_25] : memref<9x32x64xf32, #tpu.memory_space<vmem>>, vector<1x32x64xf32>
    %29 = vector.shape_cast %28 : vector<1x32x64xf32> to vector<32x64xf32>
    %cst_26 = arith.constant dense<0.000000e+00> : vector<120x64xf32>
    %30 = tpu.matmul %27, %29, %cst_26 {dimension_numbers = #tpu.dot_dimension_numbers<[1], [0], [0], [1], [0, 0, 1, 1], [], []>} : vector<120x32xf32>, vector<32x64xf32>, vector<120x64xf32> -> vector<120x64xf32>
    %31 = arith.addf %26, %30 : vector<120x64xf32>
    %c25 = arith.constant 25 : index
    %c0_27 = arith.constant 0 : index
    %32 = vector.load %arg1[%c25, %c0_27] : memref<152x32xf32, #tpu.memory_space<vmem>>, vector<120x32xf32>
    %c6_28 = arith.constant 6 : index
    %c0_29 = arith.constant 0 : index
    %c0_30 = arith.constant 0 : index
    %33 = vector.load %arg2[%c6_28, %c0_29, %c0_30] : memref<9x32x64xf32, #tpu.memory_space<vmem>>, vector<1x32x64xf32>
    %34 = vector.shape_cast %33 : vector<1x32x64xf32> to vector<32x64xf32>
    %cst_31 = arith.constant dense<0.000000e+00> : vector<120x64xf32>
    %35 = tpu.matmul %32, %34, %cst_31 {dimension_numbers = #tpu.dot_dimension_numbers<[1], [0], [0], [1], [0, 0, 1, 1], [], []>} : vector<120x32xf32>, vector<32x64xf32>, vector<120x64xf32> -> vector<120x64xf32>
    %36 = arith.addf %31, %35 : vector<120x64xf32>
    %c26 = arith.constant 26 : index
    %c0_32 = arith.constant 0 : index
    %37 = vector.load %arg1[%c26, %c0_32] : memref<152x32xf32, #tpu.memory_space<vmem>>, vector<120x32xf32>
    %c7_33 = arith.constant 7 : index
    %c0_34 = arith.constant 0 : index
    %c0_35 = arith.constant 0 : index
    %38 = vector.load %arg2[%c7_33, %c0_34, %c0_35] : memref<9x32x64xf32, #tpu.memory_space<vmem>>, vector<1x32x64xf32>
    %39 = vector.shape_cast %38 : vector<1x32x64xf32> to vector<32x64xf32>
    %cst_36 = arith.constant dense<0.000000e+00> : vector<120x64xf32>
    %40 = tpu.matmul %37, %39, %cst_36 {dimension_numbers = #tpu.dot_dimension_numbers<[1], [0], [0], [1], [0, 0, 1, 1], [], []>} : vector<120x32xf32>, vector<32x64xf32>, vector<120x64xf32> -> vector<120x64xf32>
    %41 = arith.addf %36, %40 : vector<120x64xf32>
    %c27 = arith.constant 27 : index
    %c0_37 = arith.constant 0 : index
    %42 = vector.load %arg1[%c27, %c0_37] : memref<152x32xf32, #tpu.memory_space<vmem>>, vector<120x32xf32>
    %c8 = arith.constant 8 : index
    %c0_38 = arith.constant 0 : index
    %c0_39 = arith.constant 0 : index
    %43 = vector.load %arg2[%c8, %c0_38, %c0_39] : memref<9x32x64xf32, #tpu.memory_space<vmem>>, vector<1x32x64xf32>
    %44 = vector.shape_cast %43 : vector<1x32x64xf32> to vector<32x64xf32>
    %cst_40 = arith.constant dense<0.000000e+00> : vector<120x64xf32>
    %45 = tpu.matmul %42, %44, %cst_40 {dimension_numbers = #tpu.dot_dimension_numbers<[1], [0], [0], [1], [0, 0, 1, 1], [], []>} : vector<120x32xf32>, vector<32x64xf32>, vector<120x64xf32> -> vector<120x64xf32>
    %46 = arith.addf %41, %45 : vector<120x64xf32>
    %47 = vector.broadcast %0 : vector<120x1xf32> to vector<120x64xf32>
    %48 = arith.mulf %46, %47 : vector<120x64xf32>
    %cst_41 = arith.constant dense<0.000000e+00> : vector<64xf32>
    %49 = vector.multi_reduction <add>, %48, %cst_41 [0] : vector<120x64xf32> to vector<64xf32>
    %50 = vector.shape_cast %49 : vector<64xf32> to vector<1x64xf32>
    %51 = arith.mulf %48, %48 : vector<120x64xf32>
    %cst_42 = arith.constant dense<0.000000e+00> : vector<64xf32>
    %52 = vector.multi_reduction <add>, %51, %cst_42 [0] : vector<120x64xf32> to vector<64xf32>
    %53 = vector.shape_cast %52 : vector<64xf32> to vector<1x64xf32>
    %c0_43 = arith.constant 0 : index
    %c0_44 = arith.constant 0 : index
    %54 = vector.load %arg4[%c0_43, %c0_44] : memref<64x64xf32, #tpu.memory_space<vmem>>, vector<64x64xf32>
    %cst_45 = arith.constant dense<0.000000e+00> : vector<1x64xf32>
    %55 = tpu.matmul %50, %54, %cst_45 {dimension_numbers = #tpu.dot_dimension_numbers<[1], [0], [0], [1], [0, 0, 1, 1], [], []>} : vector<1x64xf32>, vector<64x64xf32>, vector<1x64xf32> -> vector<1x64xf32>
    %c0_46 = arith.constant 0 : index
    %c0_47 = arith.constant 0 : index
    %56 = vector.load %arg4[%c0_46, %c0_47] : memref<64x64xf32, #tpu.memory_space<vmem>>, vector<64x64xf32>
    %cst_48 = arith.constant dense<0.000000e+00> : vector<1x64xf32>
    %57 = tpu.matmul %53, %56, %cst_48 {dimension_numbers = #tpu.dot_dimension_numbers<[1], [0], [0], [1], [0, 0, 1, 1], [], []>} : vector<1x64xf32>, vector<64x64xf32>, vector<1x64xf32> -> vector<1x64xf32>
    %cst_49 = arith.constant 0.001953125 : f32
    %58 = vector.broadcast %cst_49 : f32 to vector<1x64xf32>
    %59 = arith.mulf %55, %58 : vector<1x64xf32>
    %cst_50 = arith.constant 0.001953125 : f32
    %60 = vector.broadcast %cst_50 : f32 to vector<1x64xf32>
    %61 = arith.mulf %57, %60 : vector<1x64xf32>
    %62 = arith.mulf %59, %59 : vector<1x64xf32>
    %63 = arith.subf %61, %62 : vector<1x64xf32>
    %c0_51 = arith.constant 0 : index
    %c0_52 = arith.constant 0 : index
    %64 = vector.load %arg6[%c0_51, %c0_52] : memref<1x64xf32, #tpu.memory_space<vmem>>, vector<1x64xf32>
    %cst_53 = arith.constant 9.99999974E-6 : f32
    %65 = vector.broadcast %cst_53 : f32 to vector<1x64xf32>
    %66 = arith.addf %63, %65 : vector<1x64xf32>
    %67 = math.rsqrt %66 : vector<1x64xf32>
    %68 = arith.mulf %64, %67 : vector<1x64xf32>
    %c0_54 = arith.constant 0 : index
    %c0_55 = arith.constant 0 : index
    %69 = vector.load %arg7[%c0_54, %c0_55] : memref<1x64xf32, #tpu.memory_space<vmem>>, vector<1x64xf32>
    %70 = arith.mulf %59, %68 : vector<1x64xf32>
    %71 = arith.subf %69, %70 : vector<1x64xf32>
    %72 = vector.broadcast %68 : vector<1x64xf32> to vector<120x64xf32>
    %73 = arith.mulf %46, %72 : vector<120x64xf32>
    %74 = vector.broadcast %71 : vector<1x64xf32> to vector<120x64xf32>
    %75 = arith.addf %73, %74 : vector<120x64xf32>
    %cst_56 = arith.constant 0.000000e+00 : f32
    %76 = vector.broadcast %cst_56 : f32 to vector<120x64xf32>
    %77 = arith.cmpf oge, %75, %76 : vector<120x64xf32>
    %cst_57 = arith.constant 0.00999999977 : f32
    %78 = vector.broadcast %cst_57 : f32 to vector<120x64xf32>
    %79 = arith.mulf %78, %75 : vector<120x64xf32>
    %80 = arith.select %77, %75, %79 : vector<120x64xi1>, vector<120x64xf32>
    %81 = vector.broadcast %0 : vector<120x1xf32> to vector<120x64xf32>
    %82 = arith.mulf %80, %81 : vector<120x64xf32>
    %cst_58 = arith.constant 0.000000e+00 : f32
    %83 = vector.broadcast %cst_58 : f32 to vector<152x64xf32>
    %c0_59 = arith.constant 0 : index
    %c0_60 = arith.constant 0 : index
    %84 = vector.load %arg11[%c0_59, %c0_60] : memref<152x64xf32, #tpu.memory_space<vmem>>, vector<152x64xf32>
    tpu.vector_store %arg11[%c0_59, %c0_60], %83 {strides = array<i32>} : memref<152x64xf32, #tpu.memory_space<vmem>>, vector<152x64xf32>,
    %c16_61 = arith.constant 16 : index
    %c0_62 = arith.constant 0 : index
    %85 = vector.load %arg11[%c16_61, %c0_62] : memref<152x64xf32, #tpu.memory_space<vmem>>, vector<120x64xf32>
    tpu.vector_store %arg11[%c16_61, %c0_62], %82 {strides = array<i32>} : memref<152x64xf32, #tpu.memory_space<vmem>>, vector<120x64xf32>,
    %cst_63 = arith.constant 0.000000e+00 : f32
    %86 = vector.broadcast %cst_63 : f32 to vector<120x64xf32>
    %c5_64 = arith.constant 5 : index
    %c0_65 = arith.constant 0 : index
    %87 = vector.load %arg11[%c5_64, %c0_65] : memref<152x64xf32, #tpu.memory_space<vmem>>, vector<120x64xf32>
    %c0_66 = arith.constant 0 : index
    %c0_67 = arith.constant 0 : index
    %c0_68 = arith.constant 0 : index
    %88 = vector.load %arg3[%c0_66, %c0_67, %c0_68] : memref<9x64x64xf32, #tpu.memory_space<vmem>>, vector<1x64x64xf32>
    %89 = vector.shape_cast %88 : vector<1x64x64xf32> to vector<64x64xf32>
    %cst_69 = arith.constant dense<0.000000e+00> : vector<120x64xf32>
    %90 = tpu.matmul %87, %89, %cst_69 {dimension_numbers = #tpu.dot_dimension_numbers<[1], [0], [0], [1], [0, 0, 1, 1], [], []>} : vector<120x64xf32>, vector<64x64xf32>, vector<120x64xf32> -> vector<120x64xf32>
    %91 = arith.addf %86, %90 : vector<120x64xf32>
    %c6_70 = arith.constant 6 : index
    %c0_71 = arith.constant 0 : index
    %92 = vector.load %arg11[%c6_70, %c0_71] : memref<152x64xf32, #tpu.memory_space<vmem>>, vector<120x64xf32>
    %c1_72 = arith.constant 1 : index
    %c0_73 = arith.constant 0 : index
    %c0_74 = arith.constant 0 : index
    %93 = vector.load %arg3[%c1_72, %c0_73, %c0_74] : memref<9x64x64xf32, #tpu.memory_space<vmem>>, vector<1x64x64xf32>
    %94 = vector.shape_cast %93 : vector<1x64x64xf32> to vector<64x64xf32>
    %cst_75 = arith.constant dense<0.000000e+00> : vector<120x64xf32>
    %95 = tpu.matmul %92, %94, %cst_75 {dimension_numbers = #tpu.dot_dimension_numbers<[1], [0], [0], [1], [0, 0, 1, 1], [], []>} : vector<120x64xf32>, vector<64x64xf32>, vector<120x64xf32> -> vector<120x64xf32>
    %96 = arith.addf %91, %95 : vector<120x64xf32>
    %c7_76 = arith.constant 7 : index
    %c0_77 = arith.constant 0 : index
    %97 = vector.load %arg11[%c7_76, %c0_77] : memref<152x64xf32, #tpu.memory_space<vmem>>, vector<120x64xf32>
    %c2_78 = arith.constant 2 : index
    %c0_79 = arith.constant 0 : index
    %c0_80 = arith.constant 0 : index
    %98 = vector.load %arg3[%c2_78, %c0_79, %c0_80] : memref<9x64x64xf32, #tpu.memory_space<vmem>>, vector<1x64x64xf32>
    %99 = vector.shape_cast %98 : vector<1x64x64xf32> to vector<64x64xf32>
    %cst_81 = arith.constant dense<0.000000e+00> : vector<120x64xf32>
    %100 = tpu.matmul %97, %99, %cst_81 {dimension_numbers = #tpu.dot_dimension_numbers<[1], [0], [0], [1], [0, 0, 1, 1], [], []>} : vector<120x64xf32>, vector<64x64xf32>, vector<120x64xf32> -> vector<120x64xf32>
    %101 = arith.addf %96, %100 : vector<120x64xf32>
    %c15_82 = arith.constant 15 : index
    %c0_83 = arith.constant 0 : index
    %102 = vector.load %arg11[%c15_82, %c0_83] : memref<152x64xf32, #tpu.memory_space<vmem>>, vector<120x64xf32>
    %c3_84 = arith.constant 3 : index
    %c0_85 = arith.constant 0 : index
    %c0_86 = arith.constant 0 : index
    %103 = vector.load %arg3[%c3_84, %c0_85, %c0_86] : memref<9x64x64xf32, #tpu.memory_space<vmem>>, vector<1x64x64xf32>
    %104 = vector.shape_cast %103 : vector<1x64x64xf32> to vector<64x64xf32>
    %cst_87 = arith.constant dense<0.000000e+00> : vector<120x64xf32>
    %105 = tpu.matmul %102, %104, %cst_87 {dimension_numbers = #tpu.dot_dimension_numbers<[1], [0], [0], [1], [0, 0, 1, 1], [], []>} : vector<120x64xf32>, vector<64x64xf32>, vector<120x64xf32> -> vector<120x64xf32>
    %106 = arith.addf %101, %105 : vector<120x64xf32>
    %c16_88 = arith.constant 16 : index
    %c0_89 = arith.constant 0 : index
    %107 = vector.load %arg11[%c16_88, %c0_89] : memref<152x64xf32, #tpu.memory_space<vmem>>, vector<120x64xf32>
    %c4_90 = arith.constant 4 : index
    %c0_91 = arith.constant 0 : index
    %c0_92 = arith.constant 0 : index
    %108 = vector.load %arg3[%c4_90, %c0_91, %c0_92] : memref<9x64x64xf32, #tpu.memory_space<vmem>>, vector<1x64x64xf32>
    %109 = vector.shape_cast %108 : vector<1x64x64xf32> to vector<64x64xf32>
    %cst_93 = arith.constant dense<0.000000e+00> : vector<120x64xf32>
    %110 = tpu.matmul %107, %109, %cst_93 {dimension_numbers = #tpu.dot_dimension_numbers<[1], [0], [0], [1], [0, 0, 1, 1], [], []>} : vector<120x64xf32>, vector<64x64xf32>, vector<120x64xf32> -> vector<120x64xf32>
    %111 = arith.addf %106, %110 : vector<120x64xf32>
    %c17_94 = arith.constant 17 : index
    %c0_95 = arith.constant 0 : index
    %112 = vector.load %arg11[%c17_94, %c0_95] : memref<152x64xf32, #tpu.memory_space<vmem>>, vector<120x64xf32>
    %c5_96 = arith.constant 5 : index
    %c0_97 = arith.constant 0 : index
    %c0_98 = arith.constant 0 : index
    %113 = vector.load %arg3[%c5_96, %c0_97, %c0_98] : memref<9x64x64xf32, #tpu.memory_space<vmem>>, vector<1x64x64xf32>
    %114 = vector.shape_cast %113 : vector<1x64x64xf32> to vector<64x64xf32>
    %cst_99 = arith.constant dense<0.000000e+00> : vector<120x64xf32>
    %115 = tpu.matmul %112, %114, %cst_99 {dimension_numbers = #tpu.dot_dimension_numbers<[1], [0], [0], [1], [0, 0, 1, 1], [], []>} : vector<120x64xf32>, vector<64x64xf32>, vector<120x64xf32> -> vector<120x64xf32>
    %116 = arith.addf %111, %115 : vector<120x64xf32>
    %c25_100 = arith.constant 25 : index
    %c0_101 = arith.constant 0 : index
    %117 = vector.load %arg11[%c25_100, %c0_101] : memref<152x64xf32, #tpu.memory_space<vmem>>, vector<120x64xf32>
    %c6_102 = arith.constant 6 : index
    %c0_103 = arith.constant 0 : index
    %c0_104 = arith.constant 0 : index
    %118 = vector.load %arg3[%c6_102, %c0_103, %c0_104] : memref<9x64x64xf32, #tpu.memory_space<vmem>>, vector<1x64x64xf32>
    %119 = vector.shape_cast %118 : vector<1x64x64xf32> to vector<64x64xf32>
    %cst_105 = arith.constant dense<0.000000e+00> : vector<120x64xf32>
    %120 = tpu.matmul %117, %119, %cst_105 {dimension_numbers = #tpu.dot_dimension_numbers<[1], [0], [0], [1], [0, 0, 1, 1], [], []>} : vector<120x64xf32>, vector<64x64xf32>, vector<120x64xf32> -> vector<120x64xf32>
    %121 = arith.addf %116, %120 : vector<120x64xf32>
    %c26_106 = arith.constant 26 : index
    %c0_107 = arith.constant 0 : index
    %122 = vector.load %arg11[%c26_106, %c0_107] : memref<152x64xf32, #tpu.memory_space<vmem>>, vector<120x64xf32>
    %c7_108 = arith.constant 7 : index
    %c0_109 = arith.constant 0 : index
    %c0_110 = arith.constant 0 : index
    %123 = vector.load %arg3[%c7_108, %c0_109, %c0_110] : memref<9x64x64xf32, #tpu.memory_space<vmem>>, vector<1x64x64xf32>
    %124 = vector.shape_cast %123 : vector<1x64x64xf32> to vector<64x64xf32>
    %cst_111 = arith.constant dense<0.000000e+00> : vector<120x64xf32>
    %125 = tpu.matmul %122, %124, %cst_111 {dimension_numbers = #tpu.dot_dimension_numbers<[1], [0], [0], [1], [0, 0, 1, 1], [], []>} : vector<120x64xf32>, vector<64x64xf32>, vector<120x64xf32> -> vector<120x64xf32>
    %126 = arith.addf %121, %125 : vector<120x64xf32>
    %c27_112 = arith.constant 27 : index
    %c0_113 = arith.constant 0 : index
    %127 = vector.load %arg11[%c27_112, %c0_113] : memref<152x64xf32, #tpu.memory_space<vmem>>, vector<120x64xf32>
    %c8_114 = arith.constant 8 : index
    %c0_115 = arith.constant 0 : index
    %c0_116 = arith.constant 0 : index
    %128 = vector.load %arg3[%c8_114, %c0_115, %c0_116] : memref<9x64x64xf32, #tpu.memory_space<vmem>>, vector<1x64x64xf32>
    %129 = vector.shape_cast %128 : vector<1x64x64xf32> to vector<64x64xf32>
    %cst_117 = arith.constant dense<0.000000e+00> : vector<120x64xf32>
    %130 = tpu.matmul %127, %129, %cst_117 {dimension_numbers = #tpu.dot_dimension_numbers<[1], [0], [0], [1], [0, 0, 1, 1], [], []>} : vector<120x64xf32>, vector<64x64xf32>, vector<120x64xf32> -> vector<120x64xf32>
    %131 = arith.addf %126, %130 : vector<120x64xf32>
    %132 = vector.broadcast %0 : vector<120x1xf32> to vector<120x64xf32>
    %133 = arith.mulf %131, %132 : vector<120x64xf32>
    %cst_118 = arith.constant dense<0.000000e+00> : vector<64xf32>
    %134 = vector.multi_reduction <add>, %133, %cst_118 [0] : vector<120x64xf32> to vector<64xf32>
    %135 = vector.shape_cast %134 : vector<64xf32> to vector<1x64xf32>
    %136 = arith.mulf %133, %133 : vector<120x64xf32>
    %cst_119 = arith.constant dense<0.000000e+00> : vector<64xf32>
    %137 = vector.multi_reduction <add>, %136, %cst_119 [0] : vector<120x64xf32> to vector<64xf32>
    %138 = vector.shape_cast %137 : vector<64xf32> to vector<1x64xf32>
    %c0_120 = arith.constant 0 : index
    %c0_121 = arith.constant 0 : index
    %139 = vector.load %arg4[%c0_120, %c0_121] : memref<64x64xf32, #tpu.memory_space<vmem>>, vector<64x64xf32>
    %cst_122 = arith.constant dense<0.000000e+00> : vector<1x64xf32>
    %140 = tpu.matmul %135, %139, %cst_122 {dimension_numbers = #tpu.dot_dimension_numbers<[1], [0], [0], [1], [0, 0, 1, 1], [], []>} : vector<1x64xf32>, vector<64x64xf32>, vector<1x64xf32> -> vector<1x64xf32>
    %c0_123 = arith.constant 0 : index
    %c0_124 = arith.constant 0 : index
    %141 = vector.load %arg4[%c0_123, %c0_124] : memref<64x64xf32, #tpu.memory_space<vmem>>, vector<64x64xf32>
    %cst_125 = arith.constant dense<0.000000e+00> : vector<1x64xf32>
    %142 = tpu.matmul %138, %141, %cst_125 {dimension_numbers = #tpu.dot_dimension_numbers<[1], [0], [0], [1], [0, 0, 1, 1], [], []>} : vector<1x64xf32>, vector<64x64xf32>, vector<1x64xf32> -> vector<1x64xf32>
    %cst_126 = arith.constant 0.001953125 : f32
    %143 = vector.broadcast %cst_126 : f32 to vector<1x64xf32>
    %144 = arith.mulf %140, %143 : vector<1x64xf32>
    %cst_127 = arith.constant 0.001953125 : f32
    %145 = vector.broadcast %cst_127 : f32 to vector<1x64xf32>
    %146 = arith.mulf %142, %145 : vector<1x64xf32>
    %147 = arith.mulf %144, %144 : vector<1x64xf32>
    %148 = arith.subf %146, %147 : vector<1x64xf32>
    %c0_128 = arith.constant 0 : index
    %c0_129 = arith.constant 0 : index
    %149 = vector.load %arg8[%c0_128, %c0_129] : memref<1x64xf32, #tpu.memory_space<vmem>>, vector<1x64xf32>
    %cst_130 = arith.constant 9.99999974E-6 : f32
    %150 = vector.broadcast %cst_130 : f32 to vector<1x64xf32>
    %151 = arith.addf %148, %150 : vector<1x64xf32>
    %152 = math.rsqrt %151 : vector<1x64xf32>
    %153 = arith.mulf %149, %152 : vector<1x64xf32>
    %c0_131 = arith.constant 0 : index
    %c0_132 = arith.constant 0 : index
    %154 = vector.load %arg9[%c0_131, %c0_132] : memref<1x64xf32, #tpu.memory_space<vmem>>, vector<1x64xf32>
    %155 = arith.mulf %144, %153 : vector<1x64xf32>
    %156 = arith.subf %154, %155 : vector<1x64xf32>
    %157 = vector.broadcast %153 : vector<1x64xf32> to vector<120x64xf32>
    %158 = arith.mulf %131, %157 : vector<120x64xf32>
    %159 = vector.broadcast %156 : vector<1x64xf32> to vector<120x64xf32>
    %160 = arith.addf %158, %159 : vector<120x64xf32>
    %cst_133 = arith.constant 0.000000e+00 : f32
    %161 = vector.broadcast %cst_133 : f32 to vector<120x64xf32>
    %162 = arith.cmpf oge, %160, %161 : vector<120x64xf32>
    %cst_134 = arith.constant 0.00999999977 : f32
    %163 = vector.broadcast %cst_134 : f32 to vector<120x64xf32>
    %164 = arith.mulf %163, %160 : vector<120x64xf32>
    %165 = arith.select %162, %160, %164 : vector<120x64xi1>, vector<120x64xf32>
    %c0_135 = arith.constant 0 : index
    %c0_136 = arith.constant 0 : index
    %166 = vector.load %arg10[%c0_135, %c0_136] : memref<120x64xf32, #tpu.memory_space<vmem>>, vector<120x64xf32>
    tpu.vector_store %arg10[%c0_135, %c0_136], %165 {strides = array<i32>} : memref<120x64xf32, #tpu.memory_space<vmem>>, vector<120x64xf32>,
    return
  }
  func.func @transform_0(%arg0: i32) -> (i32, i32) {
    %c0_i32 = arith.constant 0 : i32
    %c0_i32_0 = arith.constant 0 : i32
    %c0_i32_1 = arith.constant 0 : i32
    return %c0_i32, %c0_i32_0 : i32, i32
  }
  func.func @transform_1(%arg0: i32) -> (i32, i32, i32) {
    %c0_i32 = arith.constant 0 : i32
    %c0_i32_0 = arith.constant 0 : i32
    %c0_i32_1 = arith.constant 0 : i32
    %c0_i32_2 = arith.constant 0 : i32
    return %c0_i32, %c0_i32_0, %c0_i32_1 : i32, i32, i32
  }
  func.func @transform_2(%arg0: i32) -> (i32, i32, i32) {
    %c0_i32 = arith.constant 0 : i32
    %c0_i32_0 = arith.constant 0 : i32
    %c0_i32_1 = arith.constant 0 : i32
    %c0_i32_2 = arith.constant 0 : i32
    return %c0_i32, %c0_i32_0, %c0_i32_1 : i32, i32, i32
  }
  func.func @transform_3(%arg0: i32) -> (i32, i32) {
    %c0_i32 = arith.constant 0 : i32
    %c0_i32_0 = arith.constant 0 : i32
    %c0_i32_1 = arith.constant 0 : i32
    return %c0_i32, %c0_i32_0 : i32, i32
  }
  func.func @transform_4(%arg0: i32) -> (i32, i32) {
    %c0_i32 = arith.constant 0 : i32
    %c0_i32_0 = arith.constant 0 : i32
    %c0_i32_1 = arith.constant 0 : i32
    return %c0_i32, %c0_i32_0 : i32, i32
  }
  func.func @transform_5(%arg0: i32) -> (i32, i32) {
    %c0_i32 = arith.constant 0 : i32
    %c0_i32_0 = arith.constant 0 : i32
    %c0_i32_1 = arith.constant 0 : i32
    return %c0_i32, %c0_i32_0 : i32, i32
  }
  func.func @transform_6(%arg0: i32) -> (i32, i32) {
    %c0_i32 = arith.constant 0 : i32
    %c0_i32_0 = arith.constant 0 : i32
    %c0_i32_1 = arith.constant 0 : i32
    return %c0_i32, %c0_i32_0 : i32, i32
  }
  func.func @transform_7(%arg0: i32) -> (i32, i32) {
    %c0_i32 = arith.constant 0 : i32
    %c0_i32_0 = arith.constant 0 : i32
    %c0_i32_1 = arith.constant 0 : i32
    return %c0_i32, %c0_i32_0 : i32, i32
  }
  func.func @transform_8(%arg0: i32) -> (i32, i32) {
    %c0_i32 = arith.constant 0 : i32
    %c0_i32_0 = arith.constant 0 : i32
    %c0_i32_1 = arith.constant 0 : i32
    return %c0_i32, %c0_i32_0 : i32, i32
  }
  func.func @transform_9(%arg0: i32) -> (i32, i32) {
    %c0_i32 = arith.constant 0 : i32
    %c0_i32_0 = arith.constant 0 : i32
    %c0_i32_1 = arith.constant 0 : i32
    return %c0_i32, %c0_i32_0 : i32, i32
  }
}

module attributes {stable_mosaic.version = 11 : i64} {
  func.func @_matmul_bias_kernel(%arg0: i32, %arg1: memref<128x128xf32, #tpu.memory_space<vmem>>, %arg2: memref<128x8xf32, #tpu.memory_space<vmem>>, %arg3: memref<1x8xf32, #tpu.memory_space<vmem>>, %arg4: memref<128x8xf32, #tpu.memory_space<vmem>>) attributes {dimension_semantics = [#tpu.dimension_semantics<parallel>], iteration_bounds = array<i64: 1>, scalar_prefetch = 0 : i64, scratch_operands = 0 : i64, tpu.core_type = #tpu.core_type<tc>, window_params = [{transform_indices = @transform_0, window_bounds = array<i64: 128, 128>}, {pipeline_mode = #tpu.pipeline_mode<synchronous>, transform_indices = @transform_1, window_bounds = array<i64: 128, 8>}, {pipeline_mode = #tpu.pipeline_mode<synchronous>, transform_indices = @transform_2, window_bounds = array<i64: 1, 8>}, {transform_indices = @transform_3, window_bounds = array<i64: 128, 8>}]} {
    %c0 = arith.constant 0 : index
    %c0_0 = arith.constant 0 : index
    %0 = vector.load %arg1[%c0, %c0_0] : memref<128x128xf32, #tpu.memory_space<vmem>>, vector<128x128xf32>
    %c0_1 = arith.constant 0 : index
    %c0_2 = arith.constant 0 : index
    %1 = vector.load %arg2[%c0_1, %c0_2] : memref<128x8xf32, #tpu.memory_space<vmem>>, vector<128x8xf32>
    %cst = arith.constant dense<0.000000e+00> : vector<128x8xf32>
    %2 = tpu.matmul %0, %1, %cst {dimension_numbers = #tpu.dot_dimension_numbers<[1], [0], [0], [1], [0, 0, 1, 1], [], []>} : vector<128x128xf32>, vector<128x8xf32>, vector<128x8xf32> -> vector<128x8xf32>
    %c0_3 = arith.constant 0 : index
    %c0_4 = arith.constant 0 : index
    %3 = vector.load %arg3[%c0_3, %c0_4] : memref<1x8xf32, #tpu.memory_space<vmem>>, vector<1x8xf32>
    %4 = vector.broadcast %3 : vector<1x8xf32> to vector<128x8xf32>
    %5 = arith.addf %2, %4 : vector<128x8xf32>
    %c0_5 = arith.constant 0 : index
    %c0_6 = arith.constant 0 : index
    %6 = vector.load %arg4[%c0_5, %c0_6] : memref<128x8xf32, #tpu.memory_space<vmem>>, vector<128x8xf32>
    tpu.vector_store %arg4[%c0_5, %c0_6], %5 {strides = array<i32>} : memref<128x8xf32, #tpu.memory_space<vmem>>, vector<128x8xf32>,
    return
  }
  func.func @transform_0(%arg0: i32) -> (i32, i32) {
    %c0_i32 = arith.constant 0 : i32
    %c0_i32_0 = arith.constant 0 : i32
    return %arg0, %c0_i32 : i32, i32
  }
  func.func @transform_1(%arg0: i32) -> (i32, i32) {
    %c0_i32 = arith.constant 0 : i32
    %c0_i32_0 = arith.constant 0 : i32
    %c0_i32_1 = arith.constant 0 : i32
    return %c0_i32, %c0_i32_0 : i32, i32
  }
  func.func @transform_2(%arg0: i32) -> (i32, i32) {
    %c0_i32 = arith.constant 0 : i32
    %c0_i32_0 = arith.constant 0 : i32
    %c0_i32_1 = arith.constant 0 : i32
    return %c0_i32, %c0_i32_0 : i32, i32
  }
  func.func @transform_3(%arg0: i32) -> (i32, i32) {
    %c0_i32 = arith.constant 0 : i32
    %c0_i32_0 = arith.constant 0 : i32
    return %arg0, %c0_i32 : i32, i32
  }
}

</mosaic_0001>

<bundles_post_ra>
// kernel: tile.23
= control target key start
LH: loop header
LB: loop body
LE: loop exit
PB: predicated region body
PF: predicated region fallthrough
CT: control target
= control target key end

     0   :  { %s22_s0 = inlined_call_operand.vmem [shape: f32[8], index: 0, kind: input, shape index: {}]   ;;  %s23_s1 = inlined_call_operand.vmem [shape: f32[8,8], index: 1, kind: output, shape index: {}]  }
   0x1   :  { %v4_v0 = vld [vmem:[%s22_s0] ss:$0 sm:$0xff] }
   0x2   :  { %5 = vst [vmem:[%s23_s1] sm:$0xff] %v4_v0 }

// kernel: tile.24
= control target key start
LH: loop header
LB: loop body
LE: loop exit
PB: predicated region body
PF: predicated region fallthrough
CT: control target
= control target key end

     0   :  { %s67_s10 = smov 56   ;;  %s68_s11 = smov 40   ;;  %vm3_vm0 = vcmask 64512   ;;  %vm9_vm1 = vcmask 523712   ;;  %vm15_vm2 = vcmask 458112   ;;  %vm21_vm3 = vcmask 392512   ;;  %s111_s0 = inlined_call_operand.vmem [shape: f32[8,8], index: 0, kind: input, shape index: {}]   ;;  %s112_s1 = inlined_call_operand.vmem [shape: f32[1,64], index: 1, kind: output, shape index: {}]  }
   0x1   :  { %v53_v0 = vld [vmem:[%s111_s0 + $0x7] sm:$0x1]   ;;  %v55_v1 = vld [vmem:[%s111_s0 + $0x5] sm:$0x1]   ;;  %v54_v2 = vld [vmem:[%s111_s0 + $0x6] sm:$0x1]  }
   0x2   :  { %7 = vrot.lane.b32.xlu0 %v53_v0, %s67_s10  ;;  %19 = vrot.lane.b32.xlu1 %v55_v1, %s68_s11  ;;  %v56_v3 = vld [vmem:[%s111_s0 + $0x4] sm:$0x1]   ;;  %v2_v4 = vld [vmem:[%s111_s0] sm:$0x1]   ;;  %s69_s18 = smov 48   ;;  %s70_s19 = smov 32  }
   0x3   :  { %4 = vst.msk [vmem:[#allocation0] sm:$0x1] %vm3_vm0, %v2_v4   ;;  %v57_v5 = vld [vmem:[%s111_s0 + $0x3] sm:$0x1]   ;;  %v58_v6 = vld [vmem:[%s111_s0 + $0x2] sm:$0x1]  }
   0x4   :  { %s71_s24 = smov 24   ;;  %s72_s25 = smov 16   ;;  %v59_v7 = vld [vmem:[%s111_s0 + $0x1] sm:$0x1]   ;;  %vm27_vm4 = vcmask 326912   ;;  %vm33_vm5 = vcmask 261312  }
   0x5   :  { %s73_s0 = smov 8   ;;  %vm39_vm6 = vcmask 195712   ;;  %vm45_vm7 = vcmask 130112  }
   0x6   :  { %13 = vrot.lane.b32.xlu0 %v54_v2, %s69_s18  ;;  %25 = vrot.lane.b32.xlu1 %v56_v3, %s70_s19 }
   0xa   :  { %31 = vrot.lane.b32.xlu0 %v57_v5, %s71_s24  ;;  %37 = vrot.lane.b32.xlu1 %v58_v6, %s72_s25 }
   0xe   :  { %43 = vrot.lane.b32.xlu0 %v59_v7, %s73_s0 }
  0x74   :  { %v8_v8 = vpop.permute.xlu0 %7   ;;  %v20_v9 = vpop.permute.xlu1 %19  }
  0x75   :  { %10 = vst.msk [vmem:[#allocation0] sm:$0x1] %vm9_vm1, %v8_v8  }
  0x78   :  { %v14_v10 = vpop.permute.xlu0 %13   ;;  %v26_v11 = vpop.permute.xlu1 %25  }
  0x79   :  { %16 = vst.msk [vmem:[#allocation0] sm:$0x1] %vm15_vm2, %v14_v10  }
  0x7a   :  { %22 = vst.msk [vmem:[#allocation0] sm:$0x1] %vm21_vm3, %v20_v9  }
  0x7b   :  { %28 = vst.msk [vmem:[#allocation0] sm:$0x1] %vm27_vm4, %v26_v11  }
  0x7c   :  { %v32_v12 = vpop.permute.xlu0 %31   ;;  %v38_v13 = vpop.permute.xlu1 %37  }
  0x7d   :  { %34 = vst.msk [vmem:[#allocation0] sm:$0x1] %vm33_vm5, %v32_v12  }
  0x7e   :  { %40 = vst.msk [vmem:[#allocation0] sm:$0x1] %vm39_vm6, %v38_v13  }
  0x80   :  { %v44_v14 = vpop.permute.xlu0 %43  }
  0x81   :  { %46 = vst.msk [vmem:[#allocation0] sm:$0x1] %vm45_vm7, %v44_v14  }
  0x88   :  { %v50_v15 = vld [vmem:[#allocation0] sm:$0x1] }
  0x89   :  { %52 = vst [vmem:[%s112_s1] sm:$0x1] %v50_v15 }

// kernel: downstream_block_forward.3
= control target key start
LH: loop header
LB: loop body
LE: loop exit
PB: predicated region body
PF: predicated region fallthrough
CT: control target
= control target key end

     0   :  { %s546_s0 = inlined_call_operand.vmem [shape: f32[128,128], index: 0, kind: input, shape index: {}]   ;;  %s547_s1 = inlined_call_operand.vmem [shape: f32[128,8], index: 1, kind: input, shape index: {}]   ;;  %s548_s2 = inlined_call_operand.vmem [shape: f32[1,8], index: 2, kind: input, shape index: {}]   ;;  %s549_s3 = inlined_call_operand.hbm [shape: f32[128,8], index: 3, kind: output, shape index: {}]  }
   0x1   :  { %v31_v0 = vld [vmem:[%s547_s1] sm:$0xff]  ;;  %v32_v1 = vld [vmem:[%s547_s1 + $0x8] sm:$0xff]  ;;  %v33_v2 = vld [vmem:[%s547_s1 + $0x10] sm:$0xff] }
   0x2   :  { %v321_v3 = vpack.c.bf16 %v32_v1, %v31_v0  ;;  %v34_v4 = vld [vmem:[%s547_s1 + $0x18] sm:$0xff]  ;;  %v35_v6 = vld [vmem:[%s547_s1 + $0x20] sm:$0xff]  ;;  %v36_v7 = vld [vmem:[%s547_s1 + $0x28] sm:$0xff] }
   0x3   :  { %v325_v5 = vpack.c.bf16 %v34_v4, %v33_v2  ;;  %v329_v8 = vpack.c.bf16 %v36_v7, %v35_v6  ;;  %v15_v9 = vld [vmem:[%s546_s0] sm:$0xff]  ;;  %v37_v11 = vld [vmem:[%s547_s1 + $0x30] sm:$0xff]  ;;  %v38_v12 = vld [vmem:[%s547_s1 + $0x38] sm:$0xff] }
   0x4   :  { %322 = vmatprep.subr.bf16.mxu0 %v321_v3  ;;  %353 = vmatprep.subr.bf16.mxu1 %v321_v3  ;;  %v23_v10 = vld [vmem:[%s546_s0 + $0x40] sm:$0xff]  ;;  %v333_v13 = vpack.c.bf16 %v38_v12, %v37_v11  ;;  %v40_v15 = vld [vmem:[%s547_s1 + $0x48] sm:$0xff] }
   0x5   :  { %324 = vmatpush3.bf16.msra.mxu0 %v321_v3  ;;  %361 = vmatpush3.bf16.msra.mxu1 %v321_v3  ;;  %v39_v14 = vld [vmem:[%s547_s1 + $0x40] sm:$0xff] }
   0x6   :  { %326 = vmatprep.subr.bf16.mxu0 %v325_v5  ;;  %354 = vmatprep.subr.bf16.mxu1 %v325_v5 }
   0x7   :  { %297 = vmatprep.mubr.f32.mxu0 %v15_v9  ;;  %309 = vmatprep.mubr.f32.mxu1 %v23_v10 }
   0x9   :  { %328 = vmatpush3.bf16.msra.mxu0 %v325_v5  ;;  %362 = vmatpush3.bf16.msra.mxu1 %v325_v5 }
   0xa   :  { %330 = vmatprep.subr.bf16.mxu0 %v329_v8  ;;  %355 = vmatprep.subr.bf16.mxu1 %v329_v8 }
   0xb   :  { %8 = vsyncpa [#allocation3], 0  ;;  %v337_v16 = vpack.c.bf16 %v40_v15, %v39_v14  ;;  %v41_v17 = vld [vmem:[%s547_s1 + $0x50] sm:$0xff]  ;;  %v42_v18 = vld [vmem:[%s547_s1 + $0x58] sm:$0xff]  ;;  %vm199_vm0 = vcmask 64512  }
   0xc   :  { %v341_v19 = vpack.c.bf16 %v42_v18, %v41_v17  ;;  %v43_v20 = vld [vmem:[%s547_s1 + $0x60] sm:$0xff]  ;;  %v44_v21 = vld [vmem:[%s547_s1 + $0x68] sm:$0xff]  ;;  %v45_v23 = vld [vmem:[%s547_s1 + $0x70] sm:$0xff] }
   0xd   :  { %332 = vmatpush3.bf16.msra.mxu0 %v329_v8  ;;  %363 = vmatpush3.bf16.msra.mxu1 %v329_v8  ;;  %v345_v22 = vpack.c.bf16 %v44_v21, %v43_v20  ;;  %v46_v24 = vld [vmem:[%s547_s1 + $0x78] sm:$0xff]  ;;  %v16_v26 = vld [vmem:[%s546_s0 + $0x8] sm:$0xff]  ;;  %v17_v28 = vld [vmem:[%s546_s0 + $0x10] sm:$0xff] }
   0xe   :  { %334 = vmatprep.subr.bf16.mxu0 %v333_v13  ;;  %356 = vmatprep.subr.bf16.mxu1 %v333_v13  ;;  %v349_v25 = vpack.c.bf16 %v46_v24, %v45_v23  ;;  %v24_v27 = vld [vmem:[%s546_s0 + $0x48] sm:$0xff]  ;;  %v25_v29 = vld [vmem:[%s546_s0 + $0x50] sm:$0xff]  ;;  %v18_v30 = vld [vmem:[%s546_s0 + $0x18] sm:$0xff] }
   0xf   :  { %v26_v31 = vld [vmem:[%s546_s0 + $0x58] sm:$0xff]  ;;  %v19_v32 = vld [vmem:[%s546_s0 + $0x20] sm:$0xff]  ;;  %v20_v34 = vld [vmem:[%s546_s0 + $0x28] sm:$0xff] }
  0x10   :  { %v27_v33 = vld [vmem:[%s546_s0 + $0x60] sm:$0xff]  ;;  %v28_v35 = vld [vmem:[%s546_s0 + $0x68] sm:$0xff]  ;;  %v21_v36 = vld [vmem:[%s546_s0 + $0x30] sm:$0xff] }
  0x11   :  { %336 = vmatpush3.bf16.msra.mxu0 %v333_v13  ;;  %364 = vmatpush3.bf16.msra.mxu1 %v333_v13  ;;  %v29_v37 = vld [vmem:[%s546_s0 + $0x70] sm:$0xff]  ;;  %v22_v38 = vld [vmem:[%s546_s0 + $0x38] sm:$0xff]  ;;  %v232_v40 = vld [vmem:[%s548_s2] ss:$0 sm:$0xff] }
  0x12   :  { %338 = vmatprep.subr.bf16.mxu0 %v337_v16  ;;  %357 = vmatprep.subr.bf16.mxu1 %v337_v16  ;;  %v30_v39 = vld [vmem:[%s546_s0 + $0x78] sm:$0xff]  ;;  %s396_s0 = smov [#allocation2]  }
  0x13   :  { %s221_s2 = sshll.u32 %s396_s0, 4  ;;  %s222_s2 = int_to_ptr.vmem [resolvable:$true] %s221_s2 }
  0x14   :  { %s372_s23 = scalar_lea.vmem %s222_s2, 2048  ;;  %p377_p1 = scmp.lt.s32.totalorder %s222_s2, %s222_s2 }
  0x15   :  { %340 = vmatpush3.bf16.msra.mxu0 %v337_v16  ;;  %365 = vmatpush3.bf16.msra.mxu1 %v337_v16  ;;  %p373_p0 = scmp.ne.s32.totalorder %s222_s2, %s372_s23  ;;  %p378_p2 = scmp.lt.s32.totalorder %s372_s23, %s372_s23 }
  0x16   :  { %342 = vmatprep.subr.bf16.mxu0 %v341_v19  ;;  %358 = vmatprep.subr.bf16.mxu1 %v341_v19 }
  0x17   :  { %p379_p3 = por %p378_p2, %p377_p1 }
  0x19   :  { %344 = vmatpush3.bf16.msra.mxu0 %v341_v19  ;;  %366 = vmatpush3.bf16.msra.mxu1 %v341_v19  ;;  %p380_p4 = pnand %p379_p3, %p373_p0 }
  0x1a   :  { %346 = vmatprep.subr.bf16.mxu0 %v345_v22  ;;  %359 = vmatprep.subr.bf16.mxu1 %v345_v22 }
  0x1d   :  { %348 = vmatpush3.bf16.msra.mxu0 %v345_v22  ;;  %367 = vmatpush3.bf16.msra.mxu1 %v345_v22 }
  0x1e   :  { %350 = vmatprep.subr.bf16.mxu0 %v349_v25  ;;  %360 = vmatprep.subr.bf16.mxu1 %v349_v25 }
  0x21   :  { %352 = vmatpush3.bf16.msra.mxu0 %v349_v25  ;;  %368 = vmatpush3.bf16.msra.mxu1 %v349_v25 }
  0x24   :  { %298 = vmatmul.mubr.f32.vlgmr.msra.gmra.mrb[0].mxu0 %v16_v26  ;;  %310 = vmatmul.mubr.f32.vlgmr.msra.gmra.mrb[0].mxu1 %v24_v27 }
  0x25   :  { %300 = vmatprep.mubr.f32.mxu0 %v17_v28  ;;  %312 = vmatprep.mubr.f32.mxu1 %v25_v29 }
  0x28   :  { %301 = vmatmul.mubr.f32.gmra.mrb[2].mxu0 %v18_v30  ;;  %313 = vmatmul.mubr.f32.gmra.mrb[2].mxu1 %v26_v31 }
  0x29   :  { %303 = vmatprep.mubr.f32.mxu0 %v19_v32  ;;  %315 = vmatprep.mubr.f32.mxu1 %v27_v33 }
  0x2c   :  { %304 = vmatmul.mubr.f32.gmra.mrb[4].mxu0 %v20_v34  ;;  %316 = vmatmul.mubr.f32.gmra.mrb[4].mxu1 %v28_v35 }
  0x2d   :  { %306 = vmatprep.mubr.f32.mxu0 %v21_v36  ;;  %318 = vmatprep.mubr.f32.mxu1 %v29_v37 }
  0x30   :  { %307 = vmatmul.mubr.f32.gmra.mrb[6].mxu0 %v22_v38  ;;  %319 = vmatmul.mubr.f32.gmra.mrb[6].mxu1 %v30_v39 }
  0xf7   :  { %v299_v41 = vpop.f32.mrb[0].mxu0  ;;  %v311_v42 = vpop.f32.mrb[0].mxu1 }
  0xf8   :  { %v126_v43 = vadd.f32 %v299_v41, %v232_v40  ;;  %v166_v44 = vadd.f32 %v311_v42, %v232_v40  ;;  %v120_v45 = vpop.f32.mrb[1].mxu0  ;;  %v160_v46 = vpop.f32.mrb[1].mxu1 }
  0xf9   :  { %v121_v47 = vadd.f32 %v232_v40, %v120_v45  ;;  %v161_v48 = vadd.f32 %v232_v40, %v160_v46 }
  0xfa   :  { %201 = vst.msk [vmem:[#allocation2 + $0x8] sm:$0xff] %vm199_vm0, %v126_v43  ;;  %209 = vst.msk [vmem:[#allocation2 + $0x48] sm:$0xff] %vm199_vm0, %v166_v44 }
  0xfb   :  { %200 = vst.msk [vmem:[#allocation2] sm:$0xff] %vm199_vm0, %v121_v47  ;;  %208 = vst.msk [vmem:[#allocation2 + $0x40] sm:$0xff] %vm199_vm0, %v161_v48  ;;  %v302_v49 = vpop.f32.mrb[2].mxu0  ;;  %v314_v50 = vpop.f32.mrb[2].mxu1 }
  0xfc   :  { %v136_v51 = vadd.f32 %v302_v49, %v232_v40  ;;  %v176_v52 = vadd.f32 %v314_v50, %v232_v40  ;;  %v130_v53 = vpop.f32.mrb[3].mxu0  ;;  %v170_v54 = vpop.f32.mrb[3].mxu1 }
  0xfd   :  { %v131_v55 = vadd.f32 %v232_v40, %v130_v53  ;;  %v171_v56 = vadd.f32 %v232_v40, %v170_v54 }
  0xfe   :  { %203 = vst.msk [vmem:[#allocation2 + $0x18] sm:$0xff] %vm199_vm0, %v136_v51  ;;  %211 = vst.msk [vmem:[#allocation2 + $0x58] sm:$0xff] %vm199_vm0, %v176_v52 }
  0xff   :  { %202 = vst.msk [vmem:[#allocation2 + $0x10] sm:$0xff] %vm199_vm0, %v131_v55  ;;  %210 = vst.msk [vmem:[#allocation2 + $0x50] sm:$0xff] %vm199_vm0, %v171_v56  ;;  %v305_v57 = vpop.f32.mrb[4].mxu0  ;;  %v317_v58 = vpop.f32.mrb[4].mxu1 }
 0x100   :  { %v146_v59 = vadd.f32 %v305_v57, %v232_v40  ;;  %v186_v60 = vadd.f32 %v317_v58, %v232_v40  ;;  %v140_v61 = vpop.f32.mrb[5].mxu0  ;;  %v180_v62 = vpop.f32.mrb[5].mxu1 }
 0x101   :  { %v141_v63 = vadd.f32 %v232_v40, %v140_v61  ;;  %v181_v0 = vadd.f32 %v232_v40, %v180_v62 }
 0x102   :  { %205 = vst.msk [vmem:[#allocation2 + $0x28] sm:$0xff] %vm199_vm0, %v146_v59  ;;  %213 = vst.msk [vmem:[#allocation2 + $0x68] sm:$0xff] %vm199_vm0, %v186_v60 }
 0x103   :  { %204 = vst.msk [vmem:[#allocation2 + $0x20] sm:$0xff] %vm199_vm0, %v141_v63  ;;  %212 = vst.msk [vmem:[#allocation2 + $0x60] sm:$0xff] %vm199_vm0, %v181_v0  ;;  %v308_v1 = vpop.f32.mrb[6].mxu0  ;;  %v320_v2 = vpop.f32.mrb[6].mxu1 }
 0x104   :  { %v156_v3 = vadd.f32 %v308_v1, %v232_v40  ;;  %v196_v4 = vadd.f32 %v320_v2, %v232_v40  ;;  %v150_v5 = vpop.f32.mrb[7].mxu0  ;;  %v190_v6 = vpop.f32.mrb[7].mxu1 }
 0x105   :  { %v151_v7 = vadd.f32 %v232_v40, %v150_v5  ;;  %v191_v8 = vadd.f32 %v232_v40, %v190_v6 }
 0x106   :  { %207 = vst.msk [vmem:[#allocation2 + $0x38] sm:$0xff] %vm199_vm0, %v156_v3  ;;  %215 = vst.msk [vmem:[#allocation2 + $0x78] sm:$0xff] %vm199_vm0, %v196_v4 }
 0x107   :  { %206 = vst.msk [vmem:[#allocation2 + $0x30] sm:$0xff] %vm199_vm0, %v151_v7  ;;  %214 = vst.msk [vmem:[#allocation2 + $0x70] sm:$0xff] %vm199_vm0, %v191_v8 }
 0x108   :  { %383 = shalt.err (!%p380_p4)
}
 0x109   :  { %s384_s25 = scalar_lea.hbm %s549_s3, 2048 }
 0x10a   :  { %p385_p5 = scmp.ne.s32.totalorder %s549_s3, %s384_s25  ;;  %p388_p6 = scmp.lt.u32.totalorder %s384_s25, %s549_s3 }
 0x10c   :  { %p390_p7 = pnand %p388_p6, %p385_p5 }
 0x10e   :  { %393 = shalt.err (!%p390_p7)
}
 0x10f   :  { %s397_s30 = smov 128   ;;  %s398_s4 = smov 8  }
 0x110   :  { %227 = dma.vmem_to_hbm [thread:$0]  %s222_s2, 2048, %s549_s3, [#allocation3], %s397_s30, %s397_s30, %s398_s4  }
 0x111   :  { %394 = dma.done.wait [#allocation3], 2048  }
 0x112   :  { %395 = vsyncadd [#allocation3], 4294965248 }
 0x113   :  { %231 = vsyncpa [#allocation3], 1 }

// kernel: downstream_block_forward.2
= control target key start
LH: loop header
LB: loop body
LE: loop exit
PB: predicated region body
PF: predicated region fallthrough
CT: control target
= control target key end

     0   :  { %v7416_v0 = vmov 0.0|0.0   ;;  %vm7417_vm0 = vmmov 0   ;;  %v7418_v4 = vmov 0.0   ;;  %vm86_vm1 = vcmask 261120   ;;  %s9537_s1 = inlined_call_operand.vmem [shape: f32[9,32,64], index: 1, kind: input, shape index: {}]   ;;  %s9538_s0 = inlined_call_operand.vmem [shape: f32[152,32], index: 0, kind: input, shape index: {}]   ;;  %s9539_s4 = inlined_call_operand.vmem [shape: f32[120,1], index: 4, kind: input, shape index: {}]   ;;  %s9540_s3 = inlined_call_operand.vmem [shape: f32[64,64], index: 3, kind: input, shape index: {}]   ;;  %s9541_s2 = inlined_call_operand.vmem [shape: f32[9,64,64], index: 2, kind: input, shape index: {}]   ;;  %s9542_s5 = inlined_call_operand.vmem [shape: f32[1,64], index: 5, kind: input, shape index: {}]   ;;  %s9543_s6 = inlined_call_operand.vmem [shape: f32[1,64], index: 6, kind: input, shape index: {}]   ;;  %s9544_s7 = inlined_call_operand.vmem [shape: f32[1,64], index: 7, kind: input, shape index: {}]   ;;  %s9545_s8 = inlined_call_operand.vmem [shape: f32[1,64], index: 8, kind: input, shape index: {}]   ;;  %s9546_s9 = inlined_call_operand.vmem [shape: f32[120,64], index: 9, kind: output, shape index: {}]  }
   0x1   :  { %6716 = vmatprep.subr.bf16.mxu0 %v7416_v0  ;;  %v4830_v1 = vld [vmem:[%s9537_s1 + $0x20] sm:$0xff]  ;;  %v4831_v2 = vld [vmem:[%s9537_s1 + $0x28] sm:$0xff]  ;;  %v4832_v3 = vld [vmem:[%s9537_s1 + $0x30] sm:$0xff]  ;;  %5622 = vmatprep.mubr.msk.f32.mxu0 %vm7417_vm0, %v7418_v4  ;;  %vm2087_vm2 = vcmask 523264  }
   0x2   :  { %v6717_v5 = vpack.c.bf16 %v4831_v2, %v4830_v1  ;;  %v4833_v6 = vld [vmem:[%s9537_s1 + $0x38] sm:$0xff]  ;;  %6782 = vmatprep.subr.bf16.mxu1 %v7416_v0  ;;  %6126 = vmatprep.mubr.msk.f32.mxu1 %vm7417_vm0, %v7418_v4  ;;  %v62_v8 = vld [vmem:[%s9537_s1] sm:$0xff]  ;;  %v63_v9 = vld [vmem:[%s9537_s1 + $0x8] sm:$0xff]  ;;  %2440 = vst.msk [vmem:[#allocation2] sm:$0xff] %vm2087_vm2, %v7418_v4 }
   0x3   :  { %v6720_v7 = vpack.c.bf16 %v4833_v6, %v4832_v3  ;;  %v66_v10 = vld [vmem:[%s9538_s0 + $0x6] sm:$0xff]  ;;  %v6723_v11 = vpack.c.bf16 %v63_v9, %v62_v8  ;;  %v64_v12 = vld [vmem:[%s9537_s1 + $0x10] sm:$0xff]  ;;  %v65_v13 = vld [vmem:[%s9537_s1 + $0x18] sm:$0xff]  ;;  %2441 = vst.msk [vmem:[#allocation2 + $0x8] sm:$0xff] %vm2087_vm2, %v7418_v4 }
   0x4   :  { %6718 = vmatpush3.bf16.msra.mxu0 %v6717_v5  ;;  %v67_v14 = vld [vmem:[%s9538_s0 + $0xe] sm:$0xff]  ;;  %v6726_v15 = vpack.c.bf16 %v65_v13, %v64_v12  ;;  %v68_v16 = vld [vmem:[%s9538_s0 + $0x16] sm:$0xff]  ;;  %v69_v17 = vld [vmem:[%s9538_s0 + $0x1e] sm:$0xff]  ;;  %2442 = vst.msk [vmem:[#allocation2 + $0x10] sm:$0xff] %vm2087_vm2, %v7418_v4 }
   0x5   :  { %6719 = vmatprep.subr.bf16.mxu0 %v7416_v0  ;;  %v70_v18 = vld [vmem:[%s9538_s0 + $0x26] sm:$0xff]  ;;  %v71_v19 = vld [vmem:[%s9538_s0 + $0x2e] sm:$0xff]  ;;  %v72_v20 = vld [vmem:[%s9538_s0 + $0x36] sm:$0xff]  ;;  %2443 = vst.msk [vmem:[#allocation2 + $0x18] sm:$0xff] %vm2087_vm2, %v7418_v4 }
   0x6   :  { %v73_v21 = vld [vmem:[%s9538_s0 + $0x3e] sm:$0xff]  ;;  %v74_v22 = vld [vmem:[%s9538_s0 + $0x46] sm:$0xff]  ;;  %v75_v23 = vld [vmem:[%s9538_s0 + $0x4e] sm:$0xff]  ;;  %2444 = vst.msk [vmem:[#allocation2 + $0x20] sm:$0xff] %vm2087_vm2, %v7418_v4 }
   0x7   :  { %v76_v24 = vld [vmem:[%s9538_s0 + $0x56] sm:$0xff]  ;;  %v77_v25 = vld [vmem:[%s9538_s0 + $0x5e] sm:$0xff]  ;;  %v78_v26 = vld [vmem:[%s9538_s0 + $0x66] sm:$0xff]  ;;  %2445 = vst.msk [vmem:[#allocation2 + $0x28] sm:$0xff] %vm2087_vm2, %v7418_v4 }
   0x8   :  { %6721 = vmatpush3.bf16.msra.mxu0 %v6720_v7  ;;  %v79_v27 = vld [vmem:[%s9538_s0 + $0x6e] sm:$0xff]  ;;  %v80_v28 = vld [vmem:[%s9538_s0 + $0x76] sm:$0xff]  ;;  %v4864_v29 = vld [vmem:[%s9537_s1 + $0x40] sm:$0xff]  ;;  %2446 = vst.msk [vmem:[#allocation2 + $0x30] sm:$0xff] %vm2087_vm2, %v7418_v4 }
   0x9   :  { %6722 = vmatprep.subr.bf16.mxu0 %v7416_v0  ;;  %v4865_v30 = vld [vmem:[%s9537_s1 + $0x48] sm:$0xff]  ;;  %v4866_v33 = vld [vmem:[%s9537_s1 + $0x50] sm:$0xff]  ;;  %v4867_v34 = vld [vmem:[%s9537_s1 + $0x58] sm:$0xff]  ;;  %2447 = vst.msk [vmem:[#allocation2 + $0x38] sm:$0xff] %vm2087_vm2, %v7418_v4 }
   0xa   :  { %v47_v31 = vld [vmem:[%s9538_s0 + $0x5] sm:$0xff]  ;;  %v6729_v32 = vpack.c.bf16 %v4865_v30, %v4864_v29  ;;  %v48_v35 = vld [vmem:[%s9538_s0 + $0xd] sm:$0xff]  ;;  %v6732_v36 = vpack.c.bf16 %v4867_v34, %v4866_v33  ;;  %v49_v37 = vld [vmem:[%s9538_s0 + $0x15] sm:$0xff]  ;;  %2448 = vst.msk [vmem:[#allocation2 + $0x40] sm:$0xff] %vm2087_vm2, %v7418_v4 }
   0xb   :  { %5623 = vmatmul.mubr.msk.f32.vlgmr.msra.gmra.mrb[0].mxu0 %vm86_vm1, %v66_v10  ;;  %v50_v38 = vld [vmem:[%s9538_s0 + $0x1d] sm:$0xff]  ;;  %v51_v39 = vld [vmem:[%s9538_s0 + $0x25] sm:$0xff]  ;;  %v52_v40 = vld [vmem:[%s9538_s0 + $0x2d] sm:$0xff]  ;;  %2449 = vst.msk [vmem:[#allocation2 + $0x48] sm:$0xff] %vm2087_vm2, %v7418_v4 }
   0xc   :  { %6724 = vmatpush3.bf16.msra.mxu0 %v6723_v11  ;;  %5625 = vmatprep.mubr.msk.f32.mxu0 %vm7417_vm0, %v7418_v4  ;;  %v53_v41 = vld [vmem:[%s9538_s0 + $0x35] sm:$0xff]  ;;  %v54_v42 = vld [vmem:[%s9538_s0 + $0x3d] sm:$0xff]  ;;  %v55_v43 = vld [vmem:[%s9538_s0 + $0x45] sm:$0xff]  ;;  %2450 = vst.msk [vmem:[#allocation2 + $0x50] sm:$0xff] %vm2087_vm2, %v7418_v4 }
   0xd   :  { %6725 = vmatprep.subr.bf16.mxu0 %v7416_v0  ;;  %v56_v44 = vld [vmem:[%s9538_s0 + $0x4d] sm:$0xff]  ;;  %v57_v45 = vld [vmem:[%s9538_s0 + $0x55] sm:$0xff]  ;;  %v58_v46 = vld [vmem:[%s9538_s0 + $0x5d] sm:$0xff]  ;;  %2451 = vst.msk [vmem:[#allocation2 + $0x58] sm:$0xff] %vm2087_vm2, %v7418_v4 }
   0xe   :  { %v59_v47 = vld [vmem:[%s9538_s0 + $0x65] sm:$0xff]  ;;  %v60_v48 = vld [vmem:[%s9538_s0 + $0x6d] sm:$0xff]  ;;  %v61_v49 = vld [vmem:[%s9538_s0 + $0x75] sm:$0xff]  ;;  %2452 = vst.msk [vmem:[#allocation2 + $0x60] sm:$0xff] %vm2087_vm2, %v7418_v4 }
   0xf   :  { %5626 = vmatmul.mubr.msk.f32.gmra.mrb[2].mxu0 %vm86_vm1, %v67_v14  ;;  %v4883_v50 = vld [vmem:[%s9537_s1 + $0x60] sm:$0xff]  ;;  %v4884_v51 = vld [vmem:[%s9537_s1 + $0x68] sm:$0xff]  ;;  %v4885_v54 = vld [vmem:[%s9537_s1 + $0x70] sm:$0xff]  ;;  %2453 = vst.msk [vmem:[#allocation2 + $0x68] sm:$0xff] %vm2087_vm2, %v7418_v4 }
  0x10   :  { %5628 = vmatprep.mubr.msk.f32.mxu0 %vm7417_vm0, %v7418_v4  ;;  %6727 = vmatpush3.bf16.msra.mxu0 %v6726_v15  ;;  %v457_v52 = vld [vmem:[%s9538_s0 + $0x7] sm:$0xff]  ;;  %v6735_v53 = vpack.c.bf16 %v4884_v51, %v4883_v50  ;;  %v4886_v55 = vld [vmem:[%s9537_s1 + $0x78] sm:$0xff]  ;;  %v458_v56 = vld [vmem:[%s9538_s0 + $0xf] sm:$0xff]  ;;  %2454 = vst.msk [vmem:[#allocation2 + $0x70] sm:$0xff] %vm2087_vm2, %v7418_v4 }
  0x11   :  { %6728 = vmatprep.subr.bf16.mxu0 %v7416_v0  ;;  %v6738_v57 = vpack.c.bf16 %v4886_v55, %v4885_v54  ;;  %v459_v58 = vld [vmem:[%s9538_s0 + $0x17] sm:$0xff]  ;;  %v460_v59 = vld [vmem:[%s9538_s0 + $0x1f] sm:$0xff]  ;;  %v461_v60 = vld [vmem:[%s9538_s0 + $0x27] sm:$0xff]  ;;  %2455 = vst.msk [vmem:[#allocation2 + $0x78] sm:$0xff] %vm2087_vm2, %v7418_v4 }
  0x12   :  { %v462_v61 = vld [vmem:[%s9538_s0 + $0x2f] sm:$0xff]  ;;  %v463_v62 = vld [vmem:[%s9538_s0 + $0x37] sm:$0xff]  ;;  %v464_v63 = vld [vmem:[%s9538_s0 + $0x3f] sm:$0xff]  ;;  %2456 = vst.msk [vmem:[#allocation2 + $0x80] sm:$0xff] %vm2087_vm2, %v7418_v4 }
  0x13   :  { %5629 = vmatmul.mubr.msk.f32.gmra.mrb[4].mxu0 %vm86_vm1, %v68_v16  ;;  %v465_v1 = vld [vmem:[%s9538_s0 + $0x47] sm:$0xff]  ;;  %v466_v2 = vld [vmem:[%s9538_s0 + $0x4f] sm:$0xff]  ;;  %v467_v3 = vld [vmem:[%s9538_s0 + $0x57] sm:$0xff]  ;;  %2457 = vst.msk [vmem:[#allocation2 + $0x88] sm:$0xff] %vm2087_vm2, %v7418_v4 }
  0x14   :  { %5631 = vmatprep.mubr.msk.f32.mxu0 %vm7417_vm0, %v7418_v4  ;;  %v468_v5 = vld [vmem:[%s9538_s0 + $0x5f] sm:$0xff]  ;;  %v469_v6 = vld [vmem:[%s9538_s0 + $0x67] sm:$0xff]  ;;  %v470_v7 = vld [vmem:[%s9538_s0 + $0x6f] sm:$0xff]  ;;  %2458 = vst.msk [vmem:[#allocation2 + $0x90] sm:$0xff] %vm2087_vm2, %v7418_v4 }
  0x15   :  { %v471_v8 = vld [vmem:[%s9538_s0 + $0x77] sm:$0xff]  ;;  %v4902_v9 = vld [vmem:[%s9537_s1 + $0x80] sm:$0xff]  ;;  %v4903_v10 = vld [vmem:[%s9537_s1 + $0x88] sm:$0xff] }
  0x16   :  { %v6741_v11 = vpack.c.bf16 %v4903_v10, %v4902_v9  ;;  %v4904_v12 = vld [vmem:[%s9537_s1 + $0x90] sm:$0xff]  ;;  %v4905_v13 = vld [vmem:[%s9537_s1 + $0x98] sm:$0xff]  ;;  %v4921_v16 = vld [vmem:[%s9537_s1 + $0xa0] sm:$0xff] }
  0x17   :  { %5632 = vmatmul.mubr.msk.f32.gmra.mrb[6].mxu0 %vm86_vm1, %v69_v17  ;;  %v6744_v14 = vpack.c.bf16 %v4905_v13, %v4904_v12  ;;  %v691_v15 = vld [vmem:[%s9538_s0 + $0x7f] sm:$0xff]  ;;  %v4922_v17 = vld [vmem:[%s9537_s1 + $0xa8] sm:$0xff]  ;;  %v905_v30 = vld [vmem:[%s9538_s0 + $0x50] sm:$0xff] }
  0x18   :  { %5634 = vmatprep.mubr.msk.f32.mxu0 %vm7417_vm0, %v7418_v4  ;;  %v904_v29 = vld [vmem:[%s9538_s0 + $0x48] sm:$0xff]  ;;  %v909_v34 = vld [vmem:[%s9538_s0 + $0x70] sm:$0xff]  ;;  %v36_v10 = vld [vmem:[%s9539_s4 + $0x20] sm:$0xff] }
  0x19   :  { %v908_v33 = vld [vmem:[%s9538_s0 + $0x68] sm:$0xff]  ;;  %v1125_v51 = vld [vmem:[%s9538_s0 + $0x51] sm:$0xff]  ;;  %v1557_v12 = vld [vmem:[%s9538_s0 + $0x1a] sm:$0xff] }
  0x1a   :  { %v1124_v50 = vld [vmem:[%s9538_s0 + $0x49] sm:$0xff]  ;;  %v1129_v55 = vld [vmem:[%s9538_s0 + $0x71] sm:$0xff] }
  0x1b   :  { %5635 = vmatmul.mubr.msk.f32.gmra.mrb[8].mxu0 %vm86_vm1, %v70_v18  ;;  %v897_v18 = vld [vmem:[%s9538_s0 + $0x10] sm:$0xff]  ;;  %v4979_v9 = vld [vmem:[%s9537_s1 + $0x108] sm:$0xff] }
  0x1c   :  { %5637 = vmatprep.mubr.msk.f32.mxu0 %vm7417_vm0, %v7418_v4  ;;  %v1128_v54 = vld [vmem:[%s9538_s0 + $0x69] sm:$0xff] }
  0x1f   :  { %5638 = vmatmul.mubr.msk.f32.gmra.mrb[10].mxu0 %vm86_vm1, %v71_v19  ;;  %v6747_v19 = vpack.c.bf16 %v4922_v17, %v4921_v16  ;;  %v38_v16 = vld [vmem:[%s9539_s4 + $0x30] sm:$0xff]  ;;  %v39_v17 = vld [vmem:[%s9539_s4 + $0x38] sm:$0xff] }
  0x20   :  { %5640 = vmatprep.mubr.msk.f32.mxu0 %vm7417_vm0, %v7418_v4 }
  0x23   :  { %5641 = vmatmul.mubr.msk.f32.gmra.mrb[12].mxu0 %vm86_vm1, %v72_v20  ;;  %v4923_v20 = vld [vmem:[%s9537_s1 + $0xb0] sm:$0xff] }
  0x24   :  { %5643 = vmatprep.mubr.msk.f32.mxu0 %vm7417_vm0, %v7418_v4 }
  0x27   :  { %5644 = vmatmul.mubr.msk.f32.gmra.mrb[14].mxu0 %vm86_vm1, %v73_v21  ;;  %v4924_v21 = vld [vmem:[%s9537_s1 + $0xb8] sm:$0xff] }
  0x28   :  { %5646 = vmatprep.mubr.msk.f32.mxu0 %vm7417_vm0, %v7418_v4 }
  0x2b   :  { %5647 = vmatmul.mubr.msk.f32.gmra.mrb[16].mxu0 %vm86_vm1, %v74_v22  ;;  %v898_v22 = vld [vmem:[%s9538_s0 + $0x18] sm:$0xff] }
  0x2c   :  { %5649 = vmatprep.mubr.msk.f32.mxu0 %vm7417_vm0, %v7418_v4 }
  0x2f   :  { %5650 = vmatmul.mubr.msk.f32.gmra.mrb[18].mxu0 %vm86_vm1, %v75_v23  ;;  %v6750_v23 = vpack.c.bf16 %v4924_v21, %v4923_v20  ;;  %v40_v20 = vld [vmem:[%s9539_s4 + $0x40] sm:$0xff]  ;;  %v41_v21 = vld [vmem:[%s9539_s4 + $0x48] sm:$0xff] }
  0x30   :  { %5652 = vmatprep.mubr.msk.f32.mxu0 %vm7417_vm0, %v7418_v4 }
  0x33   :  { %5653 = vmatmul.mubr.msk.f32.gmra.mrb[20].mxu0 %vm86_vm1, %v76_v24  ;;  %v899_v24 = vld [vmem:[%s9538_s0 + $0x20] sm:$0xff] }
  0x34   :  { %5655 = vmatprep.mubr.msk.f32.mxu0 %vm7417_vm0, %v7418_v4 }
  0x37   :  { %5656 = vmatmul.mubr.msk.f32.gmra.mrb[22].mxu0 %vm86_vm1, %v77_v25  ;;  %v900_v25 = vld [vmem:[%s9538_s0 + $0x28] sm:$0xff] }
  0x38   :  { %5658 = vmatprep.mubr.msk.f32.mxu0 %vm7417_vm0, %v7418_v4 }
  0x3b   :  { %5659 = vmatmul.mubr.msk.f32.gmra.mrb[24].mxu0 %vm86_vm1, %v78_v26  ;;  %v901_v26 = vld [vmem:[%s9538_s0 + $0x30] sm:$0xff] }
  0x3c   :  { %5661 = vmatprep.mubr.msk.f32.mxu0 %vm7417_vm0, %v7418_v4 }
  0x3f   :  { %5662 = vmatmul.mubr.msk.f32.gmra.mrb[26].mxu0 %vm86_vm1, %v79_v27  ;;  %v902_v27 = vld [vmem:[%s9538_s0 + $0x38] sm:$0xff] }
  0x40   :  { %5664 = vmatprep.mubr.msk.f32.mxu0 %vm7417_vm0, %v7418_v4 }
  0x43   :  { %5665 = vmatmul.mubr.msk.f32.gmra.mrb[28].mxu0 %vm86_vm1, %v80_v28  ;;  %v903_v28 = vld [vmem:[%s9538_s0 + $0x40] sm:$0xff] }
  0x44   :  { %5675 = vmatprep.mubr.msk.f32.mxu0 %vm7417_vm0, %v7418_v4 }
  0x47   :  { %5676 = vmatmul.mubr.msk.f32.vlgmr.msra.gmra.mrb[0].mxu0 %vm86_vm1, %v47_v31  ;;  %v906_v31 = vld [vmem:[%s9538_s0 + $0x58] sm:$0xff] }
  0x48   :  { %6730 = vmatpush3.bf16.msra.mxu0 %v6729_v32  ;;  %5678 = vmatprep.mubr.msk.f32.mxu0 %vm7417_vm0, %v7418_v4  ;;  %v907_v32 = vld [vmem:[%s9538_s0 + $0x60] sm:$0xff] }
  0x49   :  { %6731 = vmatprep.subr.bf16.mxu0 %v7416_v0 }
  0x4b   :  { %5679 = vmatmul.mubr.msk.f32.gmra.mrb[2].mxu0 %vm86_vm1, %v48_v35  ;;  %v910_v35 = vld [vmem:[%s9538_s0 + $0x78] sm:$0xff] }
  0x4c   :  { %5681 = vmatprep.mubr.msk.f32.mxu0 %vm7417_vm0, %v7418_v4  ;;  %6733 = vmatpush3.bf16.msra.mxu0 %v6732_v36  ;;  %v911_v36 = vld [vmem:[%s9538_s0 + $0x80] sm:$0xff] }
  0x4d   :  { %6734 = vmatprep.subr.bf16.mxu0 %v7416_v0 }
  0x4f   :  { %5682 = vmatmul.mubr.msk.f32.gmra.mrb[4].mxu0 %vm86_vm1, %v49_v37  ;;  %v4940_v37 = vld [vmem:[%s9537_s1 + $0xc0] sm:$0xff] }
  0x50   :  { %5684 = vmatprep.mubr.msk.f32.mxu0 %vm7417_vm0, %v7418_v4 }
  0x53   :  { %5685 = vmatmul.mubr.msk.f32.gmra.mrb[6].mxu0 %vm86_vm1, %v50_v38  ;;  %v4941_v38 = vld [vmem:[%s9537_s1 + $0xc8] sm:$0xff] }
  0x54   :  { %5687 = vmatprep.mubr.msk.f32.mxu0 %vm7417_vm0, %v7418_v4 }
  0x57   :  { %5688 = vmatmul.mubr.msk.f32.gmra.mrb[8].mxu0 %vm86_vm1, %v51_v39  ;;  %v1117_v39 = vld [vmem:[%s9538_s0 + $0x11] sm:$0xff] }
  0x58   :  { %5690 = vmatprep.mubr.msk.f32.mxu0 %vm7417_vm0, %v7418_v4 }
  0x5b   :  { %5691 = vmatmul.mubr.msk.f32.gmra.mrb[10].mxu0 %vm86_vm1, %v52_v40  ;;  %v6753_v40 = vpack.c.bf16 %v4941_v38, %v4940_v37  ;;  %v1569_v37 = vld [vmem:[%s9538_s0 + $0x7a] sm:$0xff]  ;;  %v1570_v38 = vld [vmem:[%s9538_s0 + $0x82] sm:$0xff] }
  0x5c   :  { %5693 = vmatprep.mubr.msk.f32.mxu0 %vm7417_vm0, %v7418_v4 }
  0x5f   :  { %5694 = vmatmul.mubr.msk.f32.gmra.mrb[12].mxu0 %vm86_vm1, %v53_v41  ;;  %v4942_v41 = vld [vmem:[%s9537_s1 + $0xd0] sm:$0xff] }
  0x60   :  { %5696 = vmatprep.mubr.msk.f32.mxu0 %vm7417_vm0, %v7418_v4 }
  0x63   :  { %5697 = vmatmul.mubr.msk.f32.gmra.mrb[14].mxu0 %vm86_vm1, %v54_v42  ;;  %v4943_v42 = vld [vmem:[%s9537_s1 + $0xd8] sm:$0xff] }
  0x64   :  { %5699 = vmatprep.mubr.msk.f32.mxu0 %vm7417_vm0, %v7418_v4 }
  0x67   :  { %5700 = vmatmul.mubr.msk.f32.gmra.mrb[16].mxu0 %vm86_vm1, %v55_v43  ;;  %v1118_v43 = vld [vmem:[%s9538_s0 + $0x19] sm:$0xff] }
  0x68   :  { %5702 = vmatprep.mubr.msk.f32.mxu0 %vm7417_vm0, %v7418_v4 }
  0x6b   :  { %5703 = vmatmul.mubr.msk.f32.gmra.mrb[18].mxu0 %vm86_vm1, %v56_v44  ;;  %v6756_v44 = vpack.c.bf16 %v4943_v42, %v4942_v41  ;;  %v1778_v41 = vld [vmem:[%s9538_s0 + $0x23] sm:$0xff]  ;;  %v1779_v42 = vld [vmem:[%s9538_s0 + $0x2b] sm:$0xff] }
  0x6c   :  { %5705 = vmatprep.mubr.msk.f32.mxu0 %vm7417_vm0, %v7418_v4 }
  0x6f   :  { %5706 = vmatmul.mubr.msk.f32.gmra.mrb[20].mxu0 %vm86_vm1, %v57_v45  ;;  %v1119_v45 = vld [vmem:[%s9538_s0 + $0x21] sm:$0xff] }
  0x70   :  { %5708 = vmatprep.mubr.msk.f32.mxu0 %vm7417_vm0, %v7418_v4 }
  0x73   :  { %5709 = vmatmul.mubr.msk.f32.gmra.mrb[22].mxu0 %vm86_vm1, %v58_v46  ;;  %v1120_v46 = vld [vmem:[%s9538_s0 + $0x29] sm:$0xff] }
  0x74   :  { %5711 = vmatprep.mubr.msk.f32.mxu0 %vm7417_vm0, %v7418_v4 }
  0x77   :  { %5712 = vmatmul.mubr.msk.f32.gmra.mrb[24].mxu0 %vm86_vm1, %v59_v47  ;;  %v1121_v47 = vld [vmem:[%s9538_s0 + $0x31] sm:$0xff] }
  0x78   :  { %5714 = vmatprep.mubr.msk.f32.mxu0 %vm7417_vm0, %v7418_v4 }
  0x7b   :  { %5715 = vmatmul.mubr.msk.f32.gmra.mrb[26].mxu0 %vm86_vm1, %v60_v48  ;;  %v1122_v48 = vld [vmem:[%s9538_s0 + $0x39] sm:$0xff] }
  0x7c   :  { %5717 = vmatprep.mubr.msk.f32.mxu0 %vm7417_vm0, %v7418_v4 }
  0x7f   :  { %5718 = vmatmul.mubr.msk.f32.gmra.mrb[28].mxu0 %vm86_vm1, %v61_v49  ;;  %v1123_v49 = vld [vmem:[%s9538_s0 + $0x41] sm:$0xff] }
  0x80   :  { %5728 = vmatprep.mubr.msk.f32.mxu0 %vm7417_vm0, %v7418_v4 }
  0x83   :  { %5729 = vmatmul.mubr.msk.f32.vlgmr.msra.gmra.mrb[0].mxu0 %vm86_vm1, %v457_v52  ;;  %v1126_v52 = vld [vmem:[%s9538_s0 + $0x59] sm:$0xff] }
  0x84   :  { %6736 = vmatpush3.bf16.msra.mxu0 %v6735_v53  ;;  %5731 = vmatprep.mubr.msk.f32.mxu0 %vm7417_vm0, %v7418_v4  ;;  %v1127_v53 = vld [vmem:[%s9538_s0 + $0x61] sm:$0xff] }
  0x85   :  { %6737 = vmatprep.subr.bf16.mxu0 %v7416_v0 }
  0x87   :  { %5732 = vmatmul.mubr.msk.f32.gmra.mrb[2].mxu0 %vm86_vm1, %v458_v56 }
  0x88   :  { %5734 = vmatprep.mubr.msk.f32.mxu0 %vm7417_vm0, %v7418_v4  ;;  %6739 = vmatpush3.bf16.msra.mxu0 %v6738_v57  ;;  %v1131_v57 = vld [vmem:[%s9538_s0 + $0x81] sm:$0xff] }
  0x89   :  { %6740 = vmatprep.subr.bf16.mxu0 %v7416_v0 }
  0x8b   :  { %5735 = vmatmul.mubr.msk.f32.gmra.mrb[4].mxu0 %vm86_vm1, %v459_v58 }
  0x8c   :  { %5737 = vmatprep.mubr.msk.f32.mxu0 %vm7417_vm0, %v7418_v4 }
  0x8f   :  { %5738 = vmatmul.mubr.msk.f32.gmra.mrb[6].mxu0 %vm86_vm1, %v460_v59 }
  0x90   :  { %5740 = vmatprep.mubr.msk.f32.mxu0 %vm7417_vm0, %v7418_v4 }
  0x93   :  { %5741 = vmatmul.mubr.msk.f32.gmra.mrb[8].mxu0 %vm86_vm1, %v461_v60 }
  0x94   :  { %5743 = vmatprep.mubr.msk.f32.mxu0 %vm7417_vm0, %v7418_v4 }
  0x97   :  { %5744 = vmatmul.mubr.msk.f32.gmra.mrb[10].mxu0 %vm86_vm1, %v462_v61 }
  0x98   :  { %5746 = vmatprep.mubr.msk.f32.mxu0 %vm7417_vm0, %v7418_v4 }
  0x9b   :  { %5747 = vmatmul.mubr.msk.f32.gmra.mrb[12].mxu0 %vm86_vm1, %v463_v62 }
  0x9c   :  { %5749 = vmatprep.mubr.msk.f32.mxu0 %vm7417_vm0, %v7418_v4 }
  0x9f   :  { %5750 = vmatmul.mubr.msk.f32.gmra.mrb[14].mxu0 %vm86_vm1, %v464_v63 }
  0xa0   :  { %5752 = vmatprep.mubr.msk.f32.mxu0 %vm7417_vm0, %v7418_v4 }
  0xa3   :  { %5753 = vmatmul.mubr.msk.f32.gmra.mrb[16].mxu0 %vm86_vm1, %v465_v1 }
  0xa4   :  { %5755 = vmatprep.mubr.msk.f32.mxu0 %vm7417_vm0, %v7418_v4 }
  0xa7   :  { %5756 = vmatmul.mubr.msk.f32.gmra.mrb[18].mxu0 %vm86_vm1, %v466_v2 }
  0xa8   :  { %5758 = vmatprep.mubr.msk.f32.mxu0 %vm7417_vm0, %v7418_v4 }
  0xab   :  { %5759 = vmatmul.mubr.msk.f32.gmra.mrb[20].mxu0 %vm86_vm1, %v467_v3 }
  0xac   :  { %5761 = vmatprep.mubr.msk.f32.mxu0 %vm7417_vm0, %v7418_v4 }
  0xaf   :  { %5762 = vmatmul.mubr.msk.f32.gmra.mrb[22].mxu0 %vm86_vm1, %v468_v5 }
  0xb0   :  { %5764 = vmatprep.mubr.msk.f32.mxu0 %vm7417_vm0, %v7418_v4 }
  0xb3   :  { %5765 = vmatmul.mubr.msk.f32.gmra.mrb[24].mxu0 %vm86_vm1, %v469_v6 }
  0xb4   :  { %5767 = vmatprep.mubr.msk.f32.mxu0 %vm7417_vm0, %v7418_v4 }
  0xb7   :  { %5768 = vmatmul.mubr.msk.f32.gmra.mrb[26].mxu0 %vm86_vm1, %v470_v7 }
  0xb8   :  { %5770 = vmatprep.mubr.msk.f32.mxu0 %vm7417_vm0, %v7418_v4 }
  0xbb   :  { %5771 = vmatmul.mubr.msk.f32.gmra.mrb[28].mxu0 %vm86_vm1, %v471_v8 }
  0xbc   :  { %5781 = vmatprep.mubr.msk.f32.mxu0 %vm7417_vm0, %v7418_v4 }
  0xbf   :  { %5782 = vmatmul.mubr.msk.f32.vlgmr.msra.gmra.mrb[0].mxu0 %vm86_vm1, %v458_v56  ;;  %v1130_v56 = vld [vmem:[%s9538_s0 + $0x79] sm:$0xff] }
  0xc0   :  { %6742 = vmatpush3.bf16.msra.mxu0 %v6741_v11  ;;  %5784 = vmatprep.mubr.msk.f32.mxu0 %vm7417_vm0, %v7418_v4  ;;  %v37_v11 = vld [vmem:[%s9539_s4 + $0x28] sm:$0xff] }
  0xc1   :  { %6743 = vmatprep.subr.bf16.mxu0 %v7416_v0 }
  0xc3   :  { %5785 = vmatmul.mubr.msk.f32.gmra.mrb[2].mxu0 %vm86_vm1, %v459_v58  ;;  %v4959_v58 = vld [vmem:[%s9537_s1 + $0xe0] sm:$0xff] }
  0xc4   :  { %5787 = vmatprep.mubr.msk.f32.mxu0 %vm7417_vm0, %v7418_v4  ;;  %6745 = vmatpush3.bf16.msra.mxu0 %v6744_v14  ;;  %v4980_v14 = vld [vmem:[%s9537_s1 + $0x110] sm:$0xff] }
  0xc5   :  { %6746 = vmatprep.subr.bf16.mxu0 %v7416_v0 }
  0xc7   :  { %5788 = vmatmul.mubr.msk.f32.gmra.mrb[4].mxu0 %vm86_vm1, %v460_v59  ;;  %v4960_v59 = vld [vmem:[%s9537_s1 + $0xe8] sm:$0xff] }
  0xc8   :  { %5790 = vmatprep.mubr.msk.f32.mxu0 %vm7417_vm0, %v7418_v4 }
  0xcb   :  { %5791 = vmatmul.mubr.msk.f32.gmra.mrb[6].mxu0 %vm86_vm1, %v461_v60  ;;  %v6759_v60 = vpack.c.bf16 %v4960_v59, %v4959_v58  ;;  %v2175_v58 = vld [vmem:[%s9540_s3 + $0x10] sm:$0xff]  ;;  %v2176_v59 = vld [vmem:[%s9540_s3 + $0x18] sm:$0xff] }
  0xcc   :  { %5793 = vmatprep.mubr.msk.f32.mxu0 %vm7417_vm0, %v7418_v4 }
  0xcf   :  { %5794 = vmatmul.mubr.msk.f32.gmra.mrb[8].mxu0 %vm86_vm1, %v462_v61  ;;  %v4961_v61 = vld [vmem:[%s9537_s1 + $0xf0] sm:$0xff] }
  0xd0   :  { %5796 = vmatprep.mubr.msk.f32.mxu0 %vm7417_vm0, %v7418_v4 }
  0xd3   :  { %5797 = vmatmul.mubr.msk.f32.gmra.mrb[10].mxu0 %vm86_vm1, %v463_v62  ;;  %v4962_v62 = vld [vmem:[%s9537_s1 + $0xf8] sm:$0xff] }
  0xd4   :  { %5799 = vmatprep.mubr.msk.f32.mxu0 %vm7417_vm0, %v7418_v4 }
  0xd7   :  { %5800 = vmatmul.mubr.msk.f32.gmra.mrb[12].mxu0 %vm86_vm1, %v464_v63  ;;  %v6762_v63 = vpack.c.bf16 %v4962_v62, %v4961_v61  ;;  %v2177_v61 = vld [vmem:[%s9540_s3 + $0x20] sm:$0xff]  ;;  %v2178_v62 = vld [vmem:[%s9540_s3 + $0x28] sm:$0xff] }
  0xd8   :  { %5802 = vmatprep.mubr.msk.f32.mxu0 %vm7417_vm0, %v7418_v4 }
  0xdb   :  { %5803 = vmatmul.mubr.msk.f32.gmra.mrb[14].mxu0 %vm86_vm1, %v465_v1  ;;  %v7419_v1 = vmov 0  }
  0xdc   :  { %5805 = vmatprep.mubr.msk.f32.mxu0 %vm7417_vm0, %v7418_v4  ;;  %7410 = vset.pattern.permute.xlu0 %v7419_v1 }
  0xdd   :  { %7411 = vset.pattern.permute.xlu1 %v7419_v1  ;;  %v2179_v1 = vld [vmem:[%s9540_s3 + $0x30] sm:$0xff] }
  0xdf   :  { %5806 = vmatmul.mubr.msk.f32.gmra.mrb[16].mxu0 %vm86_vm1, %v466_v2  ;;  %v32_v2 = vld [vmem:[%s9539_s4] sm:$0xff] }
  0xe0   :  { %5808 = vmatprep.mubr.msk.f32.mxu0 %vm7417_vm0, %v7418_v4  ;;  %1999 = vperm.xlu0 %7410, %v32_v2   ;;  %v2180_v2 = vld [vmem:[%s9540_s3 + $0x38] sm:$0xff] }
  0xe3   :  { %5809 = vmatmul.mubr.msk.f32.gmra.mrb[18].mxu0 %vm86_vm1, %v467_v3  ;;  %v34_v3 = vld [vmem:[%s9539_s4 + $0x10] sm:$0xff] }
  0xe4   :  { %5811 = vmatprep.mubr.msk.f32.mxu0 %vm7417_vm0, %v7418_v4  ;;  %2009 = vperm.xlu1 %7411, %v34_v3   ;;  %v6780_v3 = vpack.c.bf16 %v2180_v2, %v2179_v1 }
  0xe7   :  { %5812 = vmatmul.mubr.msk.f32.gmra.mrb[20].mxu0 %vm86_vm1, %v468_v5  ;;  %v33_v5 = vld [vmem:[%s9539_s4 + $0x8] sm:$0xff] }
  0xe8   :  { %5814 = vmatprep.mubr.msk.f32.mxu0 %vm7417_vm0, %v7418_v4  ;;  %2004 = vperm.xlu0 %7410, %v33_v5  }
  0xeb   :  { %5815 = vmatmul.mubr.msk.f32.gmra.mrb[22].mxu0 %vm86_vm1, %v469_v6  ;;  %v35_v6 = vld [vmem:[%s9539_s4 + $0x18] sm:$0xff] }
  0xec   :  { %5817 = vmatprep.mubr.msk.f32.mxu0 %vm7417_vm0, %v7418_v4  ;;  %2014 = vperm.xlu1 %7411, %v35_v6  }
  0xed   :  { %2019 = vperm.xlu0 %7410, %v36_v10  }
  0xef   :  { %5818 = vmatmul.mubr.msk.f32.gmra.mrb[24].mxu0 %vm86_vm1, %v470_v7  ;;  %v1351_v7 = vld [vmem:[%s9538_s0 + $0x89] sm:$0xff] }
  0xf0   :  { %5820 = vmatprep.mubr.msk.f32.mxu0 %vm7417_vm0, %v7418_v4  ;;  %2024 = vperm.xlu1 %7411, %v37_v11  }
  0xf1   :  { %2029 = vperm.xlu0 %7410, %v38_v16  }
  0xf3   :  { %5821 = vmatmul.mubr.msk.f32.gmra.mrb[26].mxu0 %vm86_vm1, %v471_v8  ;;  %v4978_v8 = vld [vmem:[%s9537_s1 + $0x100] sm:$0xff] }
  0xf4   :  { %5823 = vmatprep.mubr.msk.f32.mxu0 %vm7417_vm0, %v7418_v4  ;;  %v6765_v13 = vpack.c.bf16 %v4979_v9, %v4978_v8  ;;  %2034 = vperm.xlu1 %7411, %v39_v17  }
  0xf5   :  { %2039 = vperm.xlu0 %7410, %v40_v20  }
  0xf7   :  { %5824 = vmatmul.mubr.msk.f32.gmra.mrb[28].mxu0 %vm86_vm1, %v691_v15  ;;  %v4981_v15 = vld [vmem:[%s9537_s1 + $0x118] sm:$0xff] }
  0xf8   :  { %5834 = vmatprep.mubr.msk.f32.mxu0 %vm7417_vm0, %v7418_v4  ;;  %2044 = vperm.xlu1 %7411, %v41_v21  }
  0xfb   :  { %5835 = vmatmul.mubr.msk.f32.vlgmr.msra.gmra.mrb[0].mxu0 %vm86_vm1, %v897_v18  ;;  %v1558_v18 = vld [vmem:[%s9538_s0 + $0x22] sm:$0xff] }
  0xfc   :  { %6748 = vmatpush3.bf16.msra.mxu0 %v6747_v19  ;;  %5837 = vmatprep.mubr.msk.f32.mxu0 %vm7417_vm0, %v7418_v4  ;;  %v6768_v19 = vpack.c.bf16 %v4981_v15, %v4980_v14 }
  0xfd   :  { %6749 = vmatprep.subr.bf16.mxu0 %v7416_v0 }
  0xff   :  { %5838 = vmatmul.mubr.msk.f32.gmra.mrb[2].mxu0 %vm86_vm1, %v898_v22  ;;  %v1559_v22 = vld [vmem:[%s9538_s0 + $0x2a] sm:$0xff] }
 0x100   :  { %5840 = vmatprep.mubr.msk.f32.mxu0 %vm7417_vm0, %v7418_v4  ;;  %6751 = vmatpush3.bf16.msra.mxu0 %v6750_v23  ;;  %v42_v23 = vld [vmem:[%s9539_s4 + $0x50] sm:$0xff] }
 0x101   :  { %6752 = vmatprep.subr.bf16.mxu0 %v7416_v0  ;;  %2049 = vperm.xlu0 %7410, %v42_v23  }
 0x103   :  { %5841 = vmatmul.mubr.msk.f32.gmra.mrb[4].mxu0 %vm86_vm1, %v899_v24  ;;  %v43_v24 = vld [vmem:[%s9539_s4 + $0x58] sm:$0xff] }
 0x104   :  { %5843 = vmatprep.mubr.msk.f32.mxu0 %vm7417_vm0, %v7418_v4  ;;  %2054 = vperm.xlu1 %7411, %v43_v24  }
 0x107   :  { %5844 = vmatmul.mubr.msk.f32.gmra.mrb[6].mxu0 %vm86_vm1, %v900_v25  ;;  %v1560_v25 = vld [vmem:[%s9538_s0 + $0x32] sm:$0xff] }
 0x108   :  { %5846 = vmatprep.mubr.msk.f32.mxu0 %vm7417_vm0, %v7418_v4 }
 0x10b   :  { %5847 = vmatmul.mubr.msk.f32.gmra.mrb[8].mxu0 %vm86_vm1, %v901_v26  ;;  %v44_v26 = vld [vmem:[%s9539_s4 + $0x60] sm:$0xff] }
 0x10c   :  { %5849 = vmatprep.mubr.msk.f32.mxu0 %vm7417_vm0, %v7418_v4  ;;  %2059 = vperm.xlu0 %7410, %v44_v26  }
 0x10f   :  { %5850 = vmatmul.mubr.msk.f32.gmra.mrb[10].mxu0 %vm86_vm1, %v902_v27  ;;  %v45_v27 = vld [vmem:[%s9539_s4 + $0x68] sm:$0xff] }
 0x110   :  { %5852 = vmatprep.mubr.msk.f32.mxu0 %vm7417_vm0, %v7418_v4  ;;  %2064 = vperm.xlu1 %7411, %v45_v27  }
 0x113   :  { %5853 = vmatmul.mubr.msk.f32.gmra.mrb[12].mxu0 %vm86_vm1, %v903_v28  ;;  %v1561_v28 = vld [vmem:[%s9538_s0 + $0x3a] sm:$0xff] }
 0x114   :  { %5855 = vmatprep.mubr.msk.f32.mxu0 %vm7417_vm0, %v7418_v4 }
 0x117   :  { %5856 = vmatmul.mubr.msk.f32.gmra.mrb[14].mxu0 %vm86_vm1, %v904_v29  ;;  %v46_v29 = vld [vmem:[%s9539_s4 + $0x70] sm:$0xff] }
 0x118   :  { %5858 = vmatprep.mubr.msk.f32.mxu0 %vm7417_vm0, %v7418_v4  ;;  %2069 = vperm.xlu0 %7410, %v46_v29  }
 0x11b   :  { %5859 = vmatmul.mubr.msk.f32.gmra.mrb[16].mxu0 %vm86_vm1, %v905_v30  ;;  %v1562_v30 = vld [vmem:[%s9538_s0 + $0x42] sm:$0xff] }
 0x11c   :  { %5861 = vmatprep.mubr.msk.f32.mxu0 %vm7417_vm0, %v7418_v4 }
 0x11f   :  { %5862 = vmatmul.mubr.msk.f32.gmra.mrb[18].mxu0 %vm86_vm1, %v906_v31  ;;  %v1563_v31 = vld [vmem:[%s9538_s0 + $0x4a] sm:$0xff] }
 0x120   :  { %5864 = vmatprep.mubr.msk.f32.mxu0 %vm7417_vm0, %v7418_v4 }
 0x123   :  { %5865 = vmatmul.mubr.msk.f32.gmra.mrb[20].mxu0 %vm86_vm1, %v907_v32  ;;  %v1564_v32 = vld [vmem:[%s9538_s0 + $0x52] sm:$0xff] }
 0x124   :  { %5867 = vmatprep.mubr.msk.f32.mxu0 %vm7417_vm0, %v7418_v4 }
 0x127   :  { %5868 = vmatmul.mubr.msk.f32.gmra.mrb[22].mxu0 %vm86_vm1, %v908_v33  ;;  %v1565_v33 = vld [vmem:[%s9538_s0 + $0x5a] sm:$0xff] }
 0x128   :  { %5870 = vmatprep.mubr.msk.f32.mxu0 %vm7417_vm0, %v7418_v4 }
 0x12b   :  { %5871 = vmatmul.mubr.msk.f32.gmra.mrb[24].mxu0 %vm86_vm1, %v909_v34  ;;  %v1566_v34 = vld [vmem:[%s9538_s0 + $0x62] sm:$0xff] }
 0x12c   :  { %5873 = vmatprep.mubr.msk.f32.mxu0 %vm7417_vm0, %v7418_v4 }
 0x12f   :  { %5874 = vmatmul.mubr.msk.f32.gmra.mrb[26].mxu0 %vm86_vm1, %v910_v35  ;;  %v1567_v35 = vld [vmem:[%s9538_s0 + $0x6a] sm:$0xff] }
 0x130   :  { %5876 = vmatprep.mubr.msk.f32.mxu0 %vm7417_vm0, %v7418_v4 }
 0x133   :  { %5877 = vmatmul.mubr.msk.f32.gmra.mrb[28].mxu0 %vm86_vm1, %v911_v36  ;;  %v1568_v36 = vld [vmem:[%s9538_s0 + $0x72] sm:$0xff] }
 0x134   :  { %5887 = vmatprep.mubr.msk.f32.mxu0 %vm7417_vm0, %v7418_v4 }
 0x137   :  { %5888 = vmatmul.mubr.msk.f32.vlgmr.msra.gmra.mrb[0].mxu0 %vm86_vm1, %v1117_v39  ;;  %v1571_v39 = vld [vmem:[%s9538_s0 + $0x8a] sm:$0xff] }
 0x138   :  { %6754 = vmatpush3.bf16.msra.mxu0 %v6753_v40  ;;  %5890 = vmatprep.mubr.msk.f32.mxu0 %vm7417_vm0, %v7418_v4  ;;  %v1777_v40 = vld [vmem:[%s9538_s0 + $0x1b] sm:$0xff] }
 0x139   :  { %6755 = vmatprep.subr.bf16.mxu0 %v7416_v0 }
 0x13b   :  { %5891 = vmatmul.mubr.msk.f32.gmra.mrb[2].mxu0 %vm86_vm1, %v1118_v43 }
 0x13c   :  { %5893 = vmatprep.mubr.msk.f32.mxu0 %vm7417_vm0, %v7418_v4  ;;  %6757 = vmatpush3.bf16.msra.mxu0 %v6756_v44  ;;  %v1781_v44 = vld [vmem:[%s9538_s0 + $0x3b] sm:$0xff] }
 0x13d   :  { %6758 = vmatprep.subr.bf16.mxu0 %v7416_v0 }
 0x13f   :  { %5894 = vmatmul.mubr.msk.f32.gmra.mrb[4].mxu0 %vm86_vm1, %v1119_v45 }
 0x140   :  { %5896 = vmatprep.mubr.msk.f32.mxu0 %vm7417_vm0, %v7418_v4 }
 0x143   :  { %5897 = vmatmul.mubr.msk.f32.gmra.mrb[6].mxu0 %vm86_vm1, %v1120_v46 }
 0x144   :  { %5899 = vmatprep.mubr.msk.f32.mxu0 %vm7417_vm0, %v7418_v4 }
 0x147   :  { %5900 = vmatmul.mubr.msk.f32.gmra.mrb[8].mxu0 %vm86_vm1, %v1121_v47 }
 0x148   :  { %5902 = vmatprep.mubr.msk.f32.mxu0 %vm7417_vm0, %v7418_v4 }
 0x14b   :  { %5903 = vmatmul.mubr.msk.f32.gmra.mrb[10].mxu0 %vm86_vm1, %v1122_v48 }
 0x14c   :  { %5905 = vmatprep.mubr.msk.f32.mxu0 %vm7417_vm0, %v7418_v4 }
 0x14f   :  { %5906 = vmatmul.mubr.msk.f32.gmra.mrb[12].mxu0 %vm86_vm1, %v1123_v49 }
 0x150   :  { %5908 = vmatprep.mubr.msk.f32.mxu0 %vm7417_vm0, %v7418_v4 }
 0x153   :  { %5909 = vmatmul.mubr.msk.f32.gmra.mrb[14].mxu0 %vm86_vm1, %v1124_v50 }
 0x154   :  { %5911 = vmatprep.mubr.msk.f32.mxu0 %vm7417_vm0, %v7418_v4 }
 0x157   :  { %5912 = vmatmul.mubr.msk.f32.gmra.mrb[16].mxu0 %vm86_vm1, %v1125_v51 }
 0x158   :  { %5914 = vmatprep.mubr.msk.f32.mxu0 %vm7417_vm0, %v7418_v4 }
 0x15b   :  { %5915 = vmatmul.mubr.msk.f32.gmra.mrb[18].mxu0 %vm86_vm1, %v1126_v52 }
 0x15c   :  { %5917 = vmatprep.mubr.msk.f32.mxu0 %vm7417_vm0, %v7418_v4 }
 0x15f   :  { %5918 = vmatmul.mubr.msk.f32.gmra.mrb[20].mxu0 %vm86_vm1, %v1127_v53  ;;  %v8443_v5 = vpop.permute.xlu0 %1999 }
 0x160   :  { %5920 = vmatprep.mubr.msk.f32.mxu0 %vm7417_vm0, %v7418_v4 }
 0x163   :  { %5921 = vmatmul.mubr.msk.f32.gmra.mrb[22].mxu0 %vm86_vm1, %v1128_v54  ;;  %v8455_v14 = vpop.permute.xlu1 %2009 }
 0x164   :  { %5923 = vmatprep.mubr.msk.f32.mxu0 %vm7417_vm0, %v7418_v4 }
 0x167   :  { %5924 = vmatmul.mubr.msk.f32.gmra.mrb[24].mxu0 %vm86_vm1, %v1129_v55  ;;  %v8449_v9 = vpop.permute.xlu0 %2004 }
 0x168   :  { %5926 = vmatprep.mubr.msk.f32.mxu0 %vm7417_vm0, %v7418_v4 }
 0x16b   :  { %5927 = vmatmul.mubr.msk.f32.gmra.mrb[26].mxu0 %vm86_vm1, %v1130_v56 }
 0x16c   :  { %5929 = vmatprep.mubr.msk.f32.mxu0 %vm7417_vm0, %v7418_v4 }
 0x16f   :  { %5930 = vmatmul.mubr.msk.f32.gmra.mrb[28].mxu0 %vm86_vm1, %v1131_v57 }
 0x170   :  { %5940 = vmatprep.mubr.msk.f32.mxu0 %vm7417_vm0, %v7418_v4 }
 0x173   :  { %5941 = vmatmul.mubr.msk.f32.vlgmr.msra.gmra.mrb[0].mxu0 %vm86_vm1, %v1118_v43  ;;  %v1780_v43 = vld [vmem:[%s9538_s0 + $0x33] sm:$0xff] }
 0x174   :  { %6760 = vmatpush3.bf16.msra.mxu0 %v6759_v60  ;;  %5943 = vmatprep.mubr.msk.f32.mxu0 %vm7417_vm0, %v7418_v4  ;;  %v6774_v60 = vpack.c.bf16 %v2176_v59, %v2175_v58 }
 0x175   :  { %6761 = vmatprep.subr.bf16.mxu0 %v7416_v0 }
 0x177   :  { %5944 = vmatmul.mubr.msk.f32.gmra.mrb[2].mxu0 %vm86_vm1, %v1119_v45  ;;  %v1782_v45 = vld [vmem:[%s9538_s0 + $0x43] sm:$0xff] }
 0x178   :  { %5946 = vmatprep.mubr.msk.f32.mxu0 %vm7417_vm0, %v7418_v4  ;;  %6763 = vmatpush3.bf16.msra.mxu0 %v6762_v63  ;;  %v6777_v63 = vpack.c.bf16 %v2178_v62, %v2177_v61 }
 0x179   :  { %6764 = vmatprep.subr.bf16.mxu0 %v7416_v0 }
 0x17b   :  { %5947 = vmatmul.mubr.msk.f32.gmra.mrb[4].mxu0 %vm86_vm1, %v1120_v46  ;;  %v1783_v46 = vld [vmem:[%s9538_s0 + $0x4b] sm:$0xff] }
 0x17c   :  { %5949 = vmatprep.mubr.msk.f32.mxu0 %vm7417_vm0, %v7418_v4 }
 0x17f   :  { %5950 = vmatmul.mubr.msk.f32.gmra.mrb[6].mxu0 %vm86_vm1, %v1121_v47  ;;  %v1784_v47 = vld [vmem:[%s9538_s0 + $0x53] sm:$0xff] }
 0x180   :  { %5952 = vmatprep.mubr.msk.f32.mxu0 %vm7417_vm0, %v7418_v4 }
 0x183   :  { %5953 = vmatmul.mubr.msk.f32.gmra.mrb[8].mxu0 %vm86_vm1, %v1122_v48  ;;  %v1785_v48 = vld [vmem:[%s9538_s0 + $0x5b] sm:$0xff] }
 0x184   :  { %5955 = vmatprep.mubr.msk.f32.mxu0 %vm7417_vm0, %v7418_v4 }
 0x187   :  { %5956 = vmatmul.mubr.msk.f32.gmra.mrb[10].mxu0 %vm86_vm1, %v1123_v49  ;;  %v1786_v49 = vld [vmem:[%s9538_s0 + $0x63] sm:$0xff] }
 0x188   :  { %5958 = vmatprep.mubr.msk.f32.mxu0 %vm7417_vm0, %v7418_v4 }
 0x18b   :  { %5959 = vmatmul.mubr.msk.f32.gmra.mrb[12].mxu0 %vm86_vm1, %v1124_v50  ;;  %v1787_v50 = vld [vmem:[%s9538_s0 + $0x6b] sm:$0xff] }
 0x18c   :  { %5961 = vmatprep.mubr.msk.f32.mxu0 %vm7417_vm0, %v7418_v4 }
 0x18f   :  { %5962 = vmatmul.mubr.msk.f32.gmra.mrb[14].mxu0 %vm86_vm1, %v1125_v51  ;;  %v1788_v51 = vld [vmem:[%s9538_s0 + $0x73] sm:$0xff] }
 0x190   :  { %5964 = vmatprep.mubr.msk.f32.mxu0 %vm7417_vm0, %v7418_v4 }
 0x193   :  { %5965 = vmatmul.mubr.msk.f32.gmra.mrb[16].mxu0 %vm86_vm1, %v1126_v52  ;;  %v1789_v52 = vld [vmem:[%s9538_s0 + $0x7b] sm:$0xff] }
 0x194   :  { %5967 = vmatprep.mubr.msk.f32.mxu0 %vm7417_vm0, %v7418_v4 }
 0x197   :  { %5968 = vmatmul.mubr.msk.f32.gmra.mrb[18].mxu0 %vm86_vm1, %v1127_v53  ;;  %v1790_v53 = vld [vmem:[%s9538_s0 + $0x83] sm:$0xff] }
 0x198   :  { %5970 = vmatprep.mubr.msk.f32.mxu0 %vm7417_vm0, %v7418_v4 }
 0x19b   :  { %5971 = vmatmul.mubr.msk.f32.gmra.mrb[20].mxu0 %vm86_vm1, %v1128_v54  ;;  %v1791_v54 = vld [vmem:[%s9538_s0 + $0x8b] sm:$0xff] }
 0x19c   :  { %5973 = vmatprep.mubr.msk.f32.mxu0 %vm7417_vm0, %v7418_v4 }
 0x19f   :  { %5974 = vmatmul.mubr.msk.f32.gmra.mrb[22].mxu0 %vm86_vm1, %v1129_v55  ;;  %v2173_v55 = vld [vmem:[%s9540_s3] sm:$0xff] }
 0x1a0   :  { %5976 = vmatprep.mubr.msk.f32.mxu0 %vm7417_vm0, %v7418_v4 }
 0x1a3   :  { %5977 = vmatmul.mubr.msk.f32.gmra.mrb[24].mxu0 %vm86_vm1, %v1130_v56  ;;  %v2174_v56 = vld [vmem:[%s9540_s3 + $0x8] sm:$0xff] }
 0x1a4   :  { %5979 = vmatprep.mubr.msk.f32.mxu0 %vm7417_vm0, %v7418_v4 }
 0x1a7   :  { %5980 = vmatmul.mubr.msk.f32.gmra.mrb[26].mxu0 %vm86_vm1, %v1131_v57  ;;  %v6771_v57 = vpack.c.bf16 %v2174_v56, %v2173_v55 }
 0x1a8   :  { %5982 = vmatprep.mubr.msk.f32.mxu0 %vm7417_vm0, %v7418_v4 }
 0x1a9   :  { %6784 = vmatpush3.bf16.msra.mxu1 %v6771_v57 }
 0x1aa   :  { %6785 = vmatprep.subr.bf16.mxu1 %v7416_v0 }
 0x1ab   :  { %5983 = vmatmul.mubr.msk.f32.gmra.mrb[28].mxu0 %vm86_vm1, %v1351_v7 }
 0x1ac   :  { %5993 = vmatprep.mubr.msk.f32.mxu0 %vm7417_vm0, %v7418_v4 }
 0x1ad   :  { %6787 = vmatpush3.bf16.msra.mxu1 %v6774_v60 }
 0x1ae   :  { %6788 = vmatprep.subr.bf16.mxu1 %v7416_v0 }
 0x1af   :  { %5994 = vmatmul.mubr.msk.f32.vlgmr.msra.gmra.mrb[0].mxu0 %vm86_vm1, %v1557_v12 }
 0x1b0   :  { %6766 = vmatpush3.bf16.msra.mxu0 %v6765_v13  ;;  %5996 = vmatprep.mubr.msk.f32.mxu0 %vm7417_vm0, %v7418_v4 }
 0x1b1   :  { %6767 = vmatprep.subr.bf16.mxu0 %v7416_v0  ;;  %6790 = vmatpush3.bf16.msra.mxu1 %v6777_v63 }
 0x1b2   :  { %6791 = vmatprep.subr.bf16.mxu1 %v7416_v0 }
 0x1b3   :  { %5997 = vmatmul.mubr.msk.f32.gmra.mrb[2].mxu0 %vm86_vm1, %v1558_v18 }
 0x1b4   :  { %5999 = vmatprep.mubr.msk.f32.mxu0 %vm7417_vm0, %v7418_v4  ;;  %6769 = vmatpush3.bf16.msra.mxu0 %v6768_v19 }
 0x1b5   :  { %6770 = vmatprep.subr.bf16.mxu0 %v7416_v0  ;;  %6793 = vmatpush3.bf16.msra.mxu1 %v6780_v3 }
 0x1b6   :  { %6794 = vmatprep.subr.bf16.mxu1 %v7416_v0 }
 0x1b7   :  { %6000 = vmatmul.mubr.msk.f32.gmra.mrb[4].mxu0 %vm86_vm1, %v1559_v22 }
 0x1b8   :  { %6002 = vmatprep.mubr.msk.f32.mxu0 %vm7417_vm0, %v7418_v4 }
 0x1bb   :  { %6003 = vmatmul.mubr.msk.f32.gmra.mrb[6].mxu0 %vm86_vm1, %v1560_v25 }
 0x1bc   :  { %6005 = vmatprep.mubr.msk.f32.mxu0 %vm7417_vm0, %v7418_v4 }
 0x1bf   :  { %6006 = vmatmul.mubr.msk.f32.gmra.mrb[8].mxu0 %vm86_vm1, %v1561_v28  ;;  %v8466_v28 = vpop.permute.xlu1 %2014 }
 0x1c0   :  { %6008 = vmatprep.mubr.msk.f32.mxu0 %vm7417_vm0, %v7418_v4 }
 0x1c3   :  { %6009 = vmatmul.mubr.msk.f32.gmra.mrb[10].mxu0 %vm86_vm1, %v1562_v30 }
 0x1c4   :  { %6011 = vmatprep.mubr.msk.f32.mxu0 %vm7417_vm0, %v7418_v4 }
 0x1c7   :  { %6012 = vmatmul.mubr.msk.f32.gmra.mrb[12].mxu0 %vm86_vm1, %v1563_v31 }
 0x1c8   :  { %6014 = vmatprep.mubr.msk.f32.mxu0 %vm7417_vm0, %v7418_v4 }
 0x1cb   :  { %6015 = vmatmul.mubr.msk.f32.gmra.mrb[14].mxu0 %vm86_vm1, %v1564_v32 }
 0x1cc   :  { %6017 = vmatprep.mubr.msk.f32.mxu0 %vm7417_vm0, %v7418_v4 }
 0x1cf   :  { %6018 = vmatmul.mubr.msk.f32.gmra.mrb[16].mxu0 %vm86_vm1, %v1565_v33 }
 0x1d0   :  { %6020 = vmatprep.mubr.msk.f32.mxu0 %vm7417_vm0, %v7418_v4 }
 0x1d3   :  { %6021 = vmatmul.mubr.msk.f32.gmra.mrb[18].mxu0 %vm86_vm1, %v1566_v34 }
 0x1d4   :  { %6023 = vmatprep.mubr.msk.f32.mxu0 %vm7417_vm0, %v7418_v4 }
 0x1d7   :  { %6024 = vmatmul.mubr.msk.f32.gmra.mrb[20].mxu0 %vm86_vm1, %v1567_v35 }
 0x1d8   :  { %6026 = vmatprep.mubr.msk.f32.mxu0 %vm7417_vm0, %v7418_v4 }
 0x1db   :  { %6027 = vmatmul.mubr.msk.f32.gmra.mrb[22].mxu0 %vm86_vm1, %v1568_v36  ;;  %v8474_v36 = vpop.permute.xlu0 %2019 }
 0x1dc   :  { %6029 = vmatprep.mubr.msk.f32.mxu0 %vm7417_vm0, %v7418_v4 }
 0x1df   :  { %6030 = vmatmul.mubr.msk.f32.gmra.mrb[24].mxu0 %vm86_vm1, %v1569_v37 }
 0x1e0   :  { %6032 = vmatprep.mubr.msk.f32.mxu0 %vm7417_vm0, %v7418_v4 }
 0x1e3   :  { %6033 = vmatmul.mubr.msk.f32.gmra.mrb[26].mxu0 %vm86_vm1, %v1570_v38 }
 0x1e4   :  { %6035 = vmatprep.mubr.msk.f32.mxu0 %vm7417_vm0, %v7418_v4 }
 0x1e7   :  { %6036 = vmatmul.mubr.msk.f32.gmra.mrb[28].mxu0 %vm86_vm1, %v1571_v39 }
 0x1e8   :  { %6046 = vmatprep.mubr.msk.f32.mxu0 %vm7417_vm0, %v7418_v4 }
 0x1eb   :  { %6047 = vmatmul.mubr.msk.f32.vlgmr.msra.gmra.mrb[0].mxu0 %vm86_vm1, %v1777_v40 }
 0x1ec   :  { %6049 = vmatprep.mubr.msk.f32.mxu0 %vm7417_vm0, %v7418_v4  ;;  %6772 = vmatpush3.bf16.msra.mxu0 %v6771_v57 }
 0x1ed   :  { %6773 = vmatprep.subr.bf16.mxu0 %v7416_v0 }
 0x1ef   :  { %6050 = vmatmul.mubr.msk.f32.gmra.mrb[2].mxu0 %vm86_vm1, %v1778_v41 }
 0x1f0   :  { %6052 = vmatprep.mubr.msk.f32.mxu0 %vm7417_vm0, %v7418_v4  ;;  %6775 = vmatpush3.bf16.msra.mxu0 %v6774_v60 }
 0x1f1   :  { %6776 = vmatprep.subr.bf16.mxu0 %v7416_v0 }
 0x1f3   :  { %6053 = vmatmul.mubr.msk.f32.gmra.mrb[4].mxu0 %vm86_vm1, %v1779_v42 }
 0x1f4   :  { %6055 = vmatprep.mubr.msk.f32.mxu0 %vm7417_vm0, %v7418_v4  ;;  %6778 = vmatpush3.bf16.msra.mxu0 %v6777_v63 }
 0x1f5   :  { %6779 = vmatprep.subr.bf16.mxu0 %v7416_v0 }
 0x1f7   :  { %6056 = vmatmul.mubr.msk.f32.gmra.mrb[6].mxu0 %vm86_vm1, %v1780_v43 }
 0x1f8   :  { %6058 = vmatprep.mubr.msk.f32.mxu0 %vm7417_vm0, %v7418_v4  ;;  %6781 = vmatpush3.bf16.msra.mxu0 %v6780_v3 }
 0x1f9   :  { %6914 = vmatprep.subr.bf16.mxu0 %v7416_v0 }
 0x1fb   :  { %6059 = vmatmul.mubr.msk.f32.gmra.mrb[8].mxu0 %vm86_vm1, %v1781_v44 }
 0x1fc   :  { %6061 = vmatprep.mubr.msk.f32.mxu0 %vm7417_vm0, %v7418_v4 }
 0x1ff   :  { %6062 = vmatmul.mubr.msk.f32.gmra.mrb[10].mxu0 %vm86_vm1, %v1782_v45  ;;  %v8482_v45 = vpop.permute.xlu1 %2024 }
 0x200   :  { %6064 = vmatprep.mubr.msk.f32.mxu0 %vm7417_vm0, %v7418_v4 }
 0x203   :  { %6065 = vmatmul.mubr.msk.f32.gmra.mrb[12].mxu0 %vm86_vm1, %v1783_v46  ;;  %v8498_v63 = vpop.permute.xlu1 %2034 }
 0x204   :  { %6067 = vmatprep.mubr.msk.f32.mxu0 %vm7417_vm0, %v7418_v4 }
 0x207   :  { %6068 = vmatmul.mubr.msk.f32.gmra.mrb[14].mxu0 %vm86_vm1, %v1784_v47 }
 0x208   :  { %6070 = vmatprep.mubr.msk.f32.mxu0 %vm7417_vm0, %v7418_v4 }
 0x20b   :  { %6071 = vmatmul.mubr.msk.f32.gmra.mrb[16].mxu0 %vm86_vm1, %v1785_v48 }
 0x20c   :  { %6073 = vmatprep.mubr.msk.f32.mxu0 %vm7417_vm0, %v7418_v4 }
 0x20f   :  { %6074 = vmatmul.mubr.msk.f32.gmra.mrb[18].mxu0 %vm86_vm1, %v1786_v49 }
 0x210   :  { %6076 = vmatprep.mubr.msk.f32.mxu0 %vm7417_vm0, %v7418_v4 }
 0x213   :  { %6077 = vmatmul.mubr.msk.f32.gmra.mrb[20].mxu0 %vm86_vm1, %v1787_v50 }
 0x214   :  { %6079 = vmatprep.mubr.msk.f32.mxu0 %vm7417_vm0, %v7418_v4 }
 0x217   :  { %6080 = vmatmul.mubr.msk.f32.gmra.mrb[22].mxu0 %vm86_vm1, %v1788_v51 }
 0x218   :  { %6082 = vmatprep.mubr.msk.f32.mxu0 %vm7417_vm0, %v7418_v4 }
 0x21b   :  { %6083 = vmatmul.mubr.msk.f32.gmra.mrb[24].mxu0 %vm86_vm1, %v1789_v52 }
 0x21c   :  { %6085 = vmatprep.mubr.msk.f32.mxu0 %vm7417_vm0, %v7418_v4 }
 0x21f   :  { %6086 = vmatmul.mubr.msk.f32.gmra.mrb[26].mxu0 %vm86_vm1, %v1790_v53 }
 0x220   :  { %6088 = vmatprep.mubr.msk.f32.mxu0 %vm7417_vm0, %v7418_v4 }
 0x223   :  { %6089 = vmatmul.mubr.msk.f32.gmra.mrb[28].mxu0 %vm86_vm1, %v1791_v54  ;;  %v8490_v54 = vpop.permute.xlu0 %2029 }
 0x224   :  { %6107 = vmatprep.mubr.msk.f32.mxu0 %vm7417_vm0, %v7418_v4 }
 0x2be   :  { %v8445_v6 = vpop.f32.mrb[0].mxu0 }
 0x2bf   :  { %v2072_v7 = vmul.f32 %v8443_v5, %v8445_v6  ;;  %v6048_v8 = vpop.f32.mrb[1].mxu0 }
 0x2c1   :  { %v2123_v11 = vmul.f32 %v2072_v7, %v2072_v7  ;;  %v2088_v15 = vsel %vm2087_vm2, %v2072_v7, 0.0 }
 0x2c2   :  { %v8451_v10 = vpop.f32.mrb[2].mxu0 }
 0x2c3   :  { %v2073_v12 = vmul.f32 %v8449_v9, %v8451_v10  ;;  %v6051_v13 = vpop.f32.mrb[3].mxu0  ;;  %v2138_v20 = vsel %vm2087_vm2, %v2123_v11, 0.0 }
 0x2c5   :  { %v2089_v16 = vsel %vm2087_vm2, %v2073_v12, 0.0  ;;  %v2124_v17 = vmul.f32 %v2073_v12, %v2073_v12 }
 0x2c6   :  { %v2090_v18 = vadd.f32 %v2089_v16, %v2088_v15  ;;  %v8459_v19 = vpop.f32.mrb[4].mxu0  ;;  %v8506_v15 = vpop.permute.xlu0 %2039 }
 0x2c7   :  { %v2139_v21 = vsel %vm2087_vm2, %v2124_v17, 0.0  ;;  %v2074_v22 = vmul.f32 %v8455_v14, %v8459_v19  ;;  %v6054_v23 = vpop.f32.mrb[5].mxu0 }
 0x2c8   :  { %v2140_v24 = vadd.f32 %v2139_v21, %v2138_v20 }
 0x2c9   :  { %v2091_v25 = vsel %vm2087_vm2, %v2074_v22, 0.0  ;;  %v2125_v26 = vmul.f32 %v2074_v22, %v2074_v22 }
 0x2ca   :  { %v2092_v27 = vadd.f32 %v2091_v25, %v2090_v18  ;;  %v8468_v29 = vpop.f32.mrb[6].mxu0  ;;  %v8514_v25 = vpop.permute.xlu1 %2044 }
 0x2cb   :  { %v2141_v30 = vsel %vm2087_vm2, %v2125_v26, 0.0  ;;  %v2075_v31 = vmul.f32 %v8466_v28, %v8468_v29  ;;  %v6057_v32 = vpop.f32.mrb[7].mxu0 }
 0x2cc   :  { %v2142_v33 = vadd.f32 %v2141_v30, %v2140_v24 }
 0x2cd   :  { %v2093_v34 = vsel %vm2087_vm2, %v2075_v31, 0.0  ;;  %v2126_v35 = vmul.f32 %v2075_v31, %v2075_v31 }
 0x2ce   :  { %v2094_v37 = vadd.f32 %v2093_v34, %v2092_v27  ;;  %v8476_v38 = vpop.f32.mrb[8].mxu0 }
 0x2cf   :  { %v2143_v39 = vsel %vm2087_vm2, %v2126_v35, 0.0  ;;  %v2076_v40 = vmul.f32 %v8474_v36, %v8476_v38  ;;  %v6060_v41 = vpop.f32.mrb[9].mxu0 }
 0x2d0   :  { %v2144_v42 = vadd.f32 %v2143_v39, %v2142_v33 }
 0x2d1   :  { %v2095_v43 = vsel %vm2087_vm2, %v2076_v40, 0.0  ;;  %v2127_v44 = vmul.f32 %v2076_v40, %v2076_v40 }
 0x2d2   :  { %v2096_v46 = vadd.f32 %v2095_v43, %v2094_v37  ;;  %v8484_v47 = vpop.f32.mrb[10].mxu0  ;;  %v8522_v37 = vpop.permute.xlu0 %2049 }
 0x2d3   :  { %v2145_v48 = vsel %vm2087_vm2, %v2127_v44, 0.0  ;;  %v2077_v49 = vmul.f32 %v8482_v45, %v8484_v47  ;;  %v6063_v50 = vpop.f32.mrb[11].mxu0 }
 0x2d4   :  { %v2146_v51 = vadd.f32 %v2145_v48, %v2144_v42 }
 0x2d5   :  { %v2097_v52 = vsel %vm2087_vm2, %v2077_v49, 0.0  ;;  %v2128_v53 = vmul.f32 %v2077_v49, %v2077_v49  ;;  %v8530_v49 = vpop.permute.xlu1 %2054 }
 0x2d6   :  { %v2098_v55 = vadd.f32 %v2097_v52, %v2096_v46  ;;  %v8492_v56 = vpop.f32.mrb[12].mxu0 }
 0x2d7   :  { %v2147_v57 = vsel %vm2087_vm2, %v2128_v53, 0.0  ;;  %v2078_v58 = vmul.f32 %v8490_v54, %v8492_v56  ;;  %v6066_v59 = vpop.f32.mrb[13].mxu0 }
 0x2d8   :  { %v2148_v60 = vadd.f32 %v2147_v57, %v2146_v51 }
 0x2d9   :  { %v2099_v61 = vsel %vm2087_vm2, %v2078_v58, 0.0  ;;  %v2129_v62 = vmul.f32 %v2078_v58, %v2078_v58 }
 0x2da   :  { %v2100_v1 = vadd.f32 %v2099_v61, %v2098_v55  ;;  %v8500_v2 = vpop.f32.mrb[14].mxu0 }
 0x2db   :  { %v2149_v3 = vsel %vm2087_vm2, %v2129_v62, 0.0  ;;  %v2079_v7 = vmul.f32 %v8498_v63, %v8500_v2  ;;  %v6069_v8 = vpop.f32.mrb[15].mxu0 }
 0x2dc   :  { %v2150_v11 = vadd.f32 %v2149_v3, %v2148_v60  ;;  %v8538_v60 = vpop.permute.xlu0 %2059 }
 0x2dd   :  { %v2101_v12 = vsel %vm2087_vm2, %v2079_v7, 0.0  ;;  %v2130_v13 = vmul.f32 %v2079_v7, %v2079_v7 }
 0x2de   :  { %v2102_v16 = vadd.f32 %v2101_v12, %v2100_v1  ;;  %v8508_v17 = vpop.f32.mrb[16].mxu0 }
 0x2df   :  { %v2151_v18 = vsel %vm2087_vm2, %v2130_v13, 0.0  ;;  %v2080_v20 = vmul.f32 %v8506_v15, %v8508_v17  ;;  %v6072_v21 = vpop.f32.mrb[17].mxu0  ;;  %v8546_v13 = vpop.permute.xlu1 %2064 }
 0x2e0   :  { %v2152_v22 = vadd.f32 %v2151_v18, %v2150_v11 }
 0x2e1   :  { %v2103_v23 = vsel %vm2087_vm2, %v2080_v20, 0.0  ;;  %v2131_v24 = vmul.f32 %v2080_v20, %v2080_v20 }
 0x2e2   :  { %v2104_v26 = vadd.f32 %v2103_v23, %v2102_v16  ;;  %v8516_v27 = vpop.f32.mrb[18].mxu0 }
 0x2e3   :  { %v2153_v30 = vsel %vm2087_vm2, %v2131_v24, 0.0  ;;  %v2081_v31 = vmul.f32 %v8514_v25, %v8516_v27  ;;  %v6075_v32 = vpop.f32.mrb[19].mxu0 }
 0x2e4   :  { %v2154_v33 = vadd.f32 %v2153_v30, %v2152_v22  ;;  %v8554_v30 = vpop.permute.xlu0 %2069 }
 0x2e5   :  { %v2105_v34 = vsel %vm2087_vm2, %v2081_v31, 0.0  ;;  %v2132_v35 = vmul.f32 %v2081_v31, %v2081_v31 }
 0x2e6   :  { %v2106_v39 = vadd.f32 %v2105_v34, %v2104_v26  ;;  %v8524_v40 = vpop.f32.mrb[20].mxu0 }
 0x2e7   :  { %v2155_v41 = vsel %vm2087_vm2, %v2132_v35, 0.0  ;;  %v2082_v42 = vmul.f32 %v8522_v37, %v8524_v40  ;;  %v6078_v43 = vpop.f32.mrb[21].mxu0 }
 0x2e8   :  { %v2156_v44 = vadd.f32 %v2155_v41, %v2154_v33 }
 0x2e9   :  { %v2107_v46 = vsel %vm2087_vm2, %v2082_v42, 0.0  ;;  %v2133_v48 = vmul.f32 %v2082_v42, %v2082_v42 }
 0x2ea   :  { %v2108_v50 = vadd.f32 %v2107_v46, %v2106_v39  ;;  %v8532_v51 = vpop.f32.mrb[22].mxu0 }
 0x2eb   :  { %v2157_v52 = vsel %vm2087_vm2, %v2133_v48, 0.0  ;;  %v2083_v53 = vmul.f32 %v8530_v49, %v8532_v51  ;;  %v6081_v55 = vpop.f32.mrb[23].mxu0 }
 0x2ec   :  { %v2158_v57 = vadd.f32 %v2157_v52, %v2156_v44 }
 0x2ed   :  { %v2109_v58 = vsel %vm2087_vm2, %v2083_v53, 0.0  ;;  %v2134_v59 = vmul.f32 %v2083_v53, %v2083_v53 }
 0x2ee   :  { %v2110_v61 = vadd.f32 %v2109_v58, %v2108_v50  ;;  %v8540_v62 = vpop.f32.mrb[24].mxu0 }
 0x2ef   :  { %v2159_v1 = vsel %vm2087_vm2, %v2134_v59, 0.0  ;;  %v2084_v3 = vmul.f32 %v8538_v60, %v8540_v62  ;;  %v6084_v7 = vpop.f32.mrb[25].mxu0 }
 0x2f0   :  { %v2160_v8 = vadd.f32 %v2159_v1, %v2158_v57 }
 0x2f1   :  { %v2111_v11 = vsel %vm2087_vm2, %v2084_v3, 0.0  ;;  %v2135_v12 = vmul.f32 %v2084_v3, %v2084_v3 }
 0x2f2   :  { %v2112_v16 = vadd.f32 %v2111_v11, %v2110_v61  ;;  %v8548_v18 = vpop.f32.mrb[26].mxu0  ;;  %v5000_v11 = vld [vmem:[%s9541_s2 + $0x48] sm:$0xff] }
 0x2f3   :  { %v2161_v20 = vsel %vm2087_vm2, %v2135_v12, 0.0  ;;  %v2085_v21 = vmul.f32 %v8546_v13, %v8548_v18  ;;  %v6087_v22 = vpop.f32.mrb[27].mxu0 }
 0x2f4   :  { %v2162_v23 = vadd.f32 %v2161_v20, %v2160_v8  ;;  %v4999_v8 = vld [vmem:[%s9541_s2 + $0x40] sm:$0xff]  ;;  %v5002_v20 = vld [vmem:[%s9541_s2 + $0x58] sm:$0xff] }
 0x2f5   :  { %v2113_v24 = vsel %vm2087_vm2, %v2085_v21, 0.0  ;;  %v2136_v26 = vmul.f32 %v2085_v21, %v2085_v21  ;;  %v6795_v12 = vpack.c.bf16 %v5000_v11, %v4999_v8  ;;  %v5003_v22 = vld [vmem:[%s9541_s2 + $0x60] sm:$0xff] }
 0x2f6   :  { %v2114_v31 = vadd.f32 %v2113_v24, %v2112_v16  ;;  %v8556_v32 = vpop.f32.mrb[28].mxu0  ;;  %v5001_v16 = vld [vmem:[%s9541_s2 + $0x50] sm:$0xff] }
 0x2f7   :  { %v2163_v33 = vsel %vm2087_vm2, %v2136_v26, 0.0  ;;  %v2086_v34 = vmul.f32 %v8554_v30, %v8556_v32  ;;  %v6090_v35 = vpop.f32.mrb[29].mxu0  ;;  %v6798_v21 = vpack.c.bf16 %v5002_v20, %v5001_v16  ;;  %v5005_v26 = vld [vmem:[%s9541_s2 + $0x70] sm:$0xff]  ;;  %v2331_v20 = vld [vmem:[%s9542_s5] sm:$0x1] }
 0x2f8   :  { %v2164_v39 = vadd.f32 %v2163_v33, %v2162_v23  ;;  %v5004_v23 = vld [vmem:[%s9541_s2 + $0x68] sm:$0xff] }
 0x2f9   :  { %v2115_v41 = vsel %vm2087_vm2, %v2086_v34, 0.0  ;;  %v2137_v42 = vmul.f32 %v2086_v34, %v2086_v34  ;;  %v6801_v24 = vpack.c.bf16 %v5004_v23, %v5003_v22  ;;  %v2489_v34 = vld [vmem:[%s9541_s2] sm:$0xff]  ;;  %v2490_v35 = vld [vmem:[%s9541_s2 + $0x8] sm:$0xff] }
 0x2fa   :  { %v2116_v43 = vadd.f32 %v2115_v41, %v2114_v31  ;;  %v5006_v31 = vld [vmem:[%s9541_s2 + $0x78] sm:$0xff]  ;;  %v6807_v41 = vpack.c.bf16 %v2490_v35, %v2489_v34 }
 0x2fb   :  { %v2165_v44 = vsel %vm2087_vm2, %v2137_v42, 0.0  ;;  %v6804_v33 = vpack.c.bf16 %v5006_v31, %v5005_v26  ;;  %v2491_v42 = vld [vmem:[%s9541_s2 + $0x10] sm:$0xff] }
 0x2fc   :  { %v2117_v46 = vrot.slane %v2116_v43, 4  ;;  %v2166_v48 = vadd.f32 %v2165_v44, %v2164_v39  ;;  %v2497_v39 = vld [vmem:[#allocation2 + $0x6] sm:$0xff] }
 0x2fe   :  { %v2118_v50 = vadd.f32 %v2117_v46, %v2116_v43  ;;  %v2167_v52 = vrot.slane %v2166_v48, 4  ;;  %v2492_v43 = vld [vmem:[%s9541_s2 + $0x18] sm:$0xff]  ;;  %v2493_v46 = vld [vmem:[%s9541_s2 + $0x20] sm:$0xff] }
 0x2ff   :  { %v6810_v44 = vpack.c.bf16 %v2492_v43, %v2491_v42 }
 0x300   :  { %v2119_v53 = vrot.slane %v2118_v50, 2  ;;  %v2168_v55 = vadd.f32 %v2167_v52, %v2166_v48  ;;  %v2494_v48 = vld [vmem:[%s9541_s2 + $0x28] sm:$0xff]  ;;  %v2495_v52 = vld [vmem:[%s9541_s2 + $0x30] sm:$0xff] }
 0x302   :  { %v2120_v57 = vadd.f32 %v2119_v53, %v2118_v50  ;;  %v2169_v58 = vrot.slane %v2168_v55, 2  ;;  %v6813_v50 = vpack.c.bf16 %v2494_v48, %v2493_v46  ;;  %v2496_v53 = vld [vmem:[%s9541_s2 + $0x38] sm:$0xff] }
 0x304   :  { %v2121_v59 = vrot.slane %v2120_v57, 1  ;;  %v2170_v61 = vadd.f32 %v2169_v58, %v2168_v55  ;;  %v6816_v55 = vpack.c.bf16 %v2496_v53, %v2495_v52 }
 0x306   :  { %v2122_v1 = vadd.f32 %v2121_v59, %v2120_v57  ;;  %v2171_v3 = vrot.slane %v2170_v61, 1 }
 0x308   :  { %6108 = vmatmul.mubr.msk.f32.vlgmr.msra.gmra.mrb[30].mxu0 %vm2087_vm2, %v2122_v1  ;;  %v2172_v7 = vadd.f32 %v2171_v3, %v2170_v61 }
 0x309   :  { %6713 = vmatprep.mubr.msk.f32.mxu0 %vm7417_vm0, %v7418_v4 }
 0x30a   :  { %6127 = vmatmul.mubr.msk.f32.vlgmr.msra.gmra.mrb[0].mxu1 %vm2087_vm2, %v2172_v7 }
 0x30b   :  { %6145 = vmatprep.mubr.msk.f32.mxu1 %vm7417_vm0, %v7418_v4  ;;  %6796 = vmatpush3.bf16.msra.mxu1 %v6795_v12  ;;  %v2339_v12 = vlaneseq }
 0x30c   :  { %6797 = vmatprep.subr.bf16.mxu1 %v7416_v0 }
 0x30d   :  { %v2340_v16 = vshrl.u32 %v2339_v12, 7 }
 0x30f   :  { %6799 = vmatpush3.bf16.msra.mxu1 %v6798_v21  ;;  %v8631_v21 = vsub.s32 0, %v2340_v16 }
 0x310   :  { %6800 = vmatprep.subr.bf16.mxu1 %v7416_v0 }
 0x313   :  { %6802 = vmatpush3.bf16.msra.mxu1 %v6801_v24  ;;  %v2335_v24 = vld [vmem:[%s9543_s6] sm:$0x1] }
 0x314   :  { %6803 = vmatprep.subr.bf16.mxu1 %v7416_v0 }
 0x317   :  { %6805 = vmatpush3.bf16.msra.mxu1 %v6804_v33 }
 0x318   :  { %6806 = vmatprep.subr.bf16.mxu1 %v7416_v0 }
 0x31a   :  { %6146 = vmatmul.mubr.msk.f32.vlgmr.msra.gmra.mrb[2].mxu1 %vm2087_vm2, %v2497_v39 }
 0x31b   :  { %6808 = vmatpush3.bf16.msra.mxu1 %v6807_v41  ;;  %6148 = vmatprep.mubr.msk.f32.mxu1 %vm7417_vm0, %v7418_v4 }
 0x31c   :  { %6809 = vmatprep.subr.bf16.mxu1 %v7416_v0 }
 0x31f   :  { %6811 = vmatpush3.bf16.msra.mxu1 %v6810_v44 }
 0x320   :  { %6812 = vmatprep.subr.bf16.mxu1 %v7416_v0 }
 0x323   :  { %6814 = vmatpush3.bf16.msra.mxu1 %v6813_v50 }
 0x324   :  { %6815 = vmatprep.subr.bf16.mxu1 %v7416_v0 }
 0x327   :  { %6817 = vmatpush3.bf16.msra.mxu1 %v6816_v55 }
 0x328   :  { %6818 = vmatprep.subr.bf16.mxu1 %v7416_v0 }
 0x3db   :  { %v2250_v57 = vpop.f32.mrb[30].mxu0 }
 0x3dc   :  { %v2327_v58 = vmul.f32 0.001953125, %v2250_v57  ;;  %v6109_v59 = vpop.f32.mrb[31].mxu0 }
 0x3dd   :  { %v2323_v61 = vpop.f32.mrb[0].mxu1 }
 0x3de   :  { %v2329_v1 = vmul.f32 %v2327_v58, %v2327_v58  ;;  %v2328_v3 = vmul.f32 0.001953125, %v2323_v61  ;;  %v6128_v7 = vpop.f32.mrb[1].mxu1 }
 0x3e0   :  { %v2330_v8 = vsub.f32 %v2328_v3, %v2329_v1 }
 0x3e2   :  { %v2332_v11 = vadd.f32 1e-05, %v2330_v8 }
 0x3e4   :  { %7412 = vrsqrt.f32 %v2332_v11 }
 0x3ee   :  { %v7413_v22 = vpop.eup %7412 }
 0x3ef   :  { %v2334_v23 = vmul.f32 %v7413_v22, %v2331_v20 }
 0x3f1   :  { %v2336_v26 = vmul.f32 %v2334_v23, %v2327_v58  ;;  %v8637_v31 = vrot.slane %v2334_v23, %v8631_v21 }
 0x3f3   :  { %v2337_v33 = vsub.f32 %v2335_v24, %v2336_v26  ;;  %v2344_v34 = vmul.f32 %v8637_v31, %v8445_v6  ;;  %v2345_v35 = vmul.f32 %v8637_v31, %v8451_v10  ;;  %v2346_v39 = vmul.f32 %v8637_v31, %v8459_v19 }
 0x3f4   :  { %v2347_v41 = vmul.f32 %v8637_v31, %v8468_v29  ;;  %v2348_v42 = vmul.f32 %v8637_v31, %v8476_v38  ;;  %v2349_v43 = vmul.f32 %v8637_v31, %v8484_v47  ;;  %v2350_v44 = vmul.f32 %v8637_v31, %v8492_v56 }
 0x3f5   :  { %v8654_v6 = vrot.slane %v2337_v33, %v8631_v21  ;;  %v2351_v10 = vmul.f32 %v8637_v31, %v8500_v2  ;;  %v2352_v19 = vmul.f32 %v8637_v31, %v8508_v17  ;;  %v2353_v29 = vmul.f32 %v8637_v31, %v8516_v27 }
 0x3f6   :  { %v2354_v38 = vmul.f32 %v8637_v31, %v8524_v40  ;;  %v2355_v47 = vmul.f32 %v8637_v31, %v8532_v51  ;;  %v8668_v56 = vmul.f32 %v8637_v31, %v8540_v62  ;;  %v8672_v46 = vmul.f32 %v8637_v31, %v8548_v18 }
 0x3f7   :  { %v2365_v2 = vadd.f32 %v8654_v6, %v2344_v34  ;;  %v2366_v17 = vadd.f32 %v8654_v6, %v2345_v35  ;;  %v2367_v27 = vadd.f32 %v8654_v6, %v2346_v39  ;;  %v2368_v48 = vadd.f32 %v8654_v6, %v2347_v41 }
 0x3f8   :  { %v2369_v40 = vadd.f32 %v8654_v6, %v2348_v42  ;;  %v2370_v51 = vadd.f32 %v8654_v6, %v2349_v43  ;;  %v2371_v50 = vadd.f32 %v8654_v6, %v2350_v44  ;;  %v2372_v62 = vadd.f32 %v8654_v6, %v2351_v10 }
 0x3f9   :  { %vm2380_vm3 = vcmp.ge.f32.partialorder %v2365_v2, 0.0  ;;  %v2395_v52 = vmul.f32 0.01, %v2365_v2  ;;  %vm2381_vm4 = vcmp.ge.f32.partialorder %v2366_v17, 0.0  ;;  %v2396_v18 = vmul.f32 0.01, %v2366_v17 }
 0x3fa   :  { %vm2382_vm5 = vcmp.ge.f32.partialorder %v2367_v27, 0.0  ;;  %v2397_v53 = vmul.f32 0.01, %v2367_v27  ;;  %vm2383_vm6 = vcmp.ge.f32.partialorder %v2368_v48, 0.0  ;;  %v2398_v55 = vmul.f32 0.01, %v2368_v48 }
 0x3fb   :  { %v2410_v57 = vsel %vm2380_vm3, %v2365_v2, %v2395_v52  ;;  %v2411_v58 = vsel %vm2381_vm4, %v2366_v17, %v2396_v18  ;;  %vm2384_vm7 = vcmp.ge.f32.partialorder %v2369_v40, 0.0  ;;  %v2399_v59 = vmul.f32 0.01, %v2369_v40 }
 0x3fc   :  { %v2425_v61 = vmul.f32 %v2410_v57, %v8443_v5  ;;  %v2426_v1 = vmul.f32 %v2411_v58, %v8449_v9  ;;  %v2412_v3 = vsel %vm2382_vm5, %v2367_v27, %v2397_v53  ;;  %v2413_v7 = vsel %vm2383_vm6, %v2368_v48, %v2398_v55 }
 0x3fd   :  { %v2427_v8 = vmul.f32 %v2412_v3, %v8455_v14  ;;  %v2428_v11 = vmul.f32 %v2413_v7, %v8466_v28  ;;  %v2414_v12 = vsel %vm2384_vm7, %v2369_v40, %v2399_v59  ;;  %vm2385_vm8 = vcmp.ge.f32.partialorder %v2370_v51, 0.0 }
 0x3fe   :  { %2459 = vst.msk [vmem:[#allocation2 + $0x10] sm:$0xff] %vm2087_vm2, %v2425_v61  ;;  %2460 = vst.msk [vmem:[#allocation2 + $0x18] sm:$0xff] %vm2087_vm2, %v2426_v1  ;;  %v2429_v16 = vmul.f32 %v2414_v12, %v8474_v36  ;;  %v2400_v20 = vmul.f32 0.01, %v2370_v51  ;;  %vm2386_vm9 = vcmp.ge.f32.partialorder %v2371_v50, 0.0  ;;  %vm2387_vm10 = vcmp.ge.f32.partialorder %v2372_v62, 0.0 }
 0x3ff   :  { %v2401_v22 = vmul.f32 0.01, %v2371_v50  ;;  %2461 = vst.msk [vmem:[#allocation2 + $0x20] sm:$0xff] %vm2087_vm2, %v2427_v8  ;;  %2462 = vst.msk [vmem:[#allocation2 + $0x28] sm:$0xff] %vm2087_vm2, %v2428_v11  ;;  %v2402_v23 = vmul.f32 0.01, %v2372_v62  ;;  %v2373_v24 = vadd.f32 %v8654_v6, %v2352_v19  ;;  %v2374_v26 = vadd.f32 %v8654_v6, %v2353_v29 }
 0x400   :  { %2463 = vst.msk [vmem:[#allocation2 + $0x30] sm:$0xff] %vm2087_vm2, %v2429_v16  ;;  %v2415_v33 = vsel %vm2385_vm8, %v2370_v51, %v2400_v20  ;;  %v2375_v35 = vadd.f32 %v8654_v6, %v2354_v38  ;;  %v2376_v39 = vadd.f32 %v8654_v6, %v2355_v47  ;;  %v2377_v17 = vadd.f32 %v8654_v6, %v8668_v56 }
 0x401   :  { %v2416_v34 = vsel %vm2386_vm9, %v2371_v50, %v2401_v22  ;;  %v2430_v41 = vmul.f32 %v2415_v33, %v8482_v45  ;;  %v2417_v43 = vsel %vm2387_vm10, %v2372_v62, %v2402_v23  ;;  %vm2388_vm11 = vcmp.ge.f32.partialorder %v2373_v24, 0.0  ;;  %v5037_v33 = vld [vmem:[%s9541_s2 + $0x80] sm:$0xff] }
 0x402   :  { %v2431_v42 = vmul.f32 %v2416_v34, %v8490_v54  ;;  %v2432_v44 = vmul.f32 %v2417_v43, %v8498_v63  ;;  %v2403_v10 = vmul.f32 0.01, %v2373_v24  ;;  %vm2389_vm12 = vcmp.ge.f32.partialorder %v2374_v26, 0.0  ;;  %v5038_v34 = vld [vmem:[%s9541_s2 + $0x88] sm:$0xff]  ;;  %v5040_v43 = vld [vmem:[%s9541_s2 + $0x98] sm:$0xff] }
 0x403   :  { %v2404_v19 = vmul.f32 0.01, %v2374_v26  ;;  %2464 = vst.msk [vmem:[#allocation2 + $0x38] sm:$0xff] %vm2087_vm2, %v2430_v41  ;;  %vm2390_vm13 = vcmp.ge.f32.partialorder %v2375_v35, 0.0  ;;  %v2405_v29 = vmul.f32 0.01, %v2375_v35  ;;  %v2378_v27 = vadd.f32 %v8654_v6, %v8672_v46 }
 0x404   :  { %2465 = vst.msk [vmem:[#allocation2 + $0x40] sm:$0xff] %vm2087_vm2, %v2431_v42  ;;  %vm2391_vm14 = vcmp.ge.f32.partialorder %v2376_v39, 0.0  ;;  %v2406_v38 = vmul.f32 0.01, %v2376_v39  ;;  %2466 = vst.msk [vmem:[#allocation2 + $0x48] sm:$0xff] %vm2087_vm2, %v2432_v44  ;;  %v2418_v47 = vsel %vm2388_vm11, %v2373_v24, %v2403_v10  ;;  %vm2392_vm15 = vcmp.ge.f32.partialorder %v2377_v17, 0.0 }
 0x405   :  { %v2419_v2 = vsel %vm2389_vm12, %v2374_v26, %v2404_v19  ;;  %v2498_v48 = vld [vmem:[#allocation2 + $0xe] sm:$0xff]  ;;  %v2433_v40 = vmul.f32 %v2418_v47, %v8506_v15  ;;  %v2420_v50 = vsel %vm2390_vm13, %v2375_v35, %v2405_v29  ;;  %v2407_v53 = vmul.f32 0.01, %v2377_v17  ;;  %v2499_v57 = vld [vmem:[#allocation2 + $0x16] sm:$0xff]  ;;  %v5041_v10 = vld [vmem:[%s9541_s2 + $0xa0] sm:$0xff] }
 0x406   :  { %v2434_v51 = vmul.f32 %v2419_v2, %v8514_v25  ;;  %v2421_v62 = vsel %vm2391_vm14, %v2376_v39, %v2406_v38  ;;  %6149 = vmatmul.mubr.msk.f32.gmra.mrb[4].mxu1 %vm2087_vm2, %v2498_v48  ;;  %v2435_v52 = vmul.f32 %v2420_v50, %v8522_v37  ;;  %vm2393_vm1 = vcmp.ge.f32.partialorder %v2378_v27, 0.0  ;;  %v2474_v39 = vld [vmem:[#allocation2 + $0x5] sm:$0xff]  ;;  %v5039_v42 = vld [vmem:[%s9541_s2 + $0x90] sm:$0xff]  ;;  %v5044_v2 = vld [vmem:[%s9541_s2 + $0xb8] sm:$0xff] }
 0x407   :  { %v2436_v18 = vmul.f32 %v2421_v62, %v8530_v49  ;;  %6151 = vmatprep.mubr.msk.f32.mxu1 %vm7417_vm0, %v7418_v4  ;;  %2467 = vst.msk [vmem:[#allocation2 + $0x50] sm:$0xff] %vm2087_vm2, %v2433_v40  ;;  %v2408_v56 = vmul.f32 0.01, %v2378_v27  ;;  %v2358_v46 = vmul.f32 %v8637_v31, %v8556_v32  ;;  %v2422_v55 = vsel %vm2392_vm15, %v2377_v17, %v2407_v53  ;;  %v2500_v31 = vld [vmem:[#allocation2 + $0x1e] sm:$0xff]  ;;  %v2502_v8 = vld [vmem:[#allocation2 + $0x2e] sm:$0xff] }
 0x408   :  { %2468 = vst.msk [vmem:[#allocation2 + $0x58] sm:$0xff] %vm2087_vm2, %v2434_v51  ;;  %2469 = vst.msk [vmem:[#allocation2 + $0x60] sm:$0xff] %vm2087_vm2, %v2435_v52  ;;  %v2437_v58 = vmul.f32 %v2422_v55, %v8538_v60  ;;  %v6819_v41 = vpack.c.bf16 %v5038_v34, %v5037_v33  ;;  %v6822_v44 = vpack.c.bf16 %v5040_v43, %v5039_v42  ;;  %v5042_v19 = vld [vmem:[%s9541_s2 + $0xa8] sm:$0xff]  ;;  %v5043_v47 = vld [vmem:[%s9541_s2 + $0xb0] sm:$0xff] }
 0x409   :  { %2470 = vst.msk [vmem:[#allocation2 + $0x68] sm:$0xff] %vm2087_vm2, %v2436_v18  ;;  %v2423_v59 = vsel %vm2393_vm1, %v2378_v27, %v2408_v56  ;;  %v2379_v61 = vadd.f32 %v8654_v6, %v2358_v46  ;;  %v2501_v6 = vld [vmem:[#allocation2 + $0x26] sm:$0xff]  ;;  %v6825_v38 = vpack.c.bf16 %v5042_v19, %v5041_v10  ;;  %v2476_v17 = vld [vmem:[#allocation2 + $0x15] sm:$0xff]  ;;  %v6828_v27 = vpack.c.bf16 %v5044_v2, %v5043_v47  ;;  %v2477_v48 = vld [vmem:[#allocation2 + $0x1d] sm:$0xff] }
 0x40a   :  { %6152 = vmatmul.mubr.msk.f32.gmra.mrb[6].mxu1 %vm2087_vm2, %v2499_v57  ;;  %v2438_v1 = vmul.f32 %v2423_v59, %v8546_v13  ;;  %2471 = vst.msk [vmem:[#allocation2 + $0x70] sm:$0xff] %vm2087_vm2, %v2437_v58  ;;  %v2503_v11 = vld [vmem:[#allocation2 + $0x36] sm:$0xff]  ;;  %v2475_v29 = vld [vmem:[#allocation2 + $0xd] sm:$0xff]  ;;  %v2478_v40 = vld [vmem:[#allocation2 + $0x25] sm:$0xff] }
 0x40b   :  { %6154 = vmatprep.mubr.msk.f32.mxu1 %vm7417_vm0, %v7418_v4  ;;  %vm2394_vm3 = vcmp.ge.f32.partialorder %v2379_v61, 0.0  ;;  %v2409_v32 = vmul.f32 0.01, %v2379_v61  ;;  %v2504_v12 = vld [vmem:[#allocation2 + $0x3e] sm:$0xff]  ;;  %v2505_v16 = vld [vmem:[#allocation2 + $0x46] sm:$0xff]  ;;  %v2480_v50 = vld [vmem:[#allocation2 + $0x35] sm:$0xff] }
 0x40c   :  { %2472 = vst.msk [vmem:[#allocation2 + $0x78] sm:$0xff] %vm2087_vm2, %v2438_v1  ;;  %v2479_v51 = vld [vmem:[#allocation2 + $0x2d] sm:$0xff]  ;;  %v2481_v62 = vld [vmem:[#allocation2 + $0x3d] sm:$0xff]  ;;  %v2482_v52 = vld [vmem:[#allocation2 + $0x45] sm:$0xff] }
 0x40d   :  { %v2424_v3 = vsel %vm2394_vm3, %v2379_v61, %v2409_v32  ;;  %v5060_v57 = vld [vmem:[%s9541_s2 + $0xc0] sm:$0xff]  ;;  %v5061_v58 = vld [vmem:[%s9541_s2 + $0xc8] sm:$0xff]  ;;  %v5062_v32 = vld [vmem:[%s9541_s2 + $0xd0] sm:$0xff] }
 0x40e   :  { %6155 = vmatmul.mubr.msk.f32.gmra.mrb[8].mxu1 %vm2087_vm2, %v2500_v31  ;;  %v2439_v7 = vmul.f32 %v2424_v3, %v8554_v30  ;;  %v2506_v20 = vld [vmem:[#allocation2 + $0x4e] sm:$0xff]  ;;  %v6831_v1 = vpack.c.bf16 %v5061_v58, %v5060_v57  ;;  %v5063_v31 = vld [vmem:[%s9541_s2 + $0xd8] sm:$0xff]  ;;  %v5083_v10 = vld [vmem:[%s9541_s2 + $0x100] sm:$0xff] }
 0x40f   :  { %6157 = vmatprep.mubr.msk.f32.mxu1 %vm7417_vm0, %v7418_v4  ;;  %v2507_v22 = vld [vmem:[#allocation2 + $0x56] sm:$0xff]  ;;  %v2508_v23 = vld [vmem:[#allocation2 + $0x5e] sm:$0xff]  ;;  %v2483_v18 = vld [vmem:[#allocation2 + $0x4d] sm:$0xff]  ;;  %v6834_v3 = vpack.c.bf16 %v5063_v31, %v5062_v32 }
 0x410   :  { %2473 = vst.msk [vmem:[#allocation2 + $0x80] sm:$0xff] %vm2087_vm2, %v2439_v7  ;;  %v2509_v24 = vld [vmem:[#allocation2 + $0x66] sm:$0xff]  ;;  %v2484_v53 = vld [vmem:[#allocation2 + $0x55] sm:$0xff]  ;;  %v2485_v56 = vld [vmem:[#allocation2 + $0x5d] sm:$0xff] }
 0x411   :  { %v2510_v26 = vld [vmem:[#allocation2 + $0x6e] sm:$0xff]  ;;  %v2486_v46 = vld [vmem:[#allocation2 + $0x65] sm:$0xff]  ;;  %v2897_v33 = vld [vmem:[#allocation2 + $0x37] sm:$0xff] }
 0x412   :  { %6158 = vmatmul.mubr.msk.f32.gmra.mrb[10].mxu1 %vm2087_vm2, %v2501_v6  ;;  %v2487_v55 = vld [vmem:[#allocation2 + $0x6d] sm:$0xff]  ;;  %v5064_v7 = vld [vmem:[%s9541_s2 + $0xe0] sm:$0xff]  ;;  %v5086_v2 = vld [vmem:[%s9541_s2 + $0x118] sm:$0xff] }
 0x413   :  { %6160 = vmatprep.mubr.msk.f32.mxu1 %vm7417_vm0, %v7418_v4  ;;  %v2511_v35 = vld [vmem:[#allocation2 + $0x76] sm:$0xff]  ;;  %v2891_v61 = vld [vmem:[#allocation2 + $0x7] sm:$0xff]  ;;  %v2898_v34 = vld [vmem:[#allocation2 + $0x3f] sm:$0xff] }
 0x414   :  { %v2488_v59 = vld [vmem:[#allocation2 + $0x75] sm:$0xff]  ;;  %v5065_v6 = vld [vmem:[%s9541_s2 + $0xe8] sm:$0xff]  ;;  %v2902_v42 = vld [vmem:[#allocation2 + $0x5f] sm:$0xff] }
 0x415   :  { %v2903_v43 = vld [vmem:[#allocation2 + $0x67] sm:$0xff]  ;;  %v5085_v47 = vld [vmem:[%s9541_s2 + $0x110] sm:$0xff] }
 0x416   :  { %6161 = vmatmul.mubr.msk.f32.gmra.mrb[12].mxu1 %vm2087_vm2, %v2502_v8  ;;  %v2892_v8 = vld [vmem:[#allocation2 + $0xf] sm:$0xff] }
 0x417   :  { %6163 = vmatprep.mubr.msk.f32.mxu1 %vm7417_vm0, %v7418_v4  ;;  %v5084_v19 = vld [vmem:[%s9541_s2 + $0x108] sm:$0xff]  ;;  %v3339_v57 = vld [vmem:[#allocation2 + $0x10] sm:$0xff] }
 0x418   :  { %v5112_v31 = vld [vmem:[%s9541_s2 + $0x170] sm:$0xff] }
 0x41a   :  { %6164 = vmatmul.mubr.msk.f32.gmra.mrb[14].mxu1 %vm2087_vm2, %v2503_v11  ;;  %v6837_v11 = vpack.c.bf16 %v5065_v6, %v5064_v7  ;;  %v3341_v7 = vld [vmem:[#allocation2 + $0x20] sm:$0xff] }
 0x41b   :  { %6166 = vmatprep.mubr.msk.f32.mxu1 %vm7417_vm0, %v7418_v4 }
 0x41e   :  { %6167 = vmatmul.mubr.msk.f32.gmra.mrb[16].mxu1 %vm2087_vm2, %v2504_v12  ;;  %v5066_v12 = vld [vmem:[%s9541_s2 + $0xf0] sm:$0xff] }
 0x41f   :  { %6169 = vmatprep.mubr.msk.f32.mxu1 %vm7417_vm0, %v7418_v4 }
 0x422   :  { %6170 = vmatmul.mubr.msk.f32.gmra.mrb[18].mxu1 %vm2087_vm2, %v2505_v16  ;;  %v5067_v16 = vld [vmem:[%s9541_s2 + $0xf8] sm:$0xff] }
 0x423   :  { %6172 = vmatprep.mubr.msk.f32.mxu1 %vm7417_vm0, %v7418_v4 }
 0x426   :  { %6173 = vmatmul.mubr.msk.f32.gmra.mrb[20].mxu1 %vm2087_vm2, %v2506_v20  ;;  %v2893_v20 = vld [vmem:[#allocation2 + $0x17] sm:$0xff] }
 0x427   :  { %6175 = vmatprep.mubr.msk.f32.mxu1 %vm7417_vm0, %v7418_v4 }
 0x42a   :  { %6176 = vmatmul.mubr.msk.f32.gmra.mrb[22].mxu1 %vm2087_vm2, %v2507_v22  ;;  %v6840_v22 = vpack.c.bf16 %v5067_v16, %v5066_v12  ;;  %v3344_v12 = vld [vmem:[#allocation2 + $0x38] sm:$0xff]  ;;  %v3345_v16 = vld [vmem:[#allocation2 + $0x40] sm:$0xff] }
 0x42b   :  { %6178 = vmatprep.mubr.msk.f32.mxu1 %vm7417_vm0, %v7418_v4 }
 0x42e   :  { %6179 = vmatmul.mubr.msk.f32.gmra.mrb[24].mxu1 %vm2087_vm2, %v2508_v23  ;;  %v2894_v23 = vld [vmem:[#allocation2 + $0x1f] sm:$0xff] }
 0x42f   :  { %6181 = vmatprep.mubr.msk.f32.mxu1 %vm7417_vm0, %v7418_v4 }
 0x432   :  { %6182 = vmatmul.mubr.msk.f32.gmra.mrb[26].mxu1 %vm2087_vm2, %v2509_v24  ;;  %v2895_v24 = vld [vmem:[#allocation2 + $0x27] sm:$0xff] }
 0x433   :  { %6184 = vmatprep.mubr.msk.f32.mxu1 %vm7417_vm0, %v7418_v4 }
 0x436   :  { %6185 = vmatmul.mubr.msk.f32.gmra.mrb[28].mxu1 %vm2087_vm2, %v2510_v26  ;;  %v2896_v26 = vld [vmem:[#allocation2 + $0x2f] sm:$0xff] }
 0x437   :  { %6187 = vmatprep.mubr.msk.f32.mxu1 %vm7417_vm0, %v7418_v4 }
 0x43a   :  { %6188 = vmatmul.mubr.msk.f32.gmra.mrb[30].mxu1 %vm2087_vm2, %v2511_v35  ;;  %v2899_v35 = vld [vmem:[#allocation2 + $0x47] sm:$0xff] }
 0x43b   :  { %6206 = vmatprep.mubr.msk.f32.mxu1 %vm7417_vm0, %v7418_v4 }
 0x43e   :  { %6207 = vmatmul.mubr.msk.f32.vlgmr.msra.gmra.mrb[2].mxu1 %vm2087_vm2, %v2474_v39  ;;  %v2900_v39 = vld [vmem:[#allocation2 + $0x4f] sm:$0xff] }
 0x43f   :  { %6820 = vmatpush3.bf16.msra.mxu1 %v6819_v41  ;;  %6209 = vmatprep.mubr.msk.f32.mxu1 %vm7417_vm0, %v7418_v4  ;;  %v2901_v41 = vld [vmem:[#allocation2 + $0x57] sm:$0xff] }
 0x440   :  { %6821 = vmatprep.subr.bf16.mxu1 %v7416_v0 }
 0x442   :  { %6210 = vmatmul.mubr.msk.f32.gmra.mrb[4].mxu1 %vm2087_vm2, %v2475_v29  ;;  %v2905_v29 = vld [vmem:[#allocation2 + $0x77] sm:$0xff] }
 0x443   :  { %6212 = vmatprep.mubr.msk.f32.mxu1 %vm7417_vm0, %v7418_v4  ;;  %6823 = vmatpush3.bf16.msra.mxu1 %v6822_v44  ;;  %v2904_v44 = vld [vmem:[#allocation2 + $0x6f] sm:$0xff] }
 0x444   :  { %6824 = vmatprep.subr.bf16.mxu1 %v7416_v0 }
 0x446   :  { %6213 = vmatmul.mubr.msk.f32.gmra.mrb[6].mxu1 %vm2087_vm2, %v2476_v17  ;;  %v6846_v17 = vpack.c.bf16 %v5086_v2, %v5085_v47  ;;  %v3564_v47 = vld [vmem:[#allocation2 + $0x19] sm:$0xff] }
 0x447   :  { %6215 = vmatprep.mubr.msk.f32.mxu1 %vm7417_vm0, %v7418_v4  ;;  %6826 = vmatpush3.bf16.msra.mxu1 %v6825_v38  ;;  %v6843_v38 = vpack.c.bf16 %v5084_v19, %v5083_v10  ;;  %v3563_v10 = vld [vmem:[#allocation2 + $0x11] sm:$0xff] }
 0x448   :  { %6827 = vmatprep.subr.bf16.mxu1 %v7416_v0 }
 0x44a   :  { %6216 = vmatmul.mubr.msk.f32.gmra.mrb[8].mxu1 %vm2087_vm2, %v2477_v48  ;;  %v5088_v48 = vld [vmem:[%s9541_s2 + $0x128] sm:$0xff] }
 0x44b   :  { %6218 = vmatprep.mubr.msk.f32.mxu1 %vm7417_vm0, %v7418_v4  ;;  %6829 = vmatpush3.bf16.msra.mxu1 %v6828_v27  ;;  %v5087_v27 = vld [vmem:[%s9541_s2 + $0x120] sm:$0xff] }
 0x44c   :  { %6830 = vmatprep.subr.bf16.mxu1 %v7416_v0 }
 0x44e   :  { %6219 = vmatmul.mubr.msk.f32.gmra.mrb[10].mxu1 %vm2087_vm2, %v2478_v40  ;;  %v6849_v40 = vpack.c.bf16 %v5088_v48, %v5087_v27  ;;  %v5136_v27 = vld [vmem:[%s9541_s2 + $0x1b8] sm:$0xff]  ;;  %v3565_v48 = vld [vmem:[#allocation2 + $0x21] sm:$0xff] }
 0x44f   :  { %6221 = vmatprep.mubr.msk.f32.mxu1 %vm7417_vm0, %v7418_v4 }
 0x452   :  { %6222 = vmatmul.mubr.msk.f32.gmra.mrb[12].mxu1 %vm2087_vm2, %v2479_v51  ;;  %v5089_v51 = vld [vmem:[%s9541_s2 + $0x130] sm:$0xff] }
 0x453   :  { %6224 = vmatprep.mubr.msk.f32.mxu1 %vm7417_vm0, %v7418_v4 }
 0x456   :  { %6225 = vmatmul.mubr.msk.f32.gmra.mrb[14].mxu1 %vm2087_vm2, %v2480_v50  ;;  %v5090_v50 = vld [vmem:[%s9541_s2 + $0x138] sm:$0xff] }
 0x457   :  { %6227 = vmatprep.mubr.msk.f32.mxu1 %vm7417_vm0, %v7418_v4 }
 0x45a   :  { %6228 = vmatmul.mubr.msk.f32.gmra.mrb[16].mxu1 %vm2087_vm2, %v2481_v62  ;;  %v6852_v62 = vpack.c.bf16 %v5090_v50, %v5089_v51  ;;  %v3566_v51 = vld [vmem:[#allocation2 + $0x29] sm:$0xff]  ;;  %v3567_v50 = vld [vmem:[#allocation2 + $0x31] sm:$0xff] }
 0x45b   :  { %6230 = vmatprep.mubr.msk.f32.mxu1 %vm7417_vm0, %v7418_v4 }
 0x45e   :  { %6231 = vmatmul.mubr.msk.f32.gmra.mrb[18].mxu1 %vm2087_vm2, %v2482_v52  ;;  %v5106_v52 = vld [vmem:[%s9541_s2 + $0x140] sm:$0xff] }
 0x45f   :  { %6233 = vmatprep.mubr.msk.f32.mxu1 %vm7417_vm0, %v7418_v4 }
 0x462   :  { %6234 = vmatmul.mubr.msk.f32.gmra.mrb[20].mxu1 %vm2087_vm2, %v2483_v18  ;;  %v5107_v18 = vld [vmem:[%s9541_s2 + $0x148] sm:$0xff] }
 0x463   :  { %6236 = vmatprep.mubr.msk.f32.mxu1 %vm7417_vm0, %v7418_v4 }
 0x466   :  { %6237 = vmatmul.mubr.msk.f32.gmra.mrb[22].mxu1 %vm2087_vm2, %v2484_v53  ;;  %v3129_v53 = vld [vmem:[#allocation2 + $0x7f] sm:$0xff] }
 0x467   :  { %6239 = vmatprep.mubr.msk.f32.mxu1 %vm7417_vm0, %v7418_v4 }
 0x46a   :  { %6240 = vmatmul.mubr.msk.f32.gmra.mrb[24].mxu1 %vm2087_vm2, %v2485_v56  ;;  %v6855_v56 = vpack.c.bf16 %v5107_v18, %v5106_v52  ;;  %v3569_v52 = vld [vmem:[#allocation2 + $0x41] sm:$0xff]  ;;  %v3570_v18 = vld [vmem:[#allocation2 + $0x49] sm:$0xff] }
 0x46b   :  { %6242 = vmatprep.mubr.msk.f32.mxu1 %vm7417_vm0, %v7418_v4 }
 0x46e   :  { %6243 = vmatmul.mubr.msk.f32.gmra.mrb[26].mxu1 %vm2087_vm2, %v2486_v46  ;;  %v5108_v46 = vld [vmem:[%s9541_s2 + $0x150] sm:$0xff] }
 0x46f   :  { %6245 = vmatprep.mubr.msk.f32.mxu1 %vm7417_vm0, %v7418_v4 }
 0x472   :  { %6246 = vmatmul.mubr.msk.f32.gmra.mrb[28].mxu1 %vm2087_vm2, %v2487_v55  ;;  %v5109_v55 = vld [vmem:[%s9541_s2 + $0x158] sm:$0xff] }
 0x473   :  { %6248 = vmatprep.mubr.msk.f32.mxu1 %vm7417_vm0, %v7418_v4  ;;  %v6858_v58 = vpack.c.bf16 %v5109_v55, %v5108_v46  ;;  %v3573_v46 = vld [vmem:[#allocation2 + $0x61] sm:$0xff]  ;;  %v3574_v55 = vld [vmem:[#allocation2 + $0x69] sm:$0xff] }
 0x476   :  { %6249 = vmatmul.mubr.msk.f32.gmra.mrb[30].mxu1 %vm2087_vm2, %v2488_v59  ;;  %v5110_v59 = vld [vmem:[%s9541_s2 + $0x160] sm:$0xff] }
 0x477   :  { %6267 = vmatprep.mubr.msk.f32.mxu1 %vm7417_vm0, %v7418_v4 }
 0x47a   :  { %6268 = vmatmul.mubr.msk.f32.vlgmr.msra.gmra.mrb[2].mxu1 %vm2087_vm2, %v2891_v61  ;;  %v5111_v61 = vld [vmem:[%s9541_s2 + $0x168] sm:$0xff] }
 0x47b   :  { %6832 = vmatpush3.bf16.msra.mxu1 %v6831_v1  ;;  %6270 = vmatprep.mubr.msk.f32.mxu1 %vm7417_vm0, %v7418_v4  ;;  %v3340_v1 = vld [vmem:[#allocation2 + $0x18] sm:$0xff]  ;;  %v6861_v32 = vpack.c.bf16 %v5111_v61, %v5110_v59  ;;  %v5152_v59 = vld [vmem:[%s9541_s2 + $0x1c0] sm:$0xff]  ;;  %v5153_v61 = vld [vmem:[%s9541_s2 + $0x1c8] sm:$0xff] }
 0x47c   :  { %6833 = vmatprep.subr.bf16.mxu1 %v7416_v0 }
 0x47e   :  { %6271 = vmatmul.mubr.msk.f32.gmra.mrb[4].mxu1 %vm2087_vm2, %v2892_v8 }
 0x47f   :  { %6273 = vmatprep.mubr.msk.f32.mxu1 %vm7417_vm0, %v7418_v4  ;;  %6835 = vmatpush3.bf16.msra.mxu1 %v6834_v3  ;;  %v5113_v3 = vld [vmem:[%s9541_s2 + $0x178] sm:$0xff] }
 0x480   :  { %6836 = vmatprep.subr.bf16.mxu1 %v7416_v0  ;;  %v6864_v6 = vpack.c.bf16 %v5113_v3, %v5112_v31  ;;  %v5154_v31 = vld [vmem:[%s9541_s2 + $0x1d0] sm:$0xff]  ;;  %v5155_v3 = vld [vmem:[%s9541_s2 + $0x1d8] sm:$0xff] }
 0x482   :  { %6274 = vmatmul.mubr.msk.f32.gmra.mrb[6].mxu1 %vm2087_vm2, %v2893_v20 }
 0x483   :  { %6276 = vmatprep.mubr.msk.f32.mxu1 %vm7417_vm0, %v7418_v4  ;;  %6838 = vmatpush3.bf16.msra.mxu1 %v6837_v11  ;;  %v3343_v11 = vld [vmem:[#allocation2 + $0x30] sm:$0xff] }
 0x484   :  { %6839 = vmatprep.subr.bf16.mxu1 %v7416_v0 }
 0x486   :  { %6277 = vmatmul.mubr.msk.f32.gmra.mrb[8].mxu1 %vm2087_vm2, %v2894_v23 }
 0x487   :  { %6279 = vmatprep.mubr.msk.f32.mxu1 %vm7417_vm0, %v7418_v4  ;;  %6841 = vmatpush3.bf16.msra.mxu1 %v6840_v22  ;;  %v3347_v22 = vld [vmem:[#allocation2 + $0x50] sm:$0xff] }
 0x488   :  { %6842 = vmatprep.subr.bf16.mxu1 %v7416_v0 }
 0x48a   :  { %6280 = vmatmul.mubr.msk.f32.gmra.mrb[10].mxu1 %vm2087_vm2, %v2895_v24 }
 0x48b   :  { %6282 = vmatprep.mubr.msk.f32.mxu1 %vm7417_vm0, %v7418_v4 }
 0x48e   :  { %6283 = vmatmul.mubr.msk.f32.gmra.mrb[12].mxu1 %vm2087_vm2, %v2896_v26 }
 0x48f   :  { %6285 = vmatprep.mubr.msk.f32.mxu1 %vm7417_vm0, %v7418_v4 }
 0x492   :  { %6286 = vmatmul.mubr.msk.f32.gmra.mrb[14].mxu1 %vm2087_vm2, %v2897_v33 }
 0x493   :  { %6288 = vmatprep.mubr.msk.f32.mxu1 %vm7417_vm0, %v7418_v4 }
 0x496   :  { %6289 = vmatmul.mubr.msk.f32.gmra.mrb[16].mxu1 %vm2087_vm2, %v2898_v34 }
 0x497   :  { %6291 = vmatprep.mubr.msk.f32.mxu1 %vm7417_vm0, %v7418_v4 }
 0x49a   :  { %6292 = vmatmul.mubr.msk.f32.gmra.mrb[18].mxu1 %vm2087_vm2, %v2899_v35 }
 0x49b   :  { %6294 = vmatprep.mubr.msk.f32.mxu1 %vm7417_vm0, %v7418_v4 }
 0x49e   :  { %6295 = vmatmul.mubr.msk.f32.gmra.mrb[20].mxu1 %vm2087_vm2, %v2900_v39 }
 0x49f   :  { %6297 = vmatprep.mubr.msk.f32.mxu1 %vm7417_vm0, %v7418_v4 }
 0x4a2   :  { %6298 = vmatmul.mubr.msk.f32.gmra.mrb[22].mxu1 %vm2087_vm2, %v2901_v41 }
 0x4a3   :  { %6300 = vmatprep.mubr.msk.f32.mxu1 %vm7417_vm0, %v7418_v4 }
 0x4a6   :  { %6301 = vmatmul.mubr.msk.f32.gmra.mrb[24].mxu1 %vm2087_vm2, %v2902_v42 }
 0x4a7   :  { %6303 = vmatprep.mubr.msk.f32.mxu1 %vm7417_vm0, %v7418_v4 }
 0x4aa   :  { %6304 = vmatmul.mubr.msk.f32.gmra.mrb[26].mxu1 %vm2087_vm2, %v2903_v43 }
 0x4ab   :  { %6306 = vmatprep.mubr.msk.f32.mxu1 %vm7417_vm0, %v7418_v4 }
 0x4ae   :  { %6307 = vmatmul.mubr.msk.f32.gmra.mrb[28].mxu1 %vm2087_vm2, %v2904_v44 }
 0x4af   :  { %6309 = vmatprep.mubr.msk.f32.mxu1 %vm7417_vm0, %v7418_v4 }
 0x4b2   :  { %6310 = vmatmul.mubr.msk.f32.gmra.mrb[30].mxu1 %vm2087_vm2, %v2905_v29 }
 0x4b3   :  { %6328 = vmatprep.mubr.msk.f32.mxu1 %vm7417_vm0, %v7418_v4 }
 0x4b6   :  { %6329 = vmatmul.mubr.msk.f32.vlgmr.msra.gmra.mrb[2].mxu1 %vm2087_vm2, %v2892_v8  ;;  %v3342_v8 = vld [vmem:[#allocation2 + $0x28] sm:$0xff] }
 0x4b7   :  { %6844 = vmatpush3.bf16.msra.mxu1 %v6843_v38  ;;  %6331 = vmatprep.mubr.msk.f32.mxu1 %vm7417_vm0, %v7418_v4  ;;  %v5134_v38 = vld [vmem:[%s9541_s2 + $0x1a8] sm:$0xff] }
 0x4b8   :  { %6845 = vmatprep.subr.bf16.mxu1 %v7416_v0 }
 0x4ba   :  { %6332 = vmatmul.mubr.msk.f32.gmra.mrb[4].mxu1 %vm2087_vm2, %v2893_v20  ;;  %v3346_v20 = vld [vmem:[#allocation2 + $0x48] sm:$0xff] }
 0x4bb   :  { %6334 = vmatprep.mubr.msk.f32.mxu1 %vm7417_vm0, %v7418_v4  ;;  %6847 = vmatpush3.bf16.msra.mxu1 %v6846_v17  ;;  %v5135_v17 = vld [vmem:[%s9541_s2 + $0x1b0] sm:$0xff] }
 0x4bc   :  { %6848 = vmatprep.subr.bf16.mxu1 %v7416_v0 }
 0x4be   :  { %6335 = vmatmul.mubr.msk.f32.gmra.mrb[6].mxu1 %vm2087_vm2, %v2894_v23  ;;  %v3348_v23 = vld [vmem:[#allocation2 + $0x58] sm:$0xff] }
 0x4bf   :  { %6337 = vmatprep.mubr.msk.f32.mxu1 %vm7417_vm0, %v7418_v4  ;;  %6850 = vmatpush3.bf16.msra.mxu1 %v6849_v40  ;;  %v6876_v40 = vpack.c.bf16 %v5136_v27, %v5135_v17  ;;  %v4016_v17 = vld [vmem:[#allocation2 + $0x42] sm:$0xff]  ;;  %v4017_v27 = vld [vmem:[#allocation2 + $0x4a] sm:$0xff] }
 0x4c0   :  { %6851 = vmatprep.subr.bf16.mxu1 %v7416_v0 }
 0x4c2   :  { %6338 = vmatmul.mubr.msk.f32.gmra.mrb[8].mxu1 %vm2087_vm2, %v2895_v24  ;;  %v3349_v24 = vld [vmem:[#allocation2 + $0x60] sm:$0xff] }
 0x4c3   :  { %6340 = vmatprep.mubr.msk.f32.mxu1 %vm7417_vm0, %v7418_v4  ;;  %6853 = vmatpush3.bf16.msra.mxu1 %v6852_v62  ;;  %v3568_v62 = vld [vmem:[#allocation2 + $0x39] sm:$0xff] }
 0x4c4   :  { %6854 = vmatprep.subr.bf16.mxu1 %v7416_v0 }
 0x4c6   :  { %6341 = vmatmul.mubr.msk.f32.gmra.mrb[10].mxu1 %vm2087_vm2, %v2896_v26  ;;  %v3350_v26 = vld [vmem:[#allocation2 + $0x68] sm:$0xff] }
 0x4c7   :  { %6343 = vmatprep.mubr.msk.f32.mxu1 %vm7417_vm0, %v7418_v4 }
 0x4ca   :  { %6344 = vmatmul.mubr.msk.f32.gmra.mrb[12].mxu1 %vm2087_vm2, %v2897_v33  ;;  %v3351_v33 = vld [vmem:[#allocation2 + $0x70] sm:$0xff] }
 0x4cb   :  { %6346 = vmatprep.mubr.msk.f32.mxu1 %vm7417_vm0, %v7418_v4 }
 0x4ce   :  { %6347 = vmatmul.mubr.msk.f32.gmra.mrb[14].mxu1 %vm2087_vm2, %v2898_v34  ;;  %v3352_v34 = vld [vmem:[#allocation2 + $0x78] sm:$0xff] }
 0x4cf   :  { %6349 = vmatprep.mubr.msk.f32.mxu1 %vm7417_vm0, %v7418_v4 }
 0x4d2   :  { %6350 = vmatmul.mubr.msk.f32.gmra.mrb[16].mxu1 %vm2087_vm2, %v2899_v35  ;;  %v5129_v35 = vld [vmem:[%s9541_s2 + $0x180] sm:$0xff] }
 0x4d3   :  { %6352 = vmatprep.mubr.msk.f32.mxu1 %vm7417_vm0, %v7418_v4 }
 0x4d6   :  { %6353 = vmatmul.mubr.msk.f32.gmra.mrb[18].mxu1 %vm2087_vm2, %v2900_v39  ;;  %v5130_v39 = vld [vmem:[%s9541_s2 + $0x188] sm:$0xff] }
 0x4d7   :  { %6355 = vmatprep.mubr.msk.f32.mxu1 %vm7417_vm0, %v7418_v4 }
 0x4da   :  { %6356 = vmatmul.mubr.msk.f32.gmra.mrb[20].mxu1 %vm2087_vm2, %v2901_v41  ;;  %v3353_v41 = vld [vmem:[#allocation2 + $0x80] sm:$0xff] }
 0x4db   :  { %6358 = vmatprep.mubr.msk.f32.mxu1 %vm7417_vm0, %v7418_v4 }
 0x4de   :  { %6359 = vmatmul.mubr.msk.f32.gmra.mrb[22].mxu1 %vm2087_vm2, %v2902_v42  ;;  %v6867_v42 = vpack.c.bf16 %v5130_v39, %v5129_v35  ;;  %v4011_v35 = vld [vmem:[#allocation2 + $0x1a] sm:$0xff] }
 0x4df   :  { %6361 = vmatprep.mubr.msk.f32.mxu1 %vm7417_vm0, %v7418_v4 }
 0x4e2   :  { %6362 = vmatmul.mubr.msk.f32.gmra.mrb[24].mxu1 %vm2087_vm2, %v2903_v43  ;;  %v5131_v43 = vld [vmem:[%s9541_s2 + $0x190] sm:$0xff] }
 0x4e3   :  { %6364 = vmatprep.mubr.msk.f32.mxu1 %vm7417_vm0, %v7418_v4 }
 0x4e6   :  { %6365 = vmatmul.mubr.msk.f32.gmra.mrb[26].mxu1 %vm2087_vm2, %v2904_v44  ;;  %v5132_v44 = vld [vmem:[%s9541_s2 + $0x198] sm:$0xff] }
 0x4e7   :  { %6367 = vmatprep.mubr.msk.f32.mxu1 %vm7417_vm0, %v7418_v4  ;;  %v6870_v19 = vpack.c.bf16 %v5132_v44, %v5131_v43  ;;  %v4012_v43 = vld [vmem:[#allocation2 + $0x22] sm:$0xff] }
 0x4ea   :  { %6368 = vmatmul.mubr.msk.f32.gmra.mrb[28].mxu1 %vm2087_vm2, %v2905_v29  ;;  %v5133_v29 = vld [vmem:[%s9541_s2 + $0x1a0] sm:$0xff] }
 0x4eb   :  { %6370 = vmatprep.mubr.msk.f32.mxu1 %vm7417_vm0, %v7418_v4  ;;  %v6873_v2 = vpack.c.bf16 %v5134_v38, %v5133_v29  ;;  %v4013_v29 = vld [vmem:[#allocation2 + $0x2a] sm:$0xff] }
 0x4ee   :  { %6371 = vmatmul.mubr.msk.f32.gmra.mrb[30].mxu1 %vm2087_vm2, %v3129_v53  ;;  %v3571_v53 = vld [vmem:[#allocation2 + $0x51] sm:$0xff] }
 0x4ef   :  { %6389 = vmatprep.mubr.msk.f32.mxu1 %vm7417_vm0, %v7418_v4 }
 0x4f2   :  { %6390 = vmatmul.mubr.msk.f32.vlgmr.msra.gmra.mrb[2].mxu1 %vm2087_vm2, %v3339_v57  ;;  %v3575_v57 = vld [vmem:[#allocation2 + $0x71] sm:$0xff] }
 0x4f3   :  { %6856 = vmatpush3.bf16.msra.mxu1 %v6855_v56  ;;  %6392 = vmatprep.mubr.msk.f32.mxu1 %vm7417_vm0, %v7418_v4  ;;  %v3572_v56 = vld [vmem:[#allocation2 + $0x59] sm:$0xff] }
 0x4f4   :  { %6857 = vmatprep.subr.bf16.mxu1 %v7416_v0 }
 0x4f6   :  { %6393 = vmatmul.mubr.msk.f32.gmra.mrb[4].mxu1 %vm2087_vm2, %v3340_v1  ;;  %v3577_v1 = vld [vmem:[#allocation2 + $0x81] sm:$0xff] }
 0x4f7   :  { %6395 = vmatprep.mubr.msk.f32.mxu1 %vm7417_vm0, %v7418_v4  ;;  %6859 = vmatpush3.bf16.msra.mxu1 %v6858_v58  ;;  %v3576_v58 = vld [vmem:[#allocation2 + $0x79] sm:$0xff] }
 0x4f8   :  { %6860 = vmatprep.subr.bf16.mxu1 %v7416_v0 }
 0x4fa   :  { %6396 = vmatmul.mubr.msk.f32.gmra.mrb[6].mxu1 %vm2087_vm2, %v3341_v7  ;;  %v6882_v7 = vpack.c.bf16 %v5155_v3, %v5154_v31  ;;  %v4244_v31 = vld [vmem:[#allocation2 + $0x63] sm:$0xff]  ;;  %v4245_v3 = vld [vmem:[#allocation2 + $0x6b] sm:$0xff] }
 0x4fb   :  { %6398 = vmatprep.mubr.msk.f32.mxu1 %vm7417_vm0, %v7418_v4  ;;  %6862 = vmatpush3.bf16.msra.mxu1 %v6861_v32  ;;  %v6879_v32 = vpack.c.bf16 %v5153_v61, %v5152_v59  ;;  %v4240_v59 = vld [vmem:[#allocation2 + $0x43] sm:$0xff]  ;;  %v4241_v61 = vld [vmem:[#allocation2 + $0x4b] sm:$0xff] }
 0x4fc   :  { %6863 = vmatprep.subr.bf16.mxu1 %v7416_v0 }
 0x4fe   :  { %6399 = vmatmul.mubr.msk.f32.gmra.mrb[8].mxu1 %vm2087_vm2, %v3342_v8  ;;  %v5157_v8 = vld [vmem:[%s9541_s2 + $0x1e8] sm:$0xff] }
 0x4ff   :  { %6401 = vmatprep.mubr.msk.f32.mxu1 %vm7417_vm0, %v7418_v4  ;;  %6865 = vmatpush3.bf16.msra.mxu1 %v6864_v6  ;;  %v5156_v6 = vld [vmem:[%s9541_s2 + $0x1e0] sm:$0xff] }
 0x500   :  { %6866 = vmatprep.subr.bf16.mxu1 %v7416_v0 }
 0x502   :  { %6402 = vmatmul.mubr.msk.f32.gmra.mrb[10].mxu1 %vm2087_vm2, %v3343_v11  ;;  %v6885_v11 = vpack.c.bf16 %v5157_v8, %v5156_v6  ;;  %v4247_v6 = vld [vmem:[#allocation2 + $0x7b] sm:$0xff]  ;;  %v4248_v8 = vld [vmem:[#allocation2 + $0x83] sm:$0xff] }
 0x503   :  { %6404 = vmatprep.mubr.msk.f32.mxu1 %vm7417_vm0, %v7418_v4 }
 0x506   :  { %6405 = vmatmul.mubr.msk.f32.gmra.mrb[12].mxu1 %vm2087_vm2, %v3344_v12  ;;  %v5158_v12 = vld [vmem:[%s9541_s2 + $0x1f0] sm:$0xff] }
 0x507   :  { %6407 = vmatprep.mubr.msk.f32.mxu1 %vm7417_vm0, %v7418_v4 }
 0x50a   :  { %6408 = vmatmul.mubr.msk.f32.gmra.mrb[14].mxu1 %vm2087_vm2, %v3345_v16  ;;  %v5159_v16 = vld [vmem:[%s9541_s2 + $0x1f8] sm:$0xff] }
 0x50b   :  { %6410 = vmatprep.mubr.msk.f32.mxu1 %vm7417_vm0, %v7418_v4 }
 0x50e   :  { %6411 = vmatmul.mubr.msk.f32.gmra.mrb[16].mxu1 %vm2087_vm2, %v3346_v20  ;;  %v6888_v20 = vpack.c.bf16 %v5159_v16, %v5158_v12  ;;  %v4559_v12 = vld [vmem:[%s9540_s3] sm:$0xff]  ;;  %v4560_v16 = vld [vmem:[%s9540_s3 + $0x8] sm:$0xff] }
 0x50f   :  { %6413 = vmatprep.mubr.msk.f32.mxu1 %vm7417_vm0, %v7418_v4 }
 0x512   :  { %6414 = vmatmul.mubr.msk.f32.gmra.mrb[18].mxu1 %vm2087_vm2, %v3347_v22  ;;  %v3801_v22 = vld [vmem:[#allocation2 + $0x89] sm:$0xff] }
 0x513   :  { %6416 = vmatprep.mubr.msk.f32.mxu1 %vm7417_vm0, %v7418_v4 }
 0x516   :  { %6417 = vmatmul.mubr.msk.f32.gmra.mrb[20].mxu1 %vm2087_vm2, %v3348_v23  ;;  %v5175_v23 = vld [vmem:[%s9541_s2 + $0x200] sm:$0xff] }
 0x517   :  { %6419 = vmatprep.mubr.msk.f32.mxu1 %vm7417_vm0, %v7418_v4 }
 0x51a   :  { %6420 = vmatmul.mubr.msk.f32.gmra.mrb[22].mxu1 %vm2087_vm2, %v3349_v24  ;;  %v5176_v24 = vld [vmem:[%s9541_s2 + $0x208] sm:$0xff] }
 0x51b   :  { %6422 = vmatprep.mubr.msk.f32.mxu1 %vm7417_vm0, %v7418_v4 }
 0x51e   :  { %6423 = vmatmul.mubr.msk.f32.gmra.mrb[24].mxu1 %vm2087_vm2, %v3350_v26  ;;  %v6891_v26 = vpack.c.bf16 %v5176_v24, %v5175_v23  ;;  %v4563_v24 = vld [vmem:[%s9540_s3 + $0x20] sm:$0xff] }
 0x51f   :  { %6425 = vmatprep.mubr.msk.f32.mxu1 %vm7417_vm0, %v7418_v4 }
 0x522   :  { %6426 = vmatmul.mubr.msk.f32.gmra.mrb[26].mxu1 %vm2087_vm2, %v3351_v33  ;;  %v5177_v33 = vld [vmem:[%s9541_s2 + $0x210] sm:$0xff] }
 0x523   :  { %6428 = vmatprep.mubr.msk.f32.mxu1 %vm7417_vm0, %v7418_v4 }
 0x526   :  { %6429 = vmatmul.mubr.msk.f32.gmra.mrb[28].mxu1 %vm2087_vm2, %v3352_v34  ;;  %v5178_v34 = vld [vmem:[%s9541_s2 + $0x218] sm:$0xff] }
 0x527   :  { %6431 = vmatprep.mubr.msk.f32.mxu1 %vm7417_vm0, %v7418_v4  ;;  %v6894_v39 = vpack.c.bf16 %v5178_v34, %v5177_v33  ;;  %v4565_v34 = vld [vmem:[%s9540_s3 + $0x30] sm:$0xff] }
 0x52a   :  { %6432 = vmatmul.mubr.msk.f32.gmra.mrb[30].mxu1 %vm2087_vm2, %v3353_v41  ;;  %v5179_v41 = vld [vmem:[%s9541_s2 + $0x220] sm:$0xff] }
 0x52b   :  { %6450 = vmatprep.mubr.msk.f32.mxu1 %vm7417_vm0, %v7418_v4 }
 0x52e   :  { %6451 = vmatmul.mubr.msk.f32.vlgmr.msra.gmra.mrb[2].mxu1 %vm2087_vm2, %v3563_v10  ;;  %v5181_v10 = vld [vmem:[%s9541_s2 + $0x230] sm:$0xff] }
 0x52f   :  { %6868 = vmatpush3.bf16.msra.mxu1 %v6867_v42  ;;  %6453 = vmatprep.mubr.msk.f32.mxu1 %vm7417_vm0, %v7418_v4  ;;  %v5180_v42 = vld [vmem:[%s9541_s2 + $0x228] sm:$0xff] }
 0x530   :  { %6869 = vmatprep.subr.bf16.mxu1 %v7416_v0  ;;  %v6897_v44 = vpack.c.bf16 %v5180_v42, %v5179_v41 }
 0x532   :  { %6454 = vmatmul.mubr.msk.f32.gmra.mrb[4].mxu1 %vm2087_vm2, %v3564_v47 }
 0x533   :  { %6456 = vmatprep.mubr.msk.f32.mxu1 %vm7417_vm0, %v7418_v4  ;;  %6871 = vmatpush3.bf16.msra.mxu1 %v6870_v19  ;;  %v5182_v19 = vld [vmem:[%s9541_s2 + $0x238] sm:$0xff] }
 0x534   :  { %6872 = vmatprep.subr.bf16.mxu1 %v7416_v0  ;;  %v6900_v38 = vpack.c.bf16 %v5182_v19, %v5181_v10 }
 0x536   :  { %6457 = vmatmul.mubr.msk.f32.gmra.mrb[6].mxu1 %vm2087_vm2, %v3565_v48 }
 0x537   :  { %6459 = vmatprep.mubr.msk.f32.mxu1 %vm7417_vm0, %v7418_v4  ;;  %6874 = vmatpush3.bf16.msra.mxu1 %v6873_v2  ;;  %v4015_v2 = vld [vmem:[#allocation2 + $0x3a] sm:$0xff] }
 0x538   :  { %6875 = vmatprep.subr.bf16.mxu1 %v7416_v0 }
 0x53a   :  { %6460 = vmatmul.mubr.msk.f32.gmra.mrb[8].mxu1 %vm2087_vm2, %v3566_v51 }
 0x53b   :  { %6462 = vmatprep.mubr.msk.f32.mxu1 %vm7417_vm0, %v7418_v4  ;;  %6877 = vmatpush3.bf16.msra.mxu1 %v6876_v40  ;;  %v4019_v40 = vld [vmem:[#allocation2 + $0x5a] sm:$0xff] }
 0x53c   :  { %6878 = vmatprep.subr.bf16.mxu1 %v7416_v0 }
 0x53e   :  { %6463 = vmatmul.mubr.msk.f32.gmra.mrb[10].mxu1 %vm2087_vm2, %v3567_v50 }
 0x53f   :  { %6465 = vmatprep.mubr.msk.f32.mxu1 %vm7417_vm0, %v7418_v4 }
 0x542   :  { %6466 = vmatmul.mubr.msk.f32.gmra.mrb[12].mxu1 %vm2087_vm2, %v3568_v62 }
 0x543   :  { %6468 = vmatprep.mubr.msk.f32.mxu1 %vm7417_vm0, %v7418_v4 }
 0x546   :  { %6469 = vmatmul.mubr.msk.f32.gmra.mrb[14].mxu1 %vm2087_vm2, %v3569_v52 }
 0x547   :  { %6471 = vmatprep.mubr.msk.f32.mxu1 %vm7417_vm0, %v7418_v4 }
 0x54a   :  { %6472 = vmatmul.mubr.msk.f32.gmra.mrb[16].mxu1 %vm2087_vm2, %v3570_v18 }
 0x54b   :  { %6474 = vmatprep.mubr.msk.f32.mxu1 %vm7417_vm0, %v7418_v4 }
 0x54e   :  { %6475 = vmatmul.mubr.msk.f32.gmra.mrb[18].mxu1 %vm2087_vm2, %v3571_v53 }
 0x54f   :  { %6477 = vmatprep.mubr.msk.f32.mxu1 %vm7417_vm0, %v7418_v4 }
 0x552   :  { %6478 = vmatmul.mubr.msk.f32.gmra.mrb[20].mxu1 %vm2087_vm2, %v3572_v56 }
 0x553   :  { %6480 = vmatprep.mubr.msk.f32.mxu1 %vm7417_vm0, %v7418_v4 }
 0x556   :  { %6481 = vmatmul.mubr.msk.f32.gmra.mrb[22].mxu1 %vm2087_vm2, %v3573_v46 }
 0x557   :  { %6483 = vmatprep.mubr.msk.f32.mxu1 %vm7417_vm0, %v7418_v4 }
 0x55a   :  { %6484 = vmatmul.mubr.msk.f32.gmra.mrb[24].mxu1 %vm2087_vm2, %v3574_v55 }
 0x55b   :  { %6486 = vmatprep.mubr.msk.f32.mxu1 %vm7417_vm0, %v7418_v4 }
 0x55e   :  { %6487 = vmatmul.mubr.msk.f32.gmra.mrb[26].mxu1 %vm2087_vm2, %v3575_v57 }
 0x55f   :  { %6489 = vmatprep.mubr.msk.f32.mxu1 %vm7417_vm0, %v7418_v4 }
 0x562   :  { %6490 = vmatmul.mubr.msk.f32.gmra.mrb[28].mxu1 %vm2087_vm2, %v3576_v58 }
 0x563   :  { %6492 = vmatprep.mubr.msk.f32.mxu1 %vm7417_vm0, %v7418_v4 }
 0x566   :  { %6493 = vmatmul.mubr.msk.f32.gmra.mrb[30].mxu1 %vm2087_vm2, %v3577_v1 }
 0x567   :  { %6511 = vmatprep.mubr.msk.f32.mxu1 %vm7417_vm0, %v7418_v4 }
 0x56a   :  { %6512 = vmatmul.mubr.msk.f32.vlgmr.msra.gmra.mrb[2].mxu1 %vm2087_vm2, %v3564_v47  ;;  %v4014_v47 = vld [vmem:[#allocation2 + $0x32] sm:$0xff] }
 0x56b   :  { %6880 = vmatpush3.bf16.msra.mxu1 %v6879_v32  ;;  %6514 = vmatprep.mubr.msk.f32.mxu1 %vm7417_vm0, %v7418_v4  ;;  %v4243_v32 = vld [vmem:[#allocation2 + $0x5b] sm:$0xff] }
 0x56c   :  { %6881 = vmatprep.subr.bf16.mxu1 %v7416_v0 }
 0x56e   :  { %6515 = vmatmul.mubr.msk.f32.gmra.mrb[4].mxu1 %vm2087_vm2, %v3565_v48  ;;  %v4018_v48 = vld [vmem:[#allocation2 + $0x52] sm:$0xff] }
 0x56f   :  { %6517 = vmatprep.mubr.msk.f32.mxu1 %vm7417_vm0, %v7418_v4  ;;  %6883 = vmatpush3.bf16.msra.mxu1 %v6882_v7  ;;  %v4246_v7 = vld [vmem:[#allocation2 + $0x73] sm:$0xff] }
 0x570   :  { %6884 = vmatprep.subr.bf16.mxu1 %v7416_v0 }
 0x572   :  { %6518 = vmatmul.mubr.msk.f32.gmra.mrb[6].mxu1 %vm2087_vm2, %v3566_v51  ;;  %v4020_v51 = vld [vmem:[#allocation2 + $0x62] sm:$0xff] }
 0x573   :  { %6520 = vmatprep.mubr.msk.f32.mxu1 %vm7417_vm0, %v7418_v4  ;;  %6886 = vmatpush3.bf16.msra.mxu1 %v6885_v11  ;;  %v4249_v11 = vld [vmem:[#allocation2 + $0x8b] sm:$0xff] }
 0x574   :  { %6887 = vmatprep.subr.bf16.mxu1 %v7416_v0 }
 0x576   :  { %6521 = vmatmul.mubr.msk.f32.gmra.mrb[8].mxu1 %vm2087_vm2, %v3567_v50  ;;  %v4021_v50 = vld [vmem:[#allocation2 + $0x6a] sm:$0xff] }
 0x577   :  { %6523 = vmatprep.mubr.msk.f32.mxu1 %vm7417_vm0, %v7418_v4  ;;  %6889 = vmatpush3.bf16.msra.mxu1 %v6888_v20  ;;  %v6903_v20 = vpack.c.bf16 %v4560_v16, %v4559_v12 }
 0x578   :  { %6890 = vmatprep.subr.bf16.mxu1 %v7416_v0 }
 0x579   :  { %6916 = vmatpush3.bf16.msra.mxu0 %v6903_v20 }
 0x57a   :  { %6524 = vmatmul.mubr.msk.f32.gmra.mrb[10].mxu1 %vm2087_vm2, %v3568_v62  ;;  %v4022_v62 = vld [vmem:[#allocation2 + $0x72] sm:$0xff]  ;;  %6917 = vmatprep.subr.bf16.mxu0 %v7416_v0 }
 0x57b   :  { %6526 = vmatprep.mubr.msk.f32.mxu1 %vm7417_vm0, %v7418_v4 }
 0x57e   :  { %6527 = vmatmul.mubr.msk.f32.gmra.mrb[12].mxu1 %vm2087_vm2, %v3569_v52  ;;  %v4023_v52 = vld [vmem:[#allocation2 + $0x7a] sm:$0xff] }
 0x57f   :  { %6529 = vmatprep.mubr.msk.f32.mxu1 %vm7417_vm0, %v7418_v4 }
 0x582   :  { %6530 = vmatmul.mubr.msk.f32.gmra.mrb[14].mxu1 %vm2087_vm2, %v3570_v18  ;;  %v4024_v18 = vld [vmem:[#allocation2 + $0x82] sm:$0xff] }
 0x583   :  { %6532 = vmatprep.mubr.msk.f32.mxu1 %vm7417_vm0, %v7418_v4 }
 0x586   :  { %6533 = vmatmul.mubr.msk.f32.gmra.mrb[16].mxu1 %vm2087_vm2, %v3571_v53  ;;  %v4025_v53 = vld [vmem:[#allocation2 + $0x8a] sm:$0xff] }
 0x587   :  { %6535 = vmatprep.mubr.msk.f32.mxu1 %vm7417_vm0, %v7418_v4 }
 0x58a   :  { %6536 = vmatmul.mubr.msk.f32.gmra.mrb[18].mxu1 %vm2087_vm2, %v3572_v56  ;;  %v4235_v56 = vld [vmem:[#allocation2 + $0x1b] sm:$0xff] }
 0x58b   :  { %6538 = vmatprep.mubr.msk.f32.mxu1 %vm7417_vm0, %v7418_v4 }
 0x58e   :  { %6539 = vmatmul.mubr.msk.f32.gmra.mrb[20].mxu1 %vm2087_vm2, %v3573_v46  ;;  %v4236_v46 = vld [vmem:[#allocation2 + $0x23] sm:$0xff] }
 0x58f   :  { %6541 = vmatprep.mubr.msk.f32.mxu1 %vm7417_vm0, %v7418_v4 }
 0x592   :  { %6542 = vmatmul.mubr.msk.f32.gmra.mrb[22].mxu1 %vm2087_vm2, %v3574_v55  ;;  %v4237_v55 = vld [vmem:[#allocation2 + $0x2b] sm:$0xff] }
 0x593   :  { %6544 = vmatprep.mubr.msk.f32.mxu1 %vm7417_vm0, %v7418_v4 }
 0x596   :  { %6545 = vmatmul.mubr.msk.f32.gmra.mrb[24].mxu1 %vm2087_vm2, %v3575_v57  ;;  %v4238_v57 = vld [vmem:[#allocation2 + $0x33] sm:$0xff] }
 0x597   :  { %6547 = vmatprep.mubr.msk.f32.mxu1 %vm7417_vm0, %v7418_v4 }
 0x59a   :  { %6548 = vmatmul.mubr.msk.f32.gmra.mrb[26].mxu1 %vm2087_vm2, %v3576_v58  ;;  %v4239_v58 = vld [vmem:[#allocation2 + $0x3b] sm:$0xff] }
 0x59b   :  { %6550 = vmatprep.mubr.msk.f32.mxu1 %vm7417_vm0, %v7418_v4 }
 0x59e   :  { %6551 = vmatmul.mubr.msk.f32.gmra.mrb[28].mxu1 %vm2087_vm2, %v3577_v1  ;;  %v4242_v1 = vld [vmem:[#allocation2 + $0x53] sm:$0xff] }
 0x59f   :  { %6553 = vmatprep.mubr.msk.f32.mxu1 %vm7417_vm0, %v7418_v4 }
 0x5a2   :  { %6554 = vmatmul.mubr.msk.f32.gmra.mrb[30].mxu1 %vm2087_vm2, %v3801_v22  ;;  %v4561_v22 = vld [vmem:[%s9540_s3 + $0x10] sm:$0xff] }
 0x5a3   :  { %6572 = vmatprep.mubr.msk.f32.mxu1 %vm7417_vm0, %v7418_v4 }
 0x5a6   :  { %6573 = vmatmul.mubr.msk.f32.vlgmr.msra.gmra.mrb[2].mxu1 %vm2087_vm2, %v4011_v35  ;;  %v4566_v35 = vld [vmem:[%s9540_s3 + $0x38] sm:$0xff] }
 0x5a7   :  { %6892 = vmatpush3.bf16.msra.mxu1 %v6891_v26  ;;  %6575 = vmatprep.mubr.msk.f32.mxu1 %vm7417_vm0, %v7418_v4  ;;  %v4564_v26 = vld [vmem:[%s9540_s3 + $0x28] sm:$0xff] }
 0x5a8   :  { %6893 = vmatprep.subr.bf16.mxu1 %v7416_v0  ;;  %v6909_v33 = vpack.c.bf16 %v4564_v26, %v4563_v24 }
 0x5aa   :  { %6576 = vmatmul.mubr.msk.f32.gmra.mrb[4].mxu1 %vm2087_vm2, %v4012_v43 }
 0x5ab   :  { %6578 = vmatprep.mubr.msk.f32.mxu1 %vm7417_vm0, %v7418_v4  ;;  %6895 = vmatpush3.bf16.msra.mxu1 %v6894_v39  ;;  %v6912_v39 = vpack.c.bf16 %v4566_v35, %v4565_v34 }
 0x5ac   :  { %6896 = vmatprep.subr.bf16.mxu1 %v7416_v0 }
 0x5ae   :  { %6579 = vmatmul.mubr.msk.f32.gmra.mrb[6].mxu1 %vm2087_vm2, %v4013_v29 }
 0x5af   :  { %6581 = vmatprep.mubr.msk.f32.mxu1 %vm7417_vm0, %v7418_v4  ;;  %6898 = vmatpush3.bf16.msra.mxu1 %v6897_v44 }
 0x5b0   :  { %6899 = vmatprep.subr.bf16.mxu1 %v7416_v0 }
 0x5b2   :  { %6582 = vmatmul.mubr.msk.f32.gmra.mrb[8].mxu1 %vm2087_vm2, %v4014_v47 }
 0x5b3   :  { %6584 = vmatprep.mubr.msk.f32.mxu1 %vm7417_vm0, %v7418_v4  ;;  %6901 = vmatpush3.bf16.msra.mxu1 %v6900_v38 }
 0x5b4   :  { %6902 = vmatprep.subr.bf16.mxu1 %v7416_v0 }
 0x5b6   :  { %6585 = vmatmul.mubr.msk.f32.gmra.mrb[10].mxu1 %vm2087_vm2, %v4015_v2 }
 0x5b7   :  { %6587 = vmatprep.mubr.msk.f32.mxu1 %vm7417_vm0, %v7418_v4 }
 0x5ba   :  { %6588 = vmatmul.mubr.msk.f32.gmra.mrb[12].mxu1 %vm2087_vm2, %v4016_v17 }
 0x5bb   :  { %6590 = vmatprep.mubr.msk.f32.mxu1 %vm7417_vm0, %v7418_v4 }
 0x5be   :  { %6591 = vmatmul.mubr.msk.f32.gmra.mrb[14].mxu1 %vm2087_vm2, %v4017_v27 }
 0x5bf   :  { %6593 = vmatprep.mubr.msk.f32.mxu1 %vm7417_vm0, %v7418_v4 }
 0x5c2   :  { %6594 = vmatmul.mubr.msk.f32.gmra.mrb[16].mxu1 %vm2087_vm2, %v4018_v48 }
 0x5c3   :  { %6596 = vmatprep.mubr.msk.f32.mxu1 %vm7417_vm0, %v7418_v4 }
 0x5c6   :  { %6597 = vmatmul.mubr.msk.f32.gmra.mrb[18].mxu1 %vm2087_vm2, %v4019_v40 }
 0x5c7   :  { %6599 = vmatprep.mubr.msk.f32.mxu1 %vm7417_vm0, %v7418_v4 }
 0x5ca   :  { %6600 = vmatmul.mubr.msk.f32.gmra.mrb[20].mxu1 %vm2087_vm2, %v4020_v51 }
 0x5cb   :  { %6602 = vmatprep.mubr.msk.f32.mxu1 %vm7417_vm0, %v7418_v4 }
 0x5ce   :  { %6603 = vmatmul.mubr.msk.f32.gmra.mrb[22].mxu1 %vm2087_vm2, %v4021_v50 }
 0x5cf   :  { %6605 = vmatprep.mubr.msk.f32.mxu1 %vm7417_vm0, %v7418_v4 }
 0x5d2   :  { %6606 = vmatmul.mubr.msk.f32.gmra.mrb[24].mxu1 %vm2087_vm2, %v4022_v62 }
 0x5d3   :  { %6608 = vmatprep.mubr.msk.f32.mxu1 %vm7417_vm0, %v7418_v4 }
 0x5d6   :  { %6609 = vmatmul.mubr.msk.f32.gmra.mrb[26].mxu1 %vm2087_vm2, %v4023_v52 }
 0x5d7   :  { %6611 = vmatprep.mubr.msk.f32.mxu1 %vm7417_vm0, %v7418_v4 }
 0x5da   :  { %6612 = vmatmul.mubr.msk.f32.gmra.mrb[28].mxu1 %vm2087_vm2, %v4024_v18 }
 0x5db   :  { %6614 = vmatprep.mubr.msk.f32.mxu1 %vm7417_vm0, %v7418_v4 }
 0x5de   :  { %6615 = vmatmul.mubr.msk.f32.gmra.mrb[30].mxu1 %vm2087_vm2, %v4025_v53 }
 0x5df   :  { %6633 = vmatprep.mubr.msk.f32.mxu1 %vm7417_vm0, %v7418_v4 }
 0x5e2   :  { %6634 = vmatmul.mubr.msk.f32.vlgmr.msra.gmra.mrb[2].mxu1 %vm2087_vm2, %v4235_v56 }
 0x5e3   :  { %6636 = vmatprep.mubr.msk.f32.mxu1 %vm7417_vm0, %v7418_v4  ;;  %6904 = vmatpush3.bf16.msra.mxu1 %v6903_v20 }
 0x5e4   :  { %6905 = vmatprep.subr.bf16.mxu1 %v7416_v0 }
 0x5e6   :  { %6637 = vmatmul.mubr.msk.f32.gmra.mrb[4].mxu1 %vm2087_vm2, %v4236_v46 }
 0x5e7   :  { %6639 = vmatprep.mubr.msk.f32.mxu1 %vm7417_vm0, %v7418_v4 }
 0x5ea   :  { %6640 = vmatmul.mubr.msk.f32.gmra.mrb[6].mxu1 %vm2087_vm2, %v4237_v55 }
 0x5eb   :  { %6642 = vmatprep.mubr.msk.f32.mxu1 %vm7417_vm0, %v7418_v4 }
 0x5ee   :  { %6643 = vmatmul.mubr.msk.f32.gmra.mrb[8].mxu1 %vm2087_vm2, %v4238_v57 }
 0x5ef   :  { %6645 = vmatprep.mubr.msk.f32.mxu1 %vm7417_vm0, %v7418_v4 }
 0x5f2   :  { %6646 = vmatmul.mubr.msk.f32.gmra.mrb[10].mxu1 %vm2087_vm2, %v4239_v58 }
 0x5f3   :  { %6648 = vmatprep.mubr.msk.f32.mxu1 %vm7417_vm0, %v7418_v4 }
 0x5f6   :  { %6649 = vmatmul.mubr.msk.f32.gmra.mrb[12].mxu1 %vm2087_vm2, %v4240_v59 }
 0x5f7   :  { %6651 = vmatprep.mubr.msk.f32.mxu1 %vm7417_vm0, %v7418_v4 }
 0x5fa   :  { %6652 = vmatmul.mubr.msk.f32.gmra.mrb[14].mxu1 %vm2087_vm2, %v4241_v61 }
 0x5fb   :  { %6654 = vmatprep.mubr.msk.f32.mxu1 %vm7417_vm0, %v7418_v4 }
 0x5fe   :  { %6655 = vmatmul.mubr.msk.f32.gmra.mrb[16].mxu1 %vm2087_vm2, %v4242_v1 }
 0x5ff   :  { %6657 = vmatprep.mubr.msk.f32.mxu1 %vm7417_vm0, %v7418_v4 }
 0x602   :  { %6658 = vmatmul.mubr.msk.f32.gmra.mrb[18].mxu1 %vm2087_vm2, %v4243_v32 }
 0x603   :  { %6660 = vmatprep.mubr.msk.f32.mxu1 %vm7417_vm0, %v7418_v4 }
 0x606   :  { %6661 = vmatmul.mubr.msk.f32.gmra.mrb[20].mxu1 %vm2087_vm2, %v4244_v31 }
 0x607   :  { %6663 = vmatprep.mubr.msk.f32.mxu1 %vm7417_vm0, %v7418_v4 }
 0x60a   :  { %6664 = vmatmul.mubr.msk.f32.gmra.mrb[22].mxu1 %vm2087_vm2, %v4245_v3 }
 0x60b   :  { %6666 = vmatprep.mubr.msk.f32.mxu1 %vm7417_vm0, %v7418_v4 }
 0x60e   :  { %6667 = vmatmul.mubr.msk.f32.gmra.mrb[24].mxu1 %vm2087_vm2, %v4246_v7 }
 0x60f   :  { %6669 = vmatprep.mubr.msk.f32.mxu1 %vm7417_vm0, %v7418_v4 }
 0x612   :  { %6670 = vmatmul.mubr.msk.f32.gmra.mrb[26].mxu1 %vm2087_vm2, %v4247_v6 }
 0x613   :  { %6672 = vmatprep.mubr.msk.f32.mxu1 %vm7417_vm0, %v7418_v4 }
 0x616   :  { %6673 = vmatmul.mubr.msk.f32.gmra.mrb[28].mxu1 %vm2087_vm2, %v4248_v8 }
 0x617   :  { %6675 = vmatprep.mubr.msk.f32.mxu1 %vm7417_vm0, %v7418_v4 }
 0x61a   :  { %6676 = vmatmul.mubr.msk.f32.gmra.mrb[30].mxu1 %vm2087_vm2, %v4249_v11 }
 0x61b   :  { %6694 = vmatprep.mubr.msk.f32.mxu1 %vm7417_vm0, %v7418_v4  ;;  %v4562_v4 = vld [vmem:[%s9540_s3 + $0x18] sm:$0xff] }
 0x61c   :  { %v6906_v23 = vpack.c.bf16 %v4562_v4, %v4561_v22 }
 0x61e   :  { %6907 = vmatpush3.bf16.msra.mxu1 %v6906_v23  ;;  %6919 = vmatpush3.bf16.msra.mxu0 %v6906_v23 }
 0x61f   :  { %6908 = vmatprep.subr.bf16.mxu1 %v7416_v0  ;;  %6920 = vmatprep.subr.bf16.mxu0 %v7416_v0 }
 0x622   :  { %6910 = vmatpush3.bf16.msra.mxu1 %v6909_v33  ;;  %6922 = vmatpush3.bf16.msra.mxu0 %v6909_v33 }
 0x623   :  { %6911 = vmatprep.subr.bf16.mxu1 %v7416_v0  ;;  %6923 = vmatprep.subr.bf16.mxu0 %v7416_v0 }
 0x626   :  { %6913 = vmatpush3.bf16.msra.mxu1 %v6912_v39  ;;  %6925 = vmatpush3.bf16.msra.mxu0 %v6912_v39 }
 0x6b5   :  { %v9351_v41 = vpop.f32.mrb[2].mxu1 }
 0x6b6   :  { %v4459_v42 = vmul.f32 %v9351_v41, %v8443_v5  ;;  %v6635_v43 = vpop.f32.mrb[3].mxu1 }
 0x6b8   :  { %v4509_v0 = vmul.f32 %v4459_v42, %v4459_v42  ;;  %v4474_v29 = vsel %vm2087_vm2, %v4459_v42, 0.0 }
 0x6b9   :  { %v9355_v44 = vpop.f32.mrb[4].mxu1 }
 0x6ba   :  { %v4460_v10 = vmul.f32 %v9355_v44, %v8449_v9  ;;  %v6638_v19 = vpop.f32.mrb[5].mxu1  ;;  %v4524_v27 = vsel %vm2087_vm2, %v4509_v0, 0.0 }
 0x6bc   :  { %v4475_v38 = vsel %vm2087_vm2, %v4460_v10, 0.0  ;;  %v4510_v47 = vmul.f32 %v4460_v10, %v4460_v10 }
 0x6bd   :  { %v4476_v2 = vadd.f32 %v4475_v38, %v4474_v29  ;;  %v9361_v17 = vpop.f32.mrb[6].mxu1 }
 0x6be   :  { %v4525_v5 = vsel %vm2087_vm2, %v4510_v47, 0.0  ;;  %v4461_v48 = vmul.f32 %v9361_v17, %v8455_v14  ;;  %v6641_v40 = vpop.f32.mrb[7].mxu1 }
 0x6bf   :  { %v4526_v51 = vadd.f32 %v4525_v5, %v4524_v27 }
 0x6c0   :  { %v4477_v9 = vsel %vm2087_vm2, %v4461_v48, 0.0  ;;  %v4511_v50 = vmul.f32 %v4461_v48, %v4461_v48 }
 0x6c1   :  { %v4478_v62 = vadd.f32 %v4477_v9, %v4476_v2  ;;  %v9368_v52 = vpop.f32.mrb[8].mxu1 }
 0x6c2   :  { %v4527_v18 = vsel %vm2087_vm2, %v4511_v50, 0.0  ;;  %v4462_v53 = vmul.f32 %v9368_v52, %v8466_v28  ;;  %v6644_v56 = vpop.f32.mrb[9].mxu1 }
 0x6c3   :  { %v4528_v46 = vadd.f32 %v4527_v18, %v4526_v51 }
 0x6c4   :  { %v4479_v55 = vsel %vm2087_vm2, %v4462_v53, 0.0  ;;  %v4512_v57 = vmul.f32 %v4462_v53, %v4462_v53 }
 0x6c5   :  { %v4480_v58 = vadd.f32 %v4479_v55, %v4478_v62  ;;  %v9374_v14 = vpop.f32.mrb[10].mxu1 }
 0x6c6   :  { %v4529_v59 = vsel %vm2087_vm2, %v4512_v57, 0.0  ;;  %v4463_v61 = vmul.f32 %v9374_v14, %v8474_v36  ;;  %v6647_v1 = vpop.f32.mrb[11].mxu1 }
 0x6c7   :  { %v4530_v32 = vadd.f32 %v4529_v59, %v4528_v46 }
 0x6c8   :  { %v4481_v31 = vsel %vm2087_vm2, %v4463_v61, 0.0  ;;  %v4513_v3 = vmul.f32 %v4463_v61, %v4463_v61 }
 0x6c9   :  { %v4482_v7 = vadd.f32 %v4481_v31, %v4480_v58  ;;  %v9380_v28 = vpop.f32.mrb[12].mxu1 }
 0x6ca   :  { %v4531_v6 = vsel %vm2087_vm2, %v4513_v3, 0.0  ;;  %v4464_v8 = vmul.f32 %v9380_v28, %v8482_v45  ;;  %v6650_v11 = vpop.f32.mrb[13].mxu1 }
 0x6cb   :  { %v4532_v12 = vadd.f32 %v4531_v6, %v4530_v32 }
 0x6cc   :  { %v4483_v16 = vsel %vm2087_vm2, %v4464_v8, 0.0  ;;  %v4514_v20 = vmul.f32 %v4464_v8, %v4464_v8 }
 0x6cd   :  { %v4484_v22 = vadd.f32 %v4483_v16, %v4482_v7  ;;  %v9386_v36 = vpop.f32.mrb[14].mxu1 }
 0x6ce   :  { %v4533_v4 = vsel %vm2087_vm2, %v4514_v20, 0.0  ;;  %v4465_v23 = vmul.f32 %v9386_v36, %v8490_v54  ;;  %v6653_v24 = vpop.f32.mrb[15].mxu1 }
 0x6cf   :  { %v4534_v26 = vadd.f32 %v4533_v4, %v4532_v12 }
 0x6d0   :  { %v4485_v33 = vsel %vm2087_vm2, %v4465_v23, 0.0  ;;  %v4515_v34 = vmul.f32 %v4465_v23, %v4465_v23 }
 0x6d1   :  { %v4486_v35 = vadd.f32 %v4485_v33, %v4484_v22  ;;  %v9392_v45 = vpop.f32.mrb[16].mxu1 }
 0x6d2   :  { %v4535_v39 = vsel %vm2087_vm2, %v4515_v34, 0.0  ;;  %v4466_v42 = vmul.f32 %v9392_v45, %v8498_v63  ;;  %v6656_v43 = vpop.f32.mrb[17].mxu1 }
 0x6d3   :  { %v4536_v0 = vadd.f32 %v4535_v39, %v4534_v26 }
 0x6d4   :  { %v4487_v10 = vsel %vm2087_vm2, %v4466_v42, 0.0  ;;  %v4516_v19 = vmul.f32 %v4466_v42, %v4466_v42 }
 0x6d5   :  { %v4488_v29 = vadd.f32 %v4487_v10, %v4486_v35  ;;  %v9398_v54 = vpop.f32.mrb[18].mxu1 }
 0x6d6   :  { %v4537_v38 = vsel %vm2087_vm2, %v4516_v19, 0.0  ;;  %v4467_v47 = vmul.f32 %v9398_v54, %v8506_v15  ;;  %v6659_v2 = vpop.f32.mrb[19].mxu1 }
 0x6d7   :  { %v4538_v27 = vadd.f32 %v4537_v38, %v4536_v0 }
 0x6d8   :  { %v4489_v5 = vsel %vm2087_vm2, %v4467_v47, 0.0  ;;  %v4517_v48 = vmul.f32 %v4467_v47, %v4467_v47 }
 0x6d9   :  { %v4490_v40 = vadd.f32 %v4489_v5, %v4488_v29  ;;  %v9404_v63 = vpop.f32.mrb[20].mxu1 }
 0x6da   :  { %v4539_v51 = vsel %vm2087_vm2, %v4517_v48, 0.0  ;;  %v4468_v9 = vmul.f32 %v9404_v63, %v8514_v25  ;;  %v6662_v50 = vpop.f32.mrb[21].mxu1 }
 0x6db   :  { %v4540_v62 = vadd.f32 %v4539_v51, %v4538_v27 }
 0x6dc   :  { %v4491_v18 = vsel %vm2087_vm2, %v4468_v9, 0.0  ;;  %v4518_v53 = vmul.f32 %v4468_v9, %v4468_v9 }
 0x6dd   :  { %v4492_v56 = vadd.f32 %v4491_v18, %v4490_v40  ;;  %v9410_v15 = vpop.f32.mrb[22].mxu1 }
 0x6de   :  { %v4541_v46 = vsel %vm2087_vm2, %v4518_v53, 0.0  ;;  %v4469_v55 = vmul.f32 %v9410_v15, %v8522_v37  ;;  %v6665_v57 = vpop.f32.mrb[23].mxu1 }
 0x6df   :  { %v4542_v58 = vadd.f32 %v4541_v46, %v4540_v62 }
 0x6e0   :  { %v4493_v59 = vsel %vm2087_vm2, %v4469_v55, 0.0  ;;  %v4519_v61 = vmul.f32 %v4469_v55, %v4469_v55 }
 0x6e1   :  { %v4494_v1 = vadd.f32 %v4493_v59, %v4492_v56  ;;  %v9416_v25 = vpop.f32.mrb[24].mxu1 }
 0x6e2   :  { %v4543_v32 = vsel %vm2087_vm2, %v4519_v61, 0.0  ;;  %v4470_v31 = vmul.f32 %v9416_v25, %v8530_v49  ;;  %v6668_v3 = vpop.f32.mrb[25].mxu1 }
 0x6e3   :  { %v4544_v7 = vadd.f32 %v4543_v32, %v4542_v58 }
 0x6e4   :  { %v4495_v6 = vsel %vm2087_vm2, %v4470_v31, 0.0  ;;  %v4520_v8 = vmul.f32 %v4470_v31, %v4470_v31 }
 0x6e5   :  { %v4496_v11 = vadd.f32 %v4495_v6, %v4494_v1  ;;  %v9422_v37 = vpop.f32.mrb[26].mxu1 }
 0x6e6   :  { %v4545_v12 = vsel %vm2087_vm2, %v4520_v8, 0.0  ;;  %v4471_v16 = vmul.f32 %v9422_v37, %v8538_v60  ;;  %v6671_v20 = vpop.f32.mrb[27].mxu1 }
 0x6e7   :  { %v4546_v22 = vadd.f32 %v4545_v12, %v4544_v7  ;;  %v4717_v7 = vld [vmem:[%s9544_s7] sm:$0x1] }
 0x6e8   :  { %v4497_v4 = vsel %vm2087_vm2, %v4471_v16, 0.0  ;;  %v4521_v23 = vmul.f32 %v4471_v16, %v4471_v16 }
 0x6e9   :  { %v4498_v24 = vadd.f32 %v4497_v4, %v4496_v11  ;;  %v9428_v49 = vpop.f32.mrb[28].mxu1  ;;  %v4721_v11 = vld [vmem:[%s9545_s8] sm:$0x1] }
 0x6ea   :  { %v4547_v26 = vsel %vm2087_vm2, %v4521_v23, 0.0  ;;  %v4472_v33 = vmul.f32 %v9428_v49, %v8546_v13  ;;  %v6674_v34 = vpop.f32.mrb[29].mxu1 }
 0x6eb   :  { %v4548_v35 = vadd.f32 %v4547_v26, %v4546_v22 }
 0x6ec   :  { %v4499_v39 = vsel %vm2087_vm2, %v4472_v33, 0.0  ;;  %v4522_v42 = vmul.f32 %v4472_v33, %v4472_v33 }
 0x6ed   :  { %v4500_v43 = vadd.f32 %v4499_v39, %v4498_v24  ;;  %v4440_v60 = vpop.f32.mrb[30].mxu1 }
 0x6ee   :  { %v4549_v0 = vsel %vm2087_vm2, %v4522_v42, 0.0  ;;  %v4473_v10 = vmul.f32 %v4440_v60, %v8554_v30  ;;  %v6677_v19 = vpop.f32.mrb[31].mxu1 }
 0x6ef   :  { %v4550_v29 = vadd.f32 %v4549_v0, %v4548_v35 }
 0x6f0   :  { %v4501_v38 = vsel %vm2087_vm2, %v4473_v10, 0.0  ;;  %v4523_v47 = vmul.f32 %v4473_v10, %v4473_v10 }
 0x6f1   :  { %v4502_v2 = vadd.f32 %v4501_v38, %v4500_v43 }
 0x6f2   :  { %v4551_v27 = vsel %vm2087_vm2, %v4523_v47, 0.0 }
 0x6f3   :  { %v4503_v13 = vrot.slane %v4502_v2, 4  ;;  %v4552_v5 = vadd.f32 %v4551_v27, %v4550_v29 }
 0x6f5   :  { %v4504_v48 = vadd.f32 %v4503_v13, %v4502_v2  ;;  %v4553_v40 = vrot.slane %v4552_v5, 4 }
 0x6f7   :  { %v4505_v51 = vrot.slane %v4504_v48, 2  ;;  %v4554_v9 = vadd.f32 %v4553_v40, %v4552_v5 }
 0x6f9   :  { %v4506_v50 = vadd.f32 %v4505_v51, %v4504_v48  ;;  %v4555_v62 = vrot.slane %v4554_v9, 2 }
 0x6fb   :  { %v4507_v18 = vrot.slane %v4506_v50, 1  ;;  %v4556_v53 = vadd.f32 %v4555_v62, %v4554_v9 }
 0x6fd   :  { %v4508_v56 = vadd.f32 %v4507_v18, %v4506_v50  ;;  %v4557_v30 = vrot.slane %v4556_v53, 1 }
 0x6ff   :  { %6695 = vmatmul.mubr.msk.f32.vlgmr.msra.gmra.mrb[32].mxu1 %vm2087_vm2, %v4508_v56  ;;  %v4558_v46 = vadd.f32 %v4557_v30, %v4556_v53 }
 0x701   :  { %6714 = vmatmul.mubr.msk.f32.vlgmr.msra.gmra.mrb[32].mxu0 %vm2087_vm2, %v4558_v46 }
 0x7d2   :  { %v4636_v55 = vpop.f32.mrb[32].mxu1 }
 0x7d3   :  { %v4713_v57 = vmul.f32 0.001953125, %v4636_v55  ;;  %v6696_v58 = vpop.f32.mrb[33].mxu1 }
 0x7d4   :  { %v4709_v59 = vpop.f32.mrb[32].mxu0 }
 0x7d5   :  { %v4715_v61 = vmul.f32 %v4713_v57, %v4713_v57  ;;  %v4714_v1 = vmul.f32 0.001953125, %v4709_v59  ;;  %v6715_v32 = vpop.f32.mrb[33].mxu0 }
 0x7d7   :  { %v4716_v31 = vsub.f32 %v4714_v1, %v4715_v61 }
 0x7d9   :  { %v4718_v3 = vadd.f32 1e-05, %v4716_v31 }
 0x7db   :  { %7414 = vrsqrt.f32 %v4718_v3 }
 0x7e5   :  { %v7415_v6 = vpop.eup %7414 }
 0x7e6   :  { %v4720_v8 = vmul.f32 %v7415_v6, %v4717_v7 }
 0x7e8   :  { %v4722_v12 = vmul.f32 %v4720_v8, %v4713_v57  ;;  %v4728_v16 = vrot.slane %v4720_v8, %v8631_v21 }
 0x7ea   :  { %v4723_v20 = vsub.f32 %v4721_v11, %v4722_v12  ;;  %v4730_v22 = vmul.f32 %v4728_v16, %v9351_v41  ;;  %v4731_v4 = vmul.f32 %v4728_v16, %v9355_v44  ;;  %v4732_v23 = vmul.f32 %v4728_v16, %v9361_v17 }
 0x7eb   :  { %v4733_v24 = vmul.f32 %v4728_v16, %v9368_v52  ;;  %v4734_v26 = vmul.f32 %v4728_v16, %v9374_v14  ;;  %v4735_v33 = vmul.f32 %v4728_v16, %v9380_v28  ;;  %v4736_v34 = vmul.f32 %v4728_v16, %v9386_v36 }
 0x7ec   :  { %v4737_v35 = vmul.f32 %v4728_v16, %v9392_v45  ;;  %v4738_v39 = vmul.f32 %v4728_v16, %v9398_v54  ;;  %v4739_v42 = vmul.f32 %v4728_v16, %v9404_v63  ;;  %v4740_v41 = vmul.f32 %v4728_v16, %v9410_v15 }
 0x7ed   :  { %v4741_v44 = vmul.f32 %v4728_v16, %v9416_v25  ;;  %v4742_v17 = vmul.f32 %v4728_v16, %v9422_v37  ;;  %v4743_v52 = vmul.f32 %v4728_v16, %v9428_v49  ;;  %v4744_v43 = vmul.f32 %v4728_v16, %v4440_v60 }
 0x7ee   :  { %v4749_v14 = vrot.slane %v4723_v20, %v8631_v21 }
 0x7f0   :  { %v4751_v28 = vadd.f32 %v4749_v14, %v4730_v22  ;;  %v4752_v0 = vadd.f32 %v4749_v14, %v4731_v4  ;;  %v4753_v36 = vadd.f32 %v4749_v14, %v4732_v23  ;;  %v4754_v10 = vadd.f32 %v4749_v14, %v4733_v24 }
 0x7f1   :  { %v4755_v45 = vadd.f32 %v4749_v14, %v4734_v26  ;;  %v4756_v19 = vadd.f32 %v4749_v14, %v4735_v33  ;;  %v4757_v54 = vadd.f32 %v4749_v14, %v4736_v34  ;;  %v4758_v29 = vadd.f32 %v4749_v14, %v4737_v35 }
 0x7f2   :  { %v4759_v63 = vadd.f32 %v4749_v14, %v4738_v39  ;;  %v4760_v38 = vadd.f32 %v4749_v14, %v4739_v42  ;;  %v4761_v15 = vadd.f32 %v4749_v14, %v4740_v41  ;;  %v4762_v47 = vadd.f32 %v4749_v14, %v4741_v44 }
 0x7f3   :  { %v4763_v25 = vadd.f32 %v4749_v14, %v4742_v17  ;;  %v4764_v2 = vadd.f32 %v4749_v14, %v4743_v52  ;;  %v4765_v37 = vadd.f32 %v4749_v14, %v4744_v43  ;;  %vm4766_vm0 = vcmp.ge.f32.partialorder %v4751_v28, 0.0 }
 0x7f4   :  { %vm4767_vm4 = vcmp.ge.f32.partialorder %v4752_v0, 0.0  ;;  %vm4768_vm5 = vcmp.ge.f32.partialorder %v4753_v36, 0.0  ;;  %vm4769_vm6 = vcmp.ge.f32.partialorder %v4754_v10, 0.0  ;;  %vm4770_vm7 = vcmp.ge.f32.partialorder %v4755_v45, 0.0 }
 0x7f5   :  { %vm4771_vm8 = vcmp.ge.f32.partialorder %v4756_v19, 0.0  ;;  %vm4772_vm9 = vcmp.ge.f32.partialorder %v4757_v54, 0.0  ;;  %vm4773_vm10 = vcmp.ge.f32.partialorder %v4758_v29, 0.0  ;;  %vm4774_vm11 = vcmp.ge.f32.partialorder %v4759_v63, 0.0 }
 0x7f6   :  { %vm4775_vm12 = vcmp.ge.f32.partialorder %v4760_v38, 0.0  ;;  %vm4776_vm13 = vcmp.ge.f32.partialorder %v4761_v15, 0.0  ;;  %vm4777_vm14 = vcmp.ge.f32.partialorder %v4762_v47, 0.0  ;;  %vm4778_vm15 = vcmp.ge.f32.partialorder %v4763_v25, 0.0 }
 0x7f7   :  { %vm4779_vm1 = vcmp.ge.f32.partialorder %v4764_v2, 0.0  ;;  %vm4780_vm3 = vcmp.ge.f32.partialorder %v4765_v37, 0.0  ;;  %v4781_v21 = vmul.f32 0.01, %v4751_v28  ;;  %v4782_v49 = vmul.f32 0.01, %v4752_v0 }
 0x7f8   :  { %v4783_v60 = vmul.f32 0.01, %v4753_v36  ;;  %v4784_v27 = vmul.f32 0.01, %v4754_v10  ;;  %v4785_v13 = vmul.f32 0.01, %v4755_v45 }
 0x7f9   :  { %v4786_v5 = vmul.f32 0.01, %v4756_v19  ;;  %v4787_v48 = vmul.f32 0.01, %v4757_v54  ;;  %v4788_v40 = vmul.f32 0.01, %v4758_v29  ;;  %v4796_v51 = vsel %vm4766_vm0, %v4751_v28, %v4781_v21 }
 0x7fa   :  { %v4789_v9 = vmul.f32 0.01, %v4759_v63  ;;  %v4790_v50 = vmul.f32 0.01, %v4760_v38  ;;  %v4791_v62 = vmul.f32 0.01, %v4761_v15  ;;  %v4797_v18 = vsel %vm4767_vm4, %v4752_v0, %v4782_v49 }
 0x7fb   :  { %4811 = vst.msk [vmem:[%s9546_s9] sm:$0xff] %vm2087_vm2, %v4796_v51  ;;  %v4792_v53 = vmul.f32 0.01, %v4762_v47  ;;  %v4793_v56 = vmul.f32 0.01, %v4763_v25  ;;  %v4798_v46 = vsel %vm4768_vm5, %v4753_v36, %v4783_v60  ;;  %4812 = vst.msk [vmem:[%s9546_s9 + $0x8] sm:$0xff] %vm2087_vm2, %v4797_v18  ;;  %v4799_v57 = vsel %vm4769_vm6, %v4754_v10, %v4784_v27 }
 0x7fc   :  { %v4794_v30 = vmul.f32 0.01, %v4764_v2  ;;  %v4795_v55 = vmul.f32 0.01, %v4765_v37  ;;  %v4800_v58 = vsel %vm4770_vm7, %v4755_v45, %v4785_v13  ;;  %v4801_v59 = vsel %vm4771_vm8, %v4756_v19, %v4786_v5  ;;  %4813 = vst.msk [vmem:[%s9546_s9 + $0x10] sm:$0xff] %vm2087_vm2, %v4798_v46  ;;  %4814 = vst.msk [vmem:[%s9546_s9 + $0x18] sm:$0xff] %vm2087_vm2, %v4799_v57 }
 0x7fd   :  { %v4802_v61 = vsel %vm4772_vm9, %v4757_v54, %v4787_v48  ;;  %v4803_v1 = vsel %vm4773_vm10, %v4758_v29, %v4788_v40  ;;  %v4804_v32 = vsel %vm4774_vm11, %v4759_v63, %v4789_v9  ;;  %v4805_v31 = vsel %vm4775_vm12, %v4760_v38, %v4790_v50  ;;  %4815 = vst.msk [vmem:[%s9546_s9 + $0x20] sm:$0xff] %vm2087_vm2, %v4800_v58 }
 0x7fe   :  { %4816 = vst.msk [vmem:[%s9546_s9 + $0x28] sm:$0xff] %vm2087_vm2, %v4801_v59  ;;  %v4806_v3 = vsel %vm4776_vm13, %v4761_v15, %v4791_v62  ;;  %v4807_v7 = vsel %vm4777_vm14, %v4762_v47, %v4792_v53  ;;  %v4808_v6 = vsel %vm4778_vm15, %v4763_v25, %v4793_v56  ;;  %v4809_v8 = vsel %vm4779_vm1, %v4764_v2, %v4794_v30 }
 0x7ff   :  { %4817 = vst.msk [vmem:[%s9546_s9 + $0x30] sm:$0xff] %vm2087_vm2, %v4802_v61  ;;  %4818 = vst.msk [vmem:[%s9546_s9 + $0x38] sm:$0xff] %vm2087_vm2, %v4803_v1  ;;  %v4810_v11 = vsel %vm4780_vm3, %v4765_v37, %v4795_v55 }
 0x800   :  { %4819 = vst.msk [vmem:[%s9546_s9 + $0x40] sm:$0xff] %vm2087_vm2, %v4804_v32  ;;  %4820 = vst.msk [vmem:[%s9546_s9 + $0x48] sm:$0xff] %vm2087_vm2, %v4805_v31 }
 0x801   :  { %4821 = vst.msk [vmem:[%s9546_s9 + $0x50] sm:$0xff] %vm2087_vm2, %v4806_v3  ;;  %4822 = vst.msk [vmem:[%s9546_s9 + $0x58] sm:$0xff] %vm2087_vm2, %v4807_v7 }
 0x802   :  { %4823 = vst.msk [vmem:[%s9546_s9 + $0x60] sm:$0xff] %vm2087_vm2, %v4808_v6  ;;  %4824 = vst.msk [vmem:[%s9546_s9 + $0x68] sm:$0xff] %vm2087_vm2, %v4809_v8 }
 0x803   :  { %4825 = vst.msk [vmem:[%s9546_s9 + $0x70] sm:$0xff] %vm2087_vm2, %v4810_v11 }

</bundles_post_ra>
